<compile_context>
chip_gen: v6e
topology: v6e:2x2x1
jax: 0.10.0
libtpu: 0.0.40
codegen_flags: <defaults>
</compile_context>

<pallas_src>
import math
import sys

import numpy as np
import jax
import jax.numpy as jnp
from jax import lax
from jax.experimental import pallas as pl
from jax.experimental.pallas import tpu as pltpu

EPS = 1e-5                     # args.norm_eps
WEIGHT_DTYPE = jnp.bfloat16    # resident GEMM-weight dtype (f32 accumulation on the MXU)
CACHE_DTYPE = jnp.bfloat16     # persistent KV-cache dtype


def _pair_swap_matrix(n):
    # (x @ P)[j] == x[j ^ 1]  (adjacent even/odd pair swap) -- matmul-RoPE fallback only.
    idx = np.arange(n)
    P = np.zeros((n, n), np.float32)
    P[idx ^ 1, idx] = 1.0
    return jnp.asarray(P)


def make_encoder_block_kernel(n_heads, n_kv_heads, head_dim, rope_mode):
    assert rope_mode in ("roll", "matmul")
    n_rep = n_heads // n_kv_heads
    hd = head_dim
    scale = 1.0 / math.sqrt(head_dim)

    def kernel(sp_ref,                                   # scalar prefetch: start_pos (SMEM)
               x_ref, ck_ref, cv_ref,                    # x (Bt,D) f32; caches (Bt,S,KVD) bf16
               aw_ref, fw_ref,                           # RMSNorm scales (1, D) f32
               wq_ref, wk_ref, wv_ref, wo_ref,           # attention projections (bf16)
               cosq_ref, sinq_ref, cosk_ref, sink_ref,   # rotary (1,QD)/(1,KVD) f32
               pq_ref, pk_ref,                           # pair-swap mats (matmul-RoPE fallback)
               w1_ref, w3_ref, w2_ref,                   # FFN weights (bf16)
               out_ref, nck_ref, ncv_ref,                # out (Bt,D); new cache rows (Bt,1,KVD)
               attn_scr):                                # VMEM scratch (Bt, QD) f32
        sp = sp_ref[0]
        S = ck_ref.shape[1]
        wdt = wq_ref.dtype
        cdt = nck_ref.dtype

        x = x_ref[...]                                                # (Bt, D) f32

        # ---- attention RMSNorm (f32 math) ----
        xn = x * lax.rsqrt(jnp.mean(x * x, axis=-1, keepdims=True) + EPS) * aw_ref[...]
        xn_w = xn.astype(wdt)

        # ---- QKV projections: (Bt, D) @ (D, N) GEMMs, f32 accumulation ----
        q = jnp.dot(xn_w, wq_ref[...], preferred_element_type=jnp.float32)   # (Bt, QD)
        k = jnp.dot(xn_w, wk_ref[...], preferred_element_type=jnp.float32)   # (Bt, KVD)
        v = jnp.dot(xn_w, wv_ref[...], preferred_element_type=jnp.float32)   # (Bt, KVD)

        # ---- RoPE on all heads at once (interleaved complex pairs) ----
        #   out[2i]   = t[2i]*c_i - t[2i+1]*s_i ;  out[2i+1] = t[2i]*s_i + t[2i+1]*c_i
        # sin vectors are sign-interleaved [-s, +s, ...]; the pair swap t[j] -> t[j^1] is two
        # XLU lane rolls + a parity select ("roll" mode) or a permutation matmul fallback.
        if rope_mode == "roll":
            def pair_swap(t):
                w = t.shape[-1]
                par = lax.broadcasted_iota(jnp.int32, t.shape, 1) & 1
                return jnp.where(par == 0,
                                 pltpu.roll(t, shift=w - 1, axis=1),   # t[j+1] for even j
                                 pltpu.roll(t, shift=1, axis=1))       # t[j-1] for odd j
            q_sw = pair_swap(q)
            k_sw = pair_swap(k)
        else:
            q_sw = jnp.dot(q, pq_ref[...], preferred_element_type=jnp.float32)
            k_sw = jnp.dot(k, pk_ref[...], preferred_element_type=jnp.float32)
        q = (q * cosq_ref[...] + q_sw * sinq_ref[...]) * scale        # fold 1/sqrt(hd) into q
        k = k * cosk_ref[...] + k_sw * sink_ref[...]

        # ---- write ONLY the new cache row (cache outputs alias the cache inputs) ----
        nck_ref[:, 0, :] = k.astype(cdt)
        ncv_ref[:, 0, :] = v.astype(cdt)

        # cached positions strictly before the new token are valid (new token added separately)
        pos = lax.broadcasted_iota(jnp.int32, (1, 1, S), 2)
        valid = pos < sp                                               # (1, 1, S)

        # ---- attention, batched over the whole Bt block (GQA by head indexing) ----
        # TODO(synk): stream only the live cache prefix (<= start_pos) with a manual
        # double-buffered S-tile loop for real sequence lengths.
        for g in range(n_kv_heads):
            lo = g * hd
            k_old = ck_ref[:, :, lo:lo + hd]                           # (Bt, S, hd) bf16
            v_old = cv_ref[:, :, lo:lo + hd]                           # (Bt, S, hd) bf16
            k_new = k[:, lo:lo + hd]                                   # (Bt, hd) f32
            v_new = v[:, lo:lo + hd]                                   # (Bt, hd) f32
            for r in range(n_rep):
                h = g * n_rep + r
                q_h = q[:, h * hd:(h + 1) * hd]                        # (Bt, hd) f32 (scaled)
                # scores vs. cached prefix: one batched matmul over the whole Bt block
                s_old = jnp.einsum('bqd,bsd->bqs',
                                   q_h[:, None, :].astype(cdt), k_old,
                                   preferred_element_type=jnp.float32)  # (Bt, 1, S)
                s_old = jnp.where(valid, s_old, -1e30)
                # new-token score
                s_new = jnp.sum(q_h * k_new, axis=-1, keepdims=True)[:, None, :]  # (Bt,1,1)

                m = jnp.maximum(jnp.max(s_old, axis=-1, keepdims=True), s_new)
                p_old = jnp.exp(s_old - m)                             # masked lanes -> 0
                p_new = jnp.exp(s_new - m)
                inv = pl.reciprocal(
                    jnp.sum(p_old, axis=-1, keepdims=True) + p_new, approx=True)
                o = (jnp.einsum('bqs,bsd->bqd', p_old.astype(cdt), v_old,
                                preferred_element_type=jnp.float32)
                     + p_new * v_new[:, None, :]) * inv                # (Bt, 1, hd)
                # lane-dense (Bt, hd) slab store -- no per-batch loop / per-row stores
                attn_scr[:, h * hd:(h + 1) * hd] = o[:, 0, :]

        # ---- output projection + residual ----
        attn = attn_scr[...]                                           # (Bt, QD) f32
        attn_out = jnp.dot(attn.astype(wdt), wo_ref[...],
                           preferred_element_type=jnp.float32)         # (Bt, D)
        h_res = x + attn_out

        # ---- FFN RMSNorm + SwiGLU ----
        hn = (h_res * lax.rsqrt(jnp.mean(h_res * h_res, axis=-1, keepdims=True) + EPS)
              * fw_ref[...])
        hn_w = hn.astype(wdt)
        a1 = jnp.dot(hn_w, w1_ref[...], preferred_element_type=jnp.float32)
        a3 = jnp.dot(hn_w, w3_ref[...], preferred_element_type=jnp.float32)
        gated = (a1 * jax.nn.sigmoid(a1) * a3).astype(wdt)             # SiLU(w1 x) * (w3 x)
        ff = jnp.dot(gated, w2_ref[...], preferred_element_type=jnp.float32)

        out_ref[...] = (h_res + ff).astype(out_ref.dtype)

    return kernel


# ----------------------- one-time conversions to the persistent kernel formats ----------------
def prepare_params(params):
    """Convert EncoderBlock weights to the kernel-resident formats (bf16 GEMM weights,
    f32 RMSNorm scales). Do this once, NOT per decode step."""
    prepared = {}
    for name in ("wq", "wk", "wv", "wo", "w1", "w3", "w2"):
        prepared[name] = jnp.asarray(params[name], WEIGHT_DTYPE)
    for name in ("attn_norm", "ffn_norm"):
        prepared[name] = jnp.asarray(params[name], jnp.float32)
    return prepared


def prepare_cache(cache, n_kv_heads, head_dim):
    """One-time conversion of a (B, S, n_kv_heads, head_dim) cache into the kernel's persistent
    (B, S, n_kv_heads*head_dim) bf16 layout (no singleton axis -> no sublane padding)."""
    B, S = cache.shape[:2]
    return jnp.asarray(cache, CACHE_DTYPE).reshape(B, S, n_kv_heads * head_dim)


def cache_to_module_layout(cache, n_kv_heads, head_dim, dtype=jnp.float32):
    B, S, _ = cache.shape
    return cache.reshape(B, S, n_kv_heads, head_dim).astype(dtype)


def _vmem_limit_bytes():
    # Re-derive the scoped-VMEM budget per generation (64 MiB/TC on v7x, 128 MiB on v5e/v6e)
    # instead of hard-coding it; leave headroom for double-buffered cache blocks + scratch.
    try:
        cap = int(pltpu.get_tpu_info().vmem_capacity_bytes)
    except Exception:
        cap = 64 * 1024 * 1024
    return max(16 * 1024 * 1024, min(cap * 3 // 4, 100 * 1024 * 1024))


def encoder_block_pallas(x, start_pos, cos, sin, params, cache_k, cache_v,
                         *, n_heads, n_kv_heads, block_b=None):
    """Llama EncoderBlock single-token decode step (seq_len == 1).

    x:               (B, 1, D) f32
    cos / sin:       (1, head_dim // 2) rotary factors for position `start_pos`
    params:          output of prepare_params (bf16 GEMM weights, f32 norm scales)
    cache_k/cache_v: (B, S, n_kv_heads*head_dim) persistent caches in CACHE_DTYPE

    Returns (out (B,1,D) f32, new_cache_k, new_cache_v) with the caches kept in the same
    persistent layout; only the row at `start_pos` is rewritten (aliased outputs).
    """
    B, Sq, D = x.shape
    assert Sq == 1, "kernel implements the single-token decode step (seq_len == 1)"
    hd = D // n_heads
    QD = n_heads * hd
    KVD = n_kv_heads * hd
    S = cache_k.shape[1]
    HID = params["w1"].shape[1]
    assert cache_k.shape == (B, S, KVD) and cache_v.shape == (B, S, KVD)

    # batch rows per grid step (the GEMM M dimension); grid is parallel over batch blocks.
    Bt = min(B, 8) if block_b is None else block_b
    while B % Bt:
        Bt -= 1

    wdt = WEIGHT_DTYPE
    cdt = CACHE_DTYPE

    x2 = x.reshape(B, D)   # seq==1 squeezed -> dense (Bt, D) blocks and unmasked stores

    # rotary helpers (interleaved complex layout), tiled across heads
    half = hd // 2
    cos_h = jnp.repeat(cos.reshape(half).astype(jnp.float32), 2)                  # (hd,)
    sin_h = jnp.stack([-sin.reshape(half), sin.reshape(half)],
                      axis=-1).reshape(hd).astype(jnp.float32)                    # (hd,)
    cos_q = jnp.tile(cos_h, n_heads)[None, :]                                     # (1, QD)
    sin_q = jnp.tile(sin_h, n_heads)[None, :]
    cos_k = jnp.tile(cos_h, n_kv_heads)[None, :]                                  # (1, KVD)
    sin_k = jnp.tile(sin_h, n_kv_heads)[None, :]
    p_q = _pair_swap_matrix(QD)       # only read by the matmul-RoPE fallback kernel
    p_k = _pair_swap_matrix(KVD)

    aw = params["attn_norm"].reshape(1, D).astype(jnp.float32)
    fw = params["ffn_norm"].reshape(1, D).astype(jnp.float32)
    wq = jnp.asarray(params["wq"], wdt)
    wk = jnp.asarray(params["wk"], wdt)
    wv = jnp.asarray(params["wv"], wdt)
    wo = jnp.asarray(params["wo"], wdt)
    w1 = jnp.asarray(params["w1"], wdt)
    w3 = jnp.asarray(params["w3"], wdt)
    w2 = jnp.asarray(params["w2"], wdt)

    sp = jnp.asarray([start_pos], dtype=jnp.int32)

    args = (sp, x2, cache_k, cache_v, aw, fw, wq, wk, wv, wo,
            cos_q, sin_q, cos_k, sin_k, p_q, p_k, w1, w3, w2)

    cparams = pltpu.CompilerParams(
        dimension_semantics=("parallel",),
        vmem_limit_bytes=_vmem_limit_bytes(),
    )
    # TODO(synk): for real Llama sizes, tile w1/w3/w2 (and wq/wo) over an extra 'arbitrary'
    # N-tile grid axis and split that axis across the two v7x TensorCores.

    def build(rope_mode, aliased, single_buffer_weights):
        kernel = make_encoder_block_kernel(n_heads, n_kv_heads, hd, rope_mode)

        def shared(shape):
            zeros = (0,) * len(shape)
            if single_buffer_weights:
                # constant-index weights never change across grid steps -> one buffer suffices
                return pl.BlockSpec(shape, lambda ib, sp_ref: zeros,
                                    pipeline_mode=pl.Buffered(1))
            return pl.BlockSpec(shape, lambda ib, sp_ref: zeros)

        in_specs = [
            pl.BlockSpec((Bt, D), lambda ib, sp_ref: (ib, 0)),             # x
            pl.BlockSpec((Bt, S, KVD), lambda ib, sp_ref: (ib, 0, 0)),     # cache_k
            pl.BlockSpec((Bt, S, KVD), lambda ib, sp_ref: (ib, 0, 0)),     # cache_v
            shared((1, D)), shared((1, D)),                                # norm scales
            shared((D, QD)), shared((D, KVD)), shared((D, KVD)), shared((QD, D)),
            shared((1, QD)), shared((1, QD)), shared((1, KVD)), shared((1, KVD)),
            shared((QD, QD)), shared((KVD, KVD)),                          # pair-swap fallback
            shared((D, HID)), shared((D, HID)), shared((HID, D)),          # FFN weights
        ]
        out_spec_x = pl.BlockSpec((Bt, D), lambda ib, sp_ref: (ib, 0))
        if aliased:
            # Cache outputs alias the cache inputs; only the row at start_pos is written back.
            out_shape = (
                jax.ShapeDtypeStruct((B, D), jnp.float32),
                jax.ShapeDtypeStruct((B, S, KVD), cdt),
                jax.ShapeDtypeStruct((B, S, KVD), cdt),
            )
            out_specs = [
                out_spec_x,
                pl.BlockSpec((Bt, 1, KVD), lambda ib, sp_ref: (ib, sp_ref[0], 0)),
                pl.BlockSpec((Bt, 1, KVD), lambda ib, sp_ref: (ib, sp_ref[0], 0)),
            ]
            aliases = {2: 1, 3: 2}   # scalar-prefetch operand counts as input 0
        else:
            out_shape = (
                jax.ShapeDtypeStruct((B, D), jnp.float32),
                jax.ShapeDtypeStruct((B, 1, KVD), cdt),
                jax.ShapeDtypeStruct((B, 1, KVD), cdt),
            )
            out_specs = [
                out_spec_x,
                pl.BlockSpec((Bt, 1, KVD), lambda ib, sp_ref: (ib, 0, 0)),
                pl.BlockSpec((Bt, 1, KVD), lambda ib, sp_ref: (ib, 0, 0)),
            ]
            aliases = {}
        grid_spec = pltpu.PrefetchScalarGridSpec(
            num_scalar_prefetch=1,
            grid=(B // Bt,),
            in_specs=in_specs,
            out_specs=out_specs,
            scratch_shapes=[pltpu.VMEM((Bt, QD), jnp.float32)],
        )
        return pl.pallas_call(
            kernel, out_shape=out_shape, grid_spec=grid_spec,
            compiler_params=cparams, input_output_aliases=aliases)

    # Preferred configuration first; every fallback is logged to stderr (never silent).
    configs = (
        dict(rope_mode="roll", aliased=True, single_buffer_weights=True),
        dict(rope_mode="roll", aliased=True, single_buffer_weights=False),
        dict(rope_mode="roll", aliased=False, single_buffer_weights=False),
        dict(rope_mode="matmul", aliased=True, single_buffer_weights=False),
        dict(rope_mode="matmul", aliased=False, single_buffer_weights=False),
    )
    res = None
    used = None
    last_err = None
    for cfg in configs:
        try:
            res = jax.block_until_ready(build(**cfg)(*args))
            used = cfg
            break
        except Exception as err:                        # log, never silently swallow
            print(f"# encoder_block_pallas: config {cfg} failed: "
                  f"{type(err).__name__}: {err}", file=sys.stderr)
            last_err = err
    if res is None:
        raise last_err

    out2, ck_out, cv_out = res
    if used["aliased"]:
        new_ck, new_cv = ck_out, cv_out
    else:
        new_ck = lax.dynamic_update_slice(cache_k, ck_out, (0, start_pos, 0))
        new_cv = lax.dynamic_update_slice(cache_v, cv_out, (0, start_pos, 0))
    return out2.reshape(B, 1, D), new_ck, new_cv


# ------------------- pure-JAX reference (mirrors the PyTorch module) -------------------
def encoder_block_ref(x, start_pos, cos, sin, params, cache_k, cache_v,
                      *, n_heads, n_kv_heads):
    B, Sq, D = x.shape
    hd = D // n_heads
    n_rep = n_heads // n_kv_heads

    def rms(t, w):
        ms = jnp.mean(t * t, axis=-1, keepdims=True)
        return w * (t * jax.lax.rsqrt(ms + EPS))

    xn = rms(x, params["attn_norm"])
    q = (xn @ params["wq"]).reshape(B, Sq, n_heads, hd)
    k = (xn @ params["wk"]).reshape(B, Sq, n_kv_heads, hd)
    v = (xn @ params["wv"]).reshape(B, Sq, n_kv_heads, hd)

    cosb = cos[None, :, None, :]
    sinb = sin[None, :, None, :]

    def rot(t):
        tr, ti = t[..., 0::2], t[..., 1::2]
        rr = tr * cosb - ti * sinb
        ri = tr * sinb + ti * cosb
        return jnp.stack([rr, ri], axis=-1).reshape(t.shape)

    q, k = rot(q), rot(k)
    cache_k = cache_k.at[:, start_pos:start_pos + Sq].set(k)
    cache_v = cache_v.at[:, start_pos:start_pos + Sq].set(v)
    keys = jnp.repeat(cache_k[:, :start_pos + Sq], n_rep, axis=2).transpose(0, 2, 1, 3)
    vals = jnp.repeat(cache_v[:, :start_pos + Sq], n_rep, axis=2).transpose(0, 2, 1, 3)
    qh = q.transpose(0, 2, 1, 3)
    scores = jnp.einsum("bhqd,bhkd->bhqk", qh, keys) / math.sqrt(hd)
    probs = jax.nn.softmax(scores, axis=-1)
    out = jnp.einsum("bhqk,bhkv->bhqv", probs, vals)
    out = out.transpose(0, 2, 1, 3).reshape(B, Sq, n_heads * hd)
    h = x + out @ params["wo"]

    hn = rms(h, params["ffn_norm"])
    ff = (jax.nn.silu(hn @ params["w1"]) * (hn @ params["w3"])) @ params["w2"]
    return h + ff, cache_k, cache_v


if __name__ == "__main__":
    # small ModelArgs-consistent shapes
    B = 2
    D = 64
    n_heads = 4
    n_kv_heads = 2
    hd = D // n_heads
    max_seq_len = 8
    start_pos = 3
    multiple_of = 32
    hidden = 4 * D
    hidden = int(2 * hidden / 3)
    hidden = multiple_of * ((hidden + multiple_of - 1) // multiple_of)   # 192

    key = jax.random.PRNGKey(0)
    ks = jax.random.split(key, 12)
    f32 = jnp.float32
    params = {
        "attn_norm": 1.0 + 0.1 * jax.random.normal(ks[0], (D,), f32),
        "ffn_norm": 1.0 + 0.1 * jax.random.normal(ks[1], (D,), f32),
        "wq": 0.05 * jax.random.normal(ks[2], (D, n_heads * hd), f32),
        "wk": 0.05 * jax.random.normal(ks[3], (D, n_kv_heads * hd), f32),
        "wv": 0.05 * jax.random.normal(ks[4], (D, n_kv_heads * hd), f32),
        "wo": 0.05 * jax.random.normal(ks[5], (n_heads * hd, D), f32),
        "w1": 0.05 * jax.random.normal(ks[6], (D, hidden), f32),
        "w3": 0.05 * jax.random.normal(ks[7], (D, hidden), f32),
        "w2": 0.05 * jax.random.normal(ks[8], (hidden, D), f32),
    }
    cache_k = 0.1 * jax.random.normal(ks[9], (B, max_seq_len, n_kv_heads, hd), f32)
    cache_v = 0.1 * jax.random.normal(ks[10], (B, max_seq_len, n_kv_heads, hd), f32)
    x = jax.random.normal(ks[11], (B, 1, D), f32)

    # rotary frequencies for the current position (freqs_complex -> cos/sin)
    half = hd // 2
    inv_freq = 1.0 / (10000.0 ** (np.arange(0, hd, 2, dtype=np.float32) / hd))
    angle = np.float32(start_pos) * inv_freq
    cos = jnp.asarray(np.cos(angle))[None, :]   # (seq_len=1, half)
    sin = jnp.asarray(np.sin(angle))[None, :]

    # one-time conversion to the kernel's persistent formats (NOT done per decode step)
    kparams = prepare_params(params)
    ck = prepare_cache(cache_k, n_kv_heads, hd)
    cv = prepare_cache(cache_v, n_kv_heads, hd)

    out, new_ck, new_cv = encoder_block_pallas(
        x, start_pos, cos, sin, kparams, ck, cv,
        n_heads=n_heads, n_kv_heads=n_kv_heads)
    out, new_ck, new_cv = jax.block_until_ready((out, new_ck, new_cv))

    out_ref, ck_ref, cv_ref = encoder_block_ref(
        x, start_pos, cos, sin, params, cache_k, cache_v,
        n_heads=n_heads, n_kv_heads=n_kv_heads)

    np.testing.assert_allclose(np.asarray(out), np.asarray(out_ref), rtol=2e-2, atol=2e-2)
    np.testing.assert_allclose(
        np.asarray(cache_to_module_layout(new_ck, n_kv_heads, hd)),
        np.asarray(ck_ref), rtol=2e-2, atol=2e-2)
    np.testing.assert_allclose(
        np.asarray(cache_to_module_layout(new_cv, n_kv_heads, hd)),
        np.asarray(cv_ref), rtol=2e-2, atol=2e-2)

    print("KERNEL_OK")
</pallas_src>

<mosaic_0001>
module attributes {stable_mosaic.version = 11 : i64} {
  func.func @kernel(%arg0: i32, %arg1: memref<1xi32, #tpu.memory_space<smem>>, %arg2: memref<2x64xf32, #tpu.memory_space<vmem>>, %arg3: memref<2x8x32xbf16, #tpu.memory_space<vmem>>, %arg4: memref<2x8x32xbf16, #tpu.memory_space<vmem>>, %arg5: memref<1x64xf32, #tpu.memory_space<vmem>>, %arg6: memref<1x64xf32, #tpu.memory_space<vmem>>, %arg7: memref<64x64xbf16, #tpu.memory_space<vmem>>, %arg8: memref<64x32xbf16, #tpu.memory_space<vmem>>, %arg9: memref<64x32xbf16, #tpu.memory_space<vmem>>, %arg10: memref<64x64xbf16, #tpu.memory_space<vmem>>, %arg11: memref<1x64xf32, #tpu.memory_space<vmem>>, %arg12: memref<1x64xf32, #tpu.memory_space<vmem>>, %arg13: memref<1x32xf32, #tpu.memory_space<vmem>>, %arg14: memref<1x32xf32, #tpu.memory_space<vmem>>, %arg15: memref<64x64xf32, #tpu.memory_space<vmem>>, %arg16: memref<32x32xf32, #tpu.memory_space<vmem>>, %arg17: memref<64x192xbf16, #tpu.memory_space<vmem>>, %arg18: memref<64x192xbf16, #tpu.memory_space<vmem>>, %arg19: memref<192x64xbf16, #tpu.memory_space<vmem>>, %arg20: memref<2x64xf32, #tpu.memory_space<vmem>>, %arg21: memref<2x1x32xbf16, #tpu.memory_space<vmem>>, %arg22: memref<2x1x32xbf16, #tpu.memory_space<vmem>>, %arg23: memref<2x64xf32, #tpu.memory_space<vmem>>) attributes {dimension_semantics = [#tpu.dimension_semantics<parallel>], iteration_bounds = array<i64: 1>, scalar_prefetch = 1 : i64, scratch_operands = 1 : i64, tpu.core_type = #tpu.core_type<tc>, window_params = [{transform_indices = @transform_0, window_bounds = array<i64: 2, 64>}, {transform_indices = @transform_1, window_bounds = array<i64: 2, 8, 32>}, {transform_indices = @transform_2, window_bounds = array<i64: 2, 8, 32>}, {pipeline_mode = #tpu.pipeline_mode<synchronous>, transform_indices = @transform_3, window_bounds = array<i64: 1, 64>}, {pipeline_mode = #tpu.pipeline_mode<synchronous>, transform_indices = @transform_4, window_bounds = array<i64: 1, 64>}, {pipeline_mode = #tpu.pipeline_mode<synchronous>, transform_indices = @transform_5, window_bounds = array<i64: 64, 64>}, {pipeline_mode = #tpu.pipeline_mode<synchronous>, transform_indices = @transform_6, window_bounds = array<i64: 64, 32>}, {pipeline_mode = #tpu.pipeline_mode<synchronous>, transform_indices = @transform_7, window_bounds = array<i64: 64, 32>}, {pipeline_mode = #tpu.pipeline_mode<synchronous>, transform_indices = @transform_8, window_bounds = array<i64: 64, 64>}, {pipeline_mode = #tpu.pipeline_mode<synchronous>, transform_indices = @transform_9, window_bounds = array<i64: 1, 64>}, {pipeline_mode = #tpu.pipeline_mode<synchronous>, transform_indices = @transform_10, window_bounds = array<i64: 1, 64>}, {pipeline_mode = #tpu.pipeline_mode<synchronous>, transform_indices = @transform_11, window_bounds = array<i64: 1, 32>}, {pipeline_mode = #tpu.pipeline_mode<synchronous>, transform_indices = @transform_12, window_bounds = array<i64: 1, 32>}, {pipeline_mode = #tpu.pipeline_mode<synchronous>, transform_indices = @transform_13, window_bounds = array<i64: 64, 64>}, {pipeline_mode = #tpu.pipeline_mode<synchronous>, transform_indices = @transform_14, window_bounds = array<i64: 32, 32>}, {pipeline_mode = #tpu.pipeline_mode<synchronous>, transform_indices = @transform_15, window_bounds = array<i64: 64, 192>}, {pipeline_mode = #tpu.pipeline_mode<synchronous>, transform_indices = @transform_16, window_bounds = array<i64: 64, 192>}, {pipeline_mode = #tpu.pipeline_mode<synchronous>, transform_indices = @transform_17, window_bounds = array<i64: 192, 64>}, {transform_indices = @transform_18, window_bounds = array<i64: 2, 64>}, {transform_indices = @transform_19, window_bounds = array<i64: 2, 1, 32>}, {transform_indices = @transform_20, window_bounds = array<i64: 2, 1, 32>}]} {
    %c0 = arith.constant 0 : index
    %0 = memref.load %arg1[%c0] : memref<1xi32, #tpu.memory_space<smem>>
    %c0_0 = arith.constant 0 : index
    %c0_1 = arith.constant 0 : index
    %1 = vector.load %arg2[%c0_0, %c0_1] : memref<2x64xf32, #tpu.memory_space<vmem>>, vector<2x64xf32>
    %2 = arith.mulf %1, %1 : vector<2x64xf32>
    %cst = arith.constant dense<0.000000e+00> : vector<2xf32>
    %3 = vector.multi_reduction <add>, %2, %cst [1] : vector<2x64xf32> to vector<2xf32>
    %4 = vector.shape_cast %3 : vector<2xf32> to vector<2x1xf32>
    %cst_2 = arith.constant 6.400000e+01 : f32
    %5 = vector.broadcast %cst_2 : f32 to vector<2x1xf32>
    %6 = arith.divf %4, %5 : vector<2x1xf32>
    %cst_3 = arith.constant 9.99999974E-6 : f32
    %7 = vector.broadcast %cst_3 : f32 to vector<2x1xf32>
    %8 = arith.addf %6, %7 : vector<2x1xf32>
    %9 = math.rsqrt %8 : vector<2x1xf32>
    %10 = vector.broadcast %9 : vector<2x1xf32> to vector<2x64xf32>
    %11 = arith.mulf %1, %10 : vector<2x64xf32>
    %c0_4 = arith.constant 0 : index
    %c0_5 = arith.constant 0 : index
    %12 = vector.load %arg5[%c0_4, %c0_5] : memref<1x64xf32, #tpu.memory_space<vmem>>, vector<1x64xf32>
    %13 = vector.broadcast %12 : vector<1x64xf32> to vector<2x64xf32>
    %14 = arith.mulf %11, %13 : vector<2x64xf32>
    %15 = arith.truncf %14 : vector<2x64xf32> to vector<2x64xbf16>
    %c0_6 = arith.constant 0 : index
    %c0_7 = arith.constant 0 : index
    %16 = vector.load %arg7[%c0_6, %c0_7] : memref<64x64xbf16, #tpu.memory_space<vmem>>, vector<64x64xbf16>
    %cst_8 = arith.constant dense<0.000000e+00> : vector<2x64xf32>
    %17 = tpu.matmul %15, %16, %cst_8 {dimension_numbers = #tpu.dot_dimension_numbers<[1], [0], [0], [1], [0, 0, 1, 1], [], []>} : vector<2x64xbf16>, vector<64x64xbf16>, vector<2x64xf32> -> vector<2x64xf32>
    %c0_9 = arith.constant 0 : index
    %c0_10 = arith.constant 0 : index
    %18 = vector.load %arg8[%c0_9, %c0_10] : memref<64x32xbf16, #tpu.memory_space<vmem>>, vector<64x32xbf16>
    %cst_11 = arith.constant dense<0.000000e+00> : vector<2x32xf32>
    %19 = tpu.matmul %15, %18, %cst_11 {dimension_numbers = #tpu.dot_dimension_numbers<[1], [0], [0], [1], [0, 0, 1, 1], [], []>} : vector<2x64xbf16>, vector<64x32xbf16>, vector<2x32xf32> -> vector<2x32xf32>
    %c0_12 = arith.constant 0 : index
    %c0_13 = arith.constant 0 : index
    %20 = vector.load %arg9[%c0_12, %c0_13] : memref<64x32xbf16, #tpu.memory_space<vmem>>, vector<64x32xbf16>
    %cst_14 = arith.constant dense<0.000000e+00> : vector<2x32xf32>
    %21 = tpu.matmul %15, %20, %cst_14 {dimension_numbers = #tpu.dot_dimension_numbers<[1], [0], [0], [1], [0, 0, 1, 1], [], []>} : vector<2x64xbf16>, vector<64x32xbf16>, vector<2x32xf32> -> vector<2x32xf32>
    %22 = tpu.iota {dimensions = array<i32: 1>} : vector<2x64xi32>
    %c1_i32 = arith.constant 1 : i32
    %23 = vector.broadcast %c1_i32 : i32 to vector<2x64xi32>
    %24 = arith.andi %22, %23 : vector<2x64xi32>
    %c0_i32 = arith.constant 0 : i32
    %25 = vector.broadcast %c0_i32 : i32 to vector<2x64xi32>
    %26 = arith.cmpi eq, %24, %25 : vector<2x64xi32>
    %c63_i32 = arith.constant 63 : i32
    %27 = tpu.dynamic_rotate %17 by %c63_i32 dim 1 : vector<2x64xf32>, i32 -> vector<2x64xf32>
    %c1_i32_15 = arith.constant 1 : i32
    %28 = tpu.dynamic_rotate %17 by %c1_i32_15 dim 1 : vector<2x64xf32>, i32 -> vector<2x64xf32>
    %29 = arith.select %26, %27, %28 : vector<2x64xi1>, vector<2x64xf32>
    %30 = tpu.iota {dimensions = array<i32: 1>} : vector<2x32xi32>
    %c1_i32_16 = arith.constant 1 : i32
    %31 = vector.broadcast %c1_i32_16 : i32 to vector<2x32xi32>
    %32 = arith.andi %30, %31 : vector<2x32xi32>
    %c0_i32_17 = arith.constant 0 : i32
    %33 = vector.broadcast %c0_i32_17 : i32 to vector<2x32xi32>
    %34 = arith.cmpi eq, %32, %33 : vector<2x32xi32>
    %c31_i32 = arith.constant 31 : i32
    %35 = tpu.dynamic_rotate %19 by %c31_i32 dim 1 : vector<2x32xf32>, i32 -> vector<2x32xf32>
    %c1_i32_18 = arith.constant 1 : i32
    %36 = tpu.dynamic_rotate %19 by %c1_i32_18 dim 1 : vector<2x32xf32>, i32 -> vector<2x32xf32>
    %37 = arith.select %34, %35, %36 : vector<2x32xi1>, vector<2x32xf32>
    %c0_19 = arith.constant 0 : index
    %c0_20 = arith.constant 0 : index
    %38 = vector.load %arg11[%c0_19, %c0_20] : memref<1x64xf32, #tpu.memory_space<vmem>>, vector<1x64xf32>
    %39 = vector.broadcast %38 : vector<1x64xf32> to vector<2x64xf32>
    %40 = arith.mulf %17, %39 : vector<2x64xf32>
    %c0_21 = arith.constant 0 : index
    %c0_22 = arith.constant 0 : index
    %41 = vector.load %arg12[%c0_21, %c0_22] : memref<1x64xf32, #tpu.memory_space<vmem>>, vector<1x64xf32>
    %42 = vector.broadcast %41 : vector<1x64xf32> to vector<2x64xf32>
    %43 = arith.mulf %29, %42 : vector<2x64xf32>
    %44 = arith.addf %40, %43 : vector<2x64xf32>
    %cst_23 = arith.constant 2.500000e-01 : f32
    %45 = vector.broadcast %cst_23 : f32 to vector<2x64xf32>
    %46 = arith.mulf %44, %45 : vector<2x64xf32>
    %c0_24 = arith.constant 0 : index
    %c0_25 = arith.constant 0 : index
    %47 = vector.load %arg13[%c0_24, %c0_25] : memref<1x32xf32, #tpu.memory_space<vmem>>, vector<1x32xf32>
    %48 = vector.broadcast %47 : vector<1x32xf32> to vector<2x32xf32>
    %49 = arith.mulf %19, %48 : vector<2x32xf32>
    %c0_26 = arith.constant 0 : index
    %c0_27 = arith.constant 0 : index
    %50 = vector.load %arg14[%c0_26, %c0_27] : memref<1x32xf32, #tpu.memory_space<vmem>>, vector<1x32xf32>
    %51 = vector.broadcast %50 : vector<1x32xf32> to vector<2x32xf32>
    %52 = arith.mulf %37, %51 : vector<2x32xf32>
    %53 = arith.addf %49, %52 : vector<2x32xf32>
    %54 = arith.truncf %53 : vector<2x32xf32> to vector<2x32xbf16>
    %c0_28 = arith.constant 0 : index
    %c0_29 = arith.constant 0 : index
    %c0_30 = arith.constant 0 : index
    %55 = vector.load %arg21[%c0_28, %c0_29, %c0_30] : memref<2x1x32xbf16, #tpu.memory_space<vmem>>, vector<2x1x32xbf16>
    %56 = vector.shape_cast %55 : vector<2x1x32xbf16> to vector<2x32xbf16>
    %57 = vector.shape_cast %54 : vector<2x32xbf16> to vector<2x1x32xbf16>
    tpu.vector_store %arg21[%c0_28, %c0_29, %c0_30], %57 {strides = array<i32>} : memref<2x1x32xbf16, #tpu.memory_space<vmem>>, vector<2x1x32xbf16>,
    %58 = arith.truncf %21 : vector<2x32xf32> to vector<2x32xbf16>
    %c0_31 = arith.constant 0 : index
    %c0_32 = arith.constant 0 : index
    %c0_33 = arith.constant 0 : index
    %59 = vector.load %arg22[%c0_31, %c0_32, %c0_33] : memref<2x1x32xbf16, #tpu.memory_space<vmem>>, vector<2x1x32xbf16>
    %60 = vector.shape_cast %59 : vector<2x1x32xbf16> to vector<2x32xbf16>
    %61 = vector.shape_cast %58 : vector<2x32xbf16> to vector<2x1x32xbf16>
    tpu.vector_store %arg22[%c0_31, %c0_32, %c0_33], %61 {strides = array<i32>} : memref<2x1x32xbf16, #tpu.memory_space<vmem>>, vector<2x1x32xbf16>,
    %62 = tpu.iota {dimensions = array<i32: 2>} : vector<1x1x8xi32>
    %63 = vector.broadcast %0 : i32 to vector<1x1x8xi32>
    %64 = arith.cmpi slt, %62, %63 : vector<1x1x8xi32>
    %c0_34 = arith.constant 0 : index
    %c0_35 = arith.constant 0 : index
    %c0_36 = arith.constant 0 : index
    %65 = vector.load %arg3[%c0_34, %c0_35, %c0_36] : memref<2x8x32xbf16, #tpu.memory_space<vmem>>, vector<2x8x16xbf16>
    %c0_37 = arith.constant 0 : index
    %c0_38 = arith.constant 0 : index
    %c0_39 = arith.constant 0 : index
    %66 = vector.load %arg4[%c0_37, %c0_38, %c0_39] : memref<2x8x32xbf16, #tpu.memory_space<vmem>>, vector<2x8x16xbf16>
    %67 = vector.extract_strided_slice %53 {offsets = [0, 0], sizes = [2, 16], strides = [1, 1]} : vector<2x32xf32> to vector<2x16xf32>
    %68 = vector.extract_strided_slice %21 {offsets = [0, 0], sizes = [2, 16], strides = [1, 1]} : vector<2x32xf32> to vector<2x16xf32>
    %69 = vector.extract_strided_slice %46 {offsets = [0, 0], sizes = [2, 16], strides = [1, 1]} : vector<2x64xf32> to vector<2x16xf32>
    %70 = vector.shape_cast %69 : vector<2x16xf32> to vector<2x1x16xf32>
    %71 = arith.truncf %70 : vector<2x1x16xf32> to vector<2x1x16xbf16>
    "tpu.trace_start"() <{level = 10 : i32, message = "bqd,bsd->bqs"}> : () -> ()
    %cst_40 = arith.constant dense<0.000000e+00> : vector<2x1x8xf32>
    %72 = tpu.matmul %71, %65, %cst_40 {dimension_numbers = #tpu.dot_dimension_numbers<[2], [2], [1], [1], [0, 0, 0, 1, 1, 1], [0], [0]>} : vector<2x1x16xbf16>, vector<2x8x16xbf16>, vector<2x1x8xf32> -> vector<2x1x8xf32>
    %cst_41 = arith.constant -1.000000e+30 : f32
    "tpu.trace_stop"() : () -> ()
    %73 = vector.shape_cast %64 : vector<1x1x8xi1> to vector<1x1x8xi1>
    %74 = vector.broadcast %73 : vector<1x1x8xi1> to vector<2x1x8xi1>
    %75 = vector.broadcast %cst_41 : f32 to vector<2x1x8xf32>
    %76 = arith.select %74, %72, %75 : vector<2x1x8xi1>, vector<2x1x8xf32>
    %77 = arith.mulf %69, %67 : vector<2x16xf32>
    %cst_42 = arith.constant dense<0.000000e+00> : vector<2xf32>
    %78 = vector.multi_reduction <add>, %77, %cst_42 [1] : vector<2x16xf32> to vector<2xf32>
    %79 = vector.shape_cast %78 : vector<2xf32> to vector<2x1xf32>
    %80 = vector.shape_cast %79 : vector<2x1xf32> to vector<2x1x1xf32>
    %cst_43 = arith.constant dense<0xFF800000> : vector<2x1xf32>
    %81 = vector.multi_reduction <maximumf>, %76, %cst_43 [2] : vector<2x1x8xf32> to vector<2x1xf32>
    %82 = vector.shape_cast %81 : vector<2x1xf32> to vector<2x1x1xf32>
    %83 = arith.maximumf %82, %80 : vector<2x1x1xf32>
    %84 = vector.broadcast %83 : vector<2x1x1xf32> to vector<2x1x8xf32>
    %85 = arith.subf %76, %84 : vector<2x1x8xf32>
    %86 = math.exp %85 : vector<2x1x8xf32>
    %87 = arith.subf %80, %83 : vector<2x1x1xf32>
    %88 = math.exp %87 : vector<2x1x1xf32>
    %cst_44 = arith.constant dense<0.000000e+00> : vector<2x1xf32>
    %89 = vector.multi_reduction <add>, %86, %cst_44 [2] : vector<2x1x8xf32> to vector<2x1xf32>
    %90 = vector.shape_cast %89 : vector<2x1xf32> to vector<2x1x1xf32>
    %91 = arith.addf %90, %88 : vector<2x1x1xf32>
    %92 = tpu.reciprocal %91 {approx = true} : vector<2x1x1xf32> -> vector<2x1x1xf32>
    %93 = arith.truncf %86 : vector<2x1x8xf32> to vector<2x1x8xbf16>
    "tpu.trace_start"() <{level = 10 : i32, message = "bqs,bsd->bqd"}> : () -> ()
    %cst_45 = arith.constant dense<0.000000e+00> : vector<2x1x16xf32>
    %94 = tpu.matmul %93, %66, %cst_45 {dimension_numbers = #tpu.dot_dimension_numbers<[2], [1], [1], [2], [0, 0, 0, 1, 1, 2], [0], [0]>} : vector<2x1x8xbf16>, vector<2x8x16xbf16>, vector<2x1x16xf32> -> vector<2x1x16xf32>
    "tpu.trace_stop"() : () -> ()
    %95 = vector.shape_cast %68 : vector<2x16xf32> to vector<2x1x16xf32>
    %96 = vector.broadcast %88 : vector<2x1x1xf32> to vector<2x1x16xf32>
    %97 = arith.mulf %96, %95 : vector<2x1x16xf32>
    %98 = arith.addf %94, %97 : vector<2x1x16xf32>
    %99 = vector.broadcast %92 : vector<2x1x1xf32> to vector<2x1x16xf32>
    %100 = arith.mulf %98, %99 : vector<2x1x16xf32>
    %101 = vector.shape_cast %100 : vector<2x1x16xf32> to vector<2x16xf32>
    %c0_46 = arith.constant 0 : index
    %c0_47 = arith.constant 0 : index
    %102 = vector.load %arg23[%c0_46, %c0_47] : memref<2x64xf32, #tpu.memory_space<vmem>>, vector<2x16xf32>
    tpu.vector_store %arg23[%c0_46, %c0_47], %101 {strides = array<i32>} : memref<2x64xf32, #tpu.memory_space<vmem>>, vector<2x16xf32>,
    %103 = vector.extract_strided_slice %46 {offsets = [0, 16], sizes = [2, 16], strides = [1, 1]} : vector<2x64xf32> to vector<2x16xf32>
    %104 = vector.shape_cast %103 : vector<2x16xf32> to vector<2x1x16xf32>
    %105 = arith.truncf %104 : vector<2x1x16xf32> to vector<2x1x16xbf16>
    "tpu.trace_start"() <{level = 10 : i32, message = "bqd,bsd->bqs"}> : () -> ()
    %cst_48 = arith.constant dense<0.000000e+00> : vector<2x1x8xf32>
    %106 = tpu.matmul %105, %65, %cst_48 {dimension_numbers = #tpu.dot_dimension_numbers<[2], [2], [1], [1], [0, 0, 0, 1, 1, 1], [0], [0]>} : vector<2x1x16xbf16>, vector<2x8x16xbf16>, vector<2x1x8xf32> -> vector<2x1x8xf32>
    %cst_49 = arith.constant -1.000000e+30 : f32
    "tpu.trace_stop"() : () -> ()
    %107 = vector.shape_cast %64 : vector<1x1x8xi1> to vector<1x1x8xi1>
    %108 = vector.broadcast %107 : vector<1x1x8xi1> to vector<2x1x8xi1>
    %109 = vector.broadcast %cst_49 : f32 to vector<2x1x8xf32>
    %110 = arith.select %108, %106, %109 : vector<2x1x8xi1>, vector<2x1x8xf32>
    %111 = arith.mulf %103, %67 : vector<2x16xf32>
    %cst_50 = arith.constant dense<0.000000e+00> : vector<2xf32>
    %112 = vector.multi_reduction <add>, %111, %cst_50 [1] : vector<2x16xf32> to vector<2xf32>
    %113 = vector.shape_cast %112 : vector<2xf32> to vector<2x1xf32>
    %114 = vector.shape_cast %113 : vector<2x1xf32> to vector<2x1x1xf32>
    %cst_51 = arith.constant dense<0xFF800000> : vector<2x1xf32>
    %115 = vector.multi_reduction <maximumf>, %110, %cst_51 [2] : vector<2x1x8xf32> to vector<2x1xf32>
    %116 = vector.shape_cast %115 : vector<2x1xf32> to vector<2x1x1xf32>
    %117 = arith.maximumf %116, %114 : vector<2x1x1xf32>
    %118 = vector.broadcast %117 : vector<2x1x1xf32> to vector<2x1x8xf32>
    %119 = arith.subf %110, %118 : vector<2x1x8xf32>
    %120 = math.exp %119 : vector<2x1x8xf32>
    %121 = arith.subf %114, %117 : vector<2x1x1xf32>
    %122 = math.exp %121 : vector<2x1x1xf32>
    %cst_52 = arith.constant dense<0.000000e+00> : vector<2x1xf32>
    %123 = vector.multi_reduction <add>, %120, %cst_52 [2] : vector<2x1x8xf32> to vector<2x1xf32>
    %124 = vector.shape_cast %123 : vector<2x1xf32> to vector<2x1x1xf32>
    %125 = arith.addf %124, %122 : vector<2x1x1xf32>
    %126 = tpu.reciprocal %125 {approx = true} : vector<2x1x1xf32> -> vector<2x1x1xf32>
    %127 = arith.truncf %120 : vector<2x1x8xf32> to vector<2x1x8xbf16>
    "tpu.trace_start"() <{level = 10 : i32, message = "bqs,bsd->bqd"}> : () -> ()
    %cst_53 = arith.constant dense<0.000000e+00> : vector<2x1x16xf32>
    %128 = tpu.matmul %127, %66, %cst_53 {dimension_numbers = #tpu.dot_dimension_numbers<[2], [1], [1], [2], [0, 0, 0, 1, 1, 2], [0], [0]>} : vector<2x1x8xbf16>, vector<2x8x16xbf16>, vector<2x1x16xf32> -> vector<2x1x16xf32>
    "tpu.trace_stop"() : () -> ()
    %129 = vector.shape_cast %68 : vector<2x16xf32> to vector<2x1x16xf32>
    %130 = vector.broadcast %122 : vector<2x1x1xf32> to vector<2x1x16xf32>
    %131 = arith.mulf %130, %129 : vector<2x1x16xf32>
    %132 = arith.addf %128, %131 : vector<2x1x16xf32>
    %133 = vector.broadcast %126 : vector<2x1x1xf32> to vector<2x1x16xf32>
    %134 = arith.mulf %132, %133 : vector<2x1x16xf32>
    %135 = vector.shape_cast %134 : vector<2x1x16xf32> to vector<2x16xf32>
    %c0_54 = arith.constant 0 : index
    %c16 = arith.constant 16 : index
    %136 = vector.load %arg23[%c0_54, %c16] : memref<2x64xf32, #tpu.memory_space<vmem>>, vector<2x16xf32>
    tpu.vector_store %arg23[%c0_54, %c16], %135 {strides = array<i32>} : memref<2x64xf32, #tpu.memory_space<vmem>>, vector<2x16xf32>,
    %c0_55 = arith.constant 0 : index
    %c0_56 = arith.constant 0 : index
    %c16_57 = arith.constant 16 : index
    %137 = vector.load %arg3[%c0_55, %c0_56, %c16_57] : memref<2x8x32xbf16, #tpu.memory_space<vmem>>, vector<2x8x16xbf16>
    %c0_58 = arith.constant 0 : index
    %c0_59 = arith.constant 0 : index
    %c16_60 = arith.constant 16 : index
    %138 = vector.load %arg4[%c0_58, %c0_59, %c16_60] : memref<2x8x32xbf16, #tpu.memory_space<vmem>>, vector<2x8x16xbf16>
    %139 = vector.extract_strided_slice %53 {offsets = [0, 16], sizes = [2, 16], strides = [1, 1]} : vector<2x32xf32> to vector<2x16xf32>
    %140 = vector.extract_strided_slice %21 {offsets = [0, 16], sizes = [2, 16], strides = [1, 1]} : vector<2x32xf32> to vector<2x16xf32>
    %141 = vector.extract_strided_slice %46 {offsets = [0, 32], sizes = [2, 16], strides = [1, 1]} : vector<2x64xf32> to vector<2x16xf32>
    %142 = vector.shape_cast %141 : vector<2x16xf32> to vector<2x1x16xf32>
    %143 = arith.truncf %142 : vector<2x1x16xf32> to vector<2x1x16xbf16>
    "tpu.trace_start"() <{level = 10 : i32, message = "bqd,bsd->bqs"}> : () -> ()
    %cst_61 = arith.constant dense<0.000000e+00> : vector<2x1x8xf32>
    %144 = tpu.matmul %143, %137, %cst_61 {dimension_numbers = #tpu.dot_dimension_numbers<[2], [2], [1], [1], [0, 0, 0, 1, 1, 1], [0], [0]>} : vector<2x1x16xbf16>, vector<2x8x16xbf16>, vector<2x1x8xf32> -> vector<2x1x8xf32>
    %cst_62 = arith.constant -1.000000e+30 : f32
    "tpu.trace_stop"() : () -> ()
    %145 = vector.shape_cast %64 : vector<1x1x8xi1> to vector<1x1x8xi1>
    %146 = vector.broadcast %145 : vector<1x1x8xi1> to vector<2x1x8xi1>
    %147 = vector.broadcast %cst_62 : f32 to vector<2x1x8xf32>
    %148 = arith.select %146, %144, %147 : vector<2x1x8xi1>, vector<2x1x8xf32>
    %149 = arith.mulf %141, %139 : vector<2x16xf32>
    %cst_63 = arith.constant dense<0.000000e+00> : vector<2xf32>
    %150 = vector.multi_reduction <add>, %149, %cst_63 [1] : vector<2x16xf32> to vector<2xf32>
    %151 = vector.shape_cast %150 : vector<2xf32> to vector<2x1xf32>
    %152 = vector.shape_cast %151 : vector<2x1xf32> to vector<2x1x1xf32>
    %cst_64 = arith.constant dense<0xFF800000> : vector<2x1xf32>
    %153 = vector.multi_reduction <maximumf>, %148, %cst_64 [2] : vector<2x1x8xf32> to vector<2x1xf32>
    %154 = vector.shape_cast %153 : vector<2x1xf32> to vector<2x1x1xf32>
    %155 = arith.maximumf %154, %152 : vector<2x1x1xf32>
    %156 = vector.broadcast %155 : vector<2x1x1xf32> to vector<2x1x8xf32>
    %157 = arith.subf %148, %156 : vector<2x1x8xf32>
    %158 = math.exp %157 : vector<2x1x8xf32>
    %159 = arith.subf %152, %155 : vector<2x1x1xf32>
    %160 = math.exp %159 : vector<2x1x1xf32>
    %cst_65 = arith.constant dense<0.000000e+00> : vector<2x1xf32>
    %161 = vector.multi_reduction <add>, %158, %cst_65 [2] : vector<2x1x8xf32> to vector<2x1xf32>
    %162 = vector.shape_cast %161 : vector<2x1xf32> to vector<2x1x1xf32>
    %163 = arith.addf %162, %160 : vector<2x1x1xf32>
    %164 = tpu.reciprocal %163 {approx = true} : vector<2x1x1xf32> -> vector<2x1x1xf32>
    %165 = arith.truncf %158 : vector<2x1x8xf32> to vector<2x1x8xbf16>
    "tpu.trace_start"() <{level = 10 : i32, message = "bqs,bsd->bqd"}> : () -> ()
    %cst_66 = arith.constant dense<0.000000e+00> : vector<2x1x16xf32>
    %166 = tpu.matmul %165, %138, %cst_66 {dimension_numbers = #tpu.dot_dimension_numbers<[2], [1], [1], [2], [0, 0, 0, 1, 1, 2], [0], [0]>} : vector<2x1x8xbf16>, vector<2x8x16xbf16>, vector<2x1x16xf32> -> vector<2x1x16xf32>
    "tpu.trace_stop"() : () -> ()
    %167 = vector.shape_cast %140 : vector<2x16xf32> to vector<2x1x16xf32>
    %168 = vector.broadcast %160 : vector<2x1x1xf32> to vector<2x1x16xf32>
    %169 = arith.mulf %168, %167 : vector<2x1x16xf32>
    %170 = arith.addf %166, %169 : vector<2x1x16xf32>
    %171 = vector.broadcast %164 : vector<2x1x1xf32> to vector<2x1x16xf32>
    %172 = arith.mulf %170, %171 : vector<2x1x16xf32>
    %173 = vector.shape_cast %172 : vector<2x1x16xf32> to vector<2x16xf32>
    %c0_67 = arith.constant 0 : index
    %c32 = arith.constant 32 : index
    %174 = vector.load %arg23[%c0_67, %c32] : memref<2x64xf32, #tpu.memory_space<vmem>>, vector<2x16xf32>
    tpu.vector_store %arg23[%c0_67, %c32], %173 {strides = array<i32>} : memref<2x64xf32, #tpu.memory_space<vmem>>, vector<2x16xf32>,
    %175 = vector.extract_strided_slice %46 {offsets = [0, 48], sizes = [2, 16], strides = [1, 1]} : vector<2x64xf32> to vector<2x16xf32>
    %176 = vector.shape_cast %175 : vector<2x16xf32> to vector<2x1x16xf32>
    %177 = arith.truncf %176 : vector<2x1x16xf32> to vector<2x1x16xbf16>
    "tpu.trace_start"() <{level = 10 : i32, message = "bqd,bsd->bqs"}> : () -> ()
    %cst_68 = arith.constant dense<0.000000e+00> : vector<2x1x8xf32>
    %178 = tpu.matmul %177, %137, %cst_68 {dimension_numbers = #tpu.dot_dimension_numbers<[2], [2], [1], [1], [0, 0, 0, 1, 1, 1], [0], [0]>} : vector<2x1x16xbf16>, vector<2x8x16xbf16>, vector<2x1x8xf32> -> vector<2x1x8xf32>
    %cst_69 = arith.constant -1.000000e+30 : f32
    "tpu.trace_stop"() : () -> ()
    %179 = vector.shape_cast %64 : vector<1x1x8xi1> to vector<1x1x8xi1>
    %180 = vector.broadcast %179 : vector<1x1x8xi1> to vector<2x1x8xi1>
    %181 = vector.broadcast %cst_69 : f32 to vector<2x1x8xf32>
    %182 = arith.select %180, %178, %181 : vector<2x1x8xi1>, vector<2x1x8xf32>
    %183 = arith.mulf %175, %139 : vector<2x16xf32>
    %cst_70 = arith.constant dense<0.000000e+00> : vector<2xf32>
    %184 = vector.multi_reduction <add>, %183, %cst_70 [1] : vector<2x16xf32> to vector<2xf32>
    %185 = vector.shape_cast %184 : vector<2xf32> to vector<2x1xf32>
    %186 = vector.shape_cast %185 : vector<2x1xf32> to vector<2x1x1xf32>
    %cst_71 = arith.constant dense<0xFF800000> : vector<2x1xf32>
    %187 = vector.multi_reduction <maximumf>, %182, %cst_71 [2] : vector<2x1x8xf32> to vector<2x1xf32>
    %188 = vector.shape_cast %187 : vector<2x1xf32> to vector<2x1x1xf32>
    %189 = arith.maximumf %188, %186 : vector<2x1x1xf32>
    %190 = vector.broadcast %189 : vector<2x1x1xf32> to vector<2x1x8xf32>
    %191 = arith.subf %182, %190 : vector<2x1x8xf32>
    %192 = math.exp %191 : vector<2x1x8xf32>
    %193 = arith.subf %186, %189 : vector<2x1x1xf32>
    %194 = math.exp %193 : vector<2x1x1xf32>
    %cst_72 = arith.constant dense<0.000000e+00> : vector<2x1xf32>
    %195 = vector.multi_reduction <add>, %192, %cst_72 [2] : vector<2x1x8xf32> to vector<2x1xf32>
    %196 = vector.shape_cast %195 : vector<2x1xf32> to vector<2x1x1xf32>
    %197 = arith.addf %196, %194 : vector<2x1x1xf32>
    %198 = tpu.reciprocal %197 {approx = true} : vector<2x1x1xf32> -> vector<2x1x1xf32>
    %199 = arith.truncf %192 : vector<2x1x8xf32> to vector<2x1x8xbf16>
    "tpu.trace_start"() <{level = 10 : i32, message = "bqs,bsd->bqd"}> : () -> ()
    %cst_73 = arith.constant dense<0.000000e+00> : vector<2x1x16xf32>
    %200 = tpu.matmul %199, %138, %cst_73 {dimension_numbers = #tpu.dot_dimension_numbers<[2], [1], [1], [2], [0, 0, 0, 1, 1, 2], [0], [0]>} : vector<2x1x8xbf16>, vector<2x8x16xbf16>, vector<2x1x16xf32> -> vector<2x1x16xf32>
    "tpu.trace_stop"() : () -> ()
    %201 = vector.shape_cast %140 : vector<2x16xf32> to vector<2x1x16xf32>
    %202 = vector.broadcast %194 : vector<2x1x1xf32> to vector<2x1x16xf32>
    %203 = arith.mulf %202, %201 : vector<2x1x16xf32>
    %204 = arith.addf %200, %203 : vector<2x1x16xf32>
    %205 = vector.broadcast %198 : vector<2x1x1xf32> to vector<2x1x16xf32>
    %206 = arith.mulf %204, %205 : vector<2x1x16xf32>
    %207 = vector.shape_cast %206 : vector<2x1x16xf32> to vector<2x16xf32>
    %c0_74 = arith.constant 0 : index
    %c48 = arith.constant 48 : index
    %208 = vector.load %arg23[%c0_74, %c48] : memref<2x64xf32, #tpu.memory_space<vmem>>, vector<2x16xf32>
    tpu.vector_store %arg23[%c0_74, %c48], %207 {strides = array<i32>} : memref<2x64xf32, #tpu.memory_space<vmem>>, vector<2x16xf32>,
    %c0_75 = arith.constant 0 : index
    %c0_76 = arith.constant 0 : index
    %209 = vector.load %arg23[%c0_75, %c0_76] : memref<2x64xf32, #tpu.memory_space<vmem>>, vector<2x64xf32>
    %210 = arith.truncf %209 : vector<2x64xf32> to vector<2x64xbf16>
    %c0_77 = arith.constant 0 : index
    %c0_78 = arith.constant 0 : index
    %211 = vector.load %arg10[%c0_77, %c0_78] : memref<64x64xbf16, #tpu.memory_space<vmem>>, vector<64x64xbf16>
    %cst_79 = arith.constant dense<0.000000e+00> : vector<2x64xf32>
    %212 = tpu.matmul %210, %211, %cst_79 {dimension_numbers = #tpu.dot_dimension_numbers<[1], [0], [0], [1], [0, 0, 1, 1], [], []>} : vector<2x64xbf16>, vector<64x64xbf16>, vector<2x64xf32> -> vector<2x64xf32>
    %213 = arith.addf %1, %212 : vector<2x64xf32>
    %214 = arith.mulf %213, %213 : vector<2x64xf32>
    %cst_80 = arith.constant dense<0.000000e+00> : vector<2xf32>
    %215 = vector.multi_reduction <add>, %214, %cst_80 [1] : vector<2x64xf32> to vector<2xf32>
    %216 = vector.shape_cast %215 : vector<2xf32> to vector<2x1xf32>
    %cst_81 = arith.constant 6.400000e+01 : f32
    %217 = vector.broadcast %cst_81 : f32 to vector<2x1xf32>
    %218 = arith.divf %216, %217 : vector<2x1xf32>
    %cst_82 = arith.constant 9.99999974E-6 : f32
    %219 = vector.broadcast %cst_82 : f32 to vector<2x1xf32>
    %220 = arith.addf %218, %219 : vector<2x1xf32>
    %221 = math.rsqrt %220 : vector<2x1xf32>
    %222 = vector.broadcast %221 : vector<2x1xf32> to vector<2x64xf32>
    %223 = arith.mulf %213, %222 : vector<2x64xf32>
    %c0_83 = arith.constant 0 : index
    %c0_84 = arith.constant 0 : index
    %224 = vector.load %arg6[%c0_83, %c0_84] : memref<1x64xf32, #tpu.memory_space<vmem>>, vector<1x64xf32>
    %225 = vector.broadcast %224 : vector<1x64xf32> to vector<2x64xf32>
    %226 = arith.mulf %223, %225 : vector<2x64xf32>
    %227 = arith.truncf %226 : vector<2x64xf32> to vector<2x64xbf16>
    %c0_85 = arith.constant 0 : index
    %c0_86 = arith.constant 0 : index
    %228 = vector.load %arg17[%c0_85, %c0_86] : memref<64x192xbf16, #tpu.memory_space<vmem>>, vector<64x192xbf16>
    %cst_87 = arith.constant dense<0.000000e+00> : vector<2x192xf32>
    %229 = tpu.matmul %227, %228, %cst_87 {dimension_numbers = #tpu.dot_dimension_numbers<[1], [0], [0], [1], [0, 0, 1, 1], [], []>} : vector<2x64xbf16>, vector<64x192xbf16>, vector<2x192xf32> -> vector<2x192xf32>
    %c0_88 = arith.constant 0 : index
    %c0_89 = arith.constant 0 : index
    %230 = vector.load %arg18[%c0_88, %c0_89] : memref<64x192xbf16, #tpu.memory_space<vmem>>, vector<64x192xbf16>
    %cst_90 = arith.constant dense<0.000000e+00> : vector<2x192xf32>
    %231 = tpu.matmul %227, %230, %cst_90 {dimension_numbers = #tpu.dot_dimension_numbers<[1], [0], [0], [1], [0, 0, 1, 1], [], []>} : vector<2x64xbf16>, vector<64x192xbf16>, vector<2x192xf32> -> vector<2x192xf32>
    %232 = arith.negf %229 : vector<2x192xf32>
    %233 = math.exp %232 : vector<2x192xf32>
    %cst_91 = arith.constant 1.000000e+00 : f32
    %234 = vector.broadcast %cst_91 : f32 to vector<2x192xf32>
    %235 = arith.addf %234, %233 : vector<2x192xf32>
    %236 = arith.divf %234, %235 : vector<2x192xf32>
    %237 = arith.mulf %229, %236 : vector<2x192xf32>
    %238 = arith.mulf %237, %231 : vector<2x192xf32>
    %239 = arith.truncf %238 : vector<2x192xf32> to vector<2x192xbf16>
    %c0_92 = arith.constant 0 : index
    %c0_93 = arith.constant 0 : index
    %240 = vector.load %arg19[%c0_92, %c0_93] : memref<192x64xbf16, #tpu.memory_space<vmem>>, vector<192x64xbf16>
    %cst_94 = arith.constant dense<0.000000e+00> : vector<2x64xf32>
    %241 = tpu.matmul %239, %240, %cst_94 {dimension_numbers = #tpu.dot_dimension_numbers<[1], [0], [0], [1], [0, 0, 1, 1], [], []>} : vector<2x192xbf16>, vector<192x64xbf16>, vector<2x64xf32> -> vector<2x64xf32>
    %242 = arith.addf %213, %241 : vector<2x64xf32>
    %c0_95 = arith.constant 0 : index
    %c0_96 = arith.constant 0 : index
    %243 = vector.load %arg20[%c0_95, %c0_96] : memref<2x64xf32, #tpu.memory_space<vmem>>, vector<2x64xf32>
    tpu.vector_store %arg20[%c0_95, %c0_96], %242 {strides = array<i32>} : memref<2x64xf32, #tpu.memory_space<vmem>>, vector<2x64xf32>,
    return
  }
  func.func @transform_0(%arg0: i32, %arg1: memref<1xi32, #tpu.memory_space<smem>>) -> (i32, i32) {
    %c0_i32 = arith.constant 0 : i32
    %c0_i32_0 = arith.constant 0 : i32
    return %arg0, %c0_i32 : i32, i32
  }
  func.func @transform_1(%arg0: i32, %arg1: memref<1xi32, #tpu.memory_space<smem>>) -> (i32, i32, i32) {
    %c0_i32 = arith.constant 0 : i32
    %c0_i32_0 = arith.constant 0 : i32
    %c0_i32_1 = arith.constant 0 : i32
    return %arg0, %c0_i32, %c0_i32_0 : i32, i32, i32
  }
  func.func @transform_2(%arg0: i32, %arg1: memref<1xi32, #tpu.memory_space<smem>>) -> (i32, i32, i32) {
    %c0_i32 = arith.constant 0 : i32
    %c0_i32_0 = arith.constant 0 : i32
    %c0_i32_1 = arith.constant 0 : i32
    return %arg0, %c0_i32, %c0_i32_0 : i32, i32, i32
  }
  func.func @transform_3(%arg0: i32, %arg1: memref<1xi32, #tpu.memory_space<smem>>) -> (i32, i32) {
    %c0_i32 = arith.constant 0 : i32
    %c0_i32_0 = arith.constant 0 : i32
    %c0_i32_1 = arith.constant 0 : i32
    return %c0_i32, %c0_i32_0 : i32, i32
  }
  func.func @transform_4(%arg0: i32, %arg1: memref<1xi32, #tpu.memory_space<smem>>) -> (i32, i32) {
    %c0_i32 = arith.constant 0 : i32
    %c0_i32_0 = arith.constant 0 : i32
    %c0_i32_1 = arith.constant 0 : i32
    return %c0_i32, %c0_i32_0 : i32, i32
  }
  func.func @transform_5(%arg0: i32, %arg1: memref<1xi32, #tpu.memory_space<smem>>) -> (i32, i32) {
    %c0_i32 = arith.constant 0 : i32
    %c0_i32_0 = arith.constant 0 : i32
    %c0_i32_1 = arith.constant 0 : i32
    return %c0_i32, %c0_i32_0 : i32, i32
  }
  func.func @transform_6(%arg0: i32, %arg1: memref<1xi32, #tpu.memory_space<smem>>) -> (i32, i32) {
    %c0_i32 = arith.constant 0 : i32
    %c0_i32_0 = arith.constant 0 : i32
    %c0_i32_1 = arith.constant 0 : i32
    return %c0_i32, %c0_i32_0 : i32, i32
  }
  func.func @transform_7(%arg0: i32, %arg1: memref<1xi32, #tpu.memory_space<smem>>) -> (i32, i32) {
    %c0_i32 = arith.constant 0 : i32
    %c0_i32_0 = arith.constant 0 : i32
    %c0_i32_1 = arith.constant 0 : i32
    return %c0_i32, %c0_i32_0 : i32, i32
  }
  func.func @transform_8(%arg0: i32, %arg1: memref<1xi32, #tpu.memory_space<smem>>) -> (i32, i32) {
    %c0_i32 = arith.constant 0 : i32
    %c0_i32_0 = arith.constant 0 : i32
    %c0_i32_1 = arith.constant 0 : i32
    return %c0_i32, %c0_i32_0 : i32, i32
  }
  func.func @transform_9(%arg0: i32, %arg1: memref<1xi32, #tpu.memory_space<smem>>) -> (i32, i32) {
    %c0_i32 = arith.constant 0 : i32
    %c0_i32_0 = arith.constant 0 : i32
    %c0_i32_1 = arith.constant 0 : i32
    return %c0_i32, %c0_i32_0 : i32, i32
  }
  func.func @transform_10(%arg0: i32, %arg1: memref<1xi32, #tpu.memory_space<smem>>) -> (i32, i32) {
    %c0_i32 = arith.constant 0 : i32
    %c0_i32_0 = arith.constant 0 : i32
    %c0_i32_1 = arith.constant 0 : i32
    return %c0_i32, %c0_i32_0 : i32, i32
  }
  func.func @transform_11(%arg0: i32, %arg1: memref<1xi32, #tpu.memory_space<smem>>) -> (i32, i32) {
    %c0_i32 = arith.constant 0 : i32
    %c0_i32_0 = arith.constant 0 : i32
    %c0_i32_1 = arith.constant 0 : i32
    return %c0_i32, %c0_i32_0 : i32, i32
  }
  func.func @transform_12(%arg0: i32, %arg1: memref<1xi32, #tpu.memory_space<smem>>) -> (i32, i32) {
    %c0_i32 = arith.constant 0 : i32
    %c0_i32_0 = arith.constant 0 : i32
    %c0_i32_1 = arith.constant 0 : i32
    return %c0_i32, %c0_i32_0 : i32, i32
  }
  func.func @transform_13(%arg0: i32, %arg1: memref<1xi32, #tpu.memory_space<smem>>) -> (i32, i32) {
    %c0_i32 = arith.constant 0 : i32
    %c0_i32_0 = arith.constant 0 : i32
    %c0_i32_1 = arith.constant 0 : i32
    return %c0_i32, %c0_i32_0 : i32, i32
  }
  func.func @transform_14(%arg0: i32, %arg1: memref<1xi32, #tpu.memory_space<smem>>) -> (i32, i32) {
    %c0_i32 = arith.constant 0 : i32
    %c0_i32_0 = arith.constant 0 : i32
    %c0_i32_1 = arith.constant 0 : i32
    return %c0_i32, %c0_i32_0 : i32, i32
  }
  func.func @transform_15(%arg0: i32, %arg1: memref<1xi32, #tpu.memory_space<smem>>) -> (i32, i32) {
    %c0_i32 = arith.constant 0 : i32
    %c0_i32_0 = arith.constant 0 : i32
    %c0_i32_1 = arith.constant 0 : i32
    return %c0_i32, %c0_i32_0 : i32, i32
  }
  func.func @transform_16(%arg0: i32, %arg1: memref<1xi32, #tpu.memory_space<smem>>) -> (i32, i32) {
    %c0_i32 = arith.constant 0 : i32
    %c0_i32_0 = arith.constant 0 : i32
    %c0_i32_1 = arith.constant 0 : i32
    return %c0_i32, %c0_i32_0 : i32, i32
  }
  func.func @transform_17(%arg0: i32, %arg1: memref<1xi32, #tpu.memory_space<smem>>) -> (i32, i32) {
    %c0_i32 = arith.constant 0 : i32
    %c0_i32_0 = arith.constant 0 : i32
    %c0_i32_1 = arith.constant 0 : i32
    return %c0_i32, %c0_i32_0 : i32, i32
  }
  func.func @transform_18(%arg0: i32, %arg1: memref<1xi32, #tpu.memory_space<smem>>) -> (i32, i32) {
    %c0_i32 = arith.constant 0 : i32
    %c0_i32_0 = arith.constant 0 : i32
    return %arg0, %c0_i32 : i32, i32
  }
  func.func @transform_19(%arg0: i32, %arg1: memref<1xi32, #tpu.memory_space<smem>>) -> (i32, i32, i32) {
    %c0_i32 = arith.constant 0 : i32
    %c0_i32_0 = arith.constant 0 : i32
    %c0_i32_1 = arith.constant 0 : i32
    return %arg0, %c0_i32, %c0_i32_0 : i32, i32, i32
  }
  func.func @transform_20(%arg0: i32, %arg1: memref<1xi32, #tpu.memory_space<smem>>) -> (i32, i32, i32) {
    %c0_i32 = arith.constant 0 : i32
    %c0_i32_0 = arith.constant 0 : i32
    %c0_i32_1 = arith.constant 0 : i32
    return %arg0, %c0_i32, %c0_i32_0 : i32, i32, i32
  }
}

module attributes {stable_mosaic.version = 11 : i64} {
  func.func @kernel(%arg0: i32, %arg1: memref<1xi32, #tpu.memory_space<smem>>, %arg2: memref<2x64xf32, #tpu.memory_space<vmem>>, %arg3: memref<2x8x32xbf16, #tpu.memory_space<vmem>>, %arg4: memref<2x8x32xbf16, #tpu.memory_space<vmem>>, %arg5: memref<1x64xf32, #tpu.memory_space<vmem>>, %arg6: memref<1x64xf32, #tpu.memory_space<vmem>>, %arg7: memref<64x64xbf16, #tpu.memory_space<vmem>>, %arg8: memref<64x32xbf16, #tpu.memory_space<vmem>>, %arg9: memref<64x32xbf16, #tpu.memory_space<vmem>>, %arg10: memref<64x64xbf16, #tpu.memory_space<vmem>>, %arg11: memref<1x64xf32, #tpu.memory_space<vmem>>, %arg12: memref<1x64xf32, #tpu.memory_space<vmem>>, %arg13: memref<1x32xf32, #tpu.memory_space<vmem>>, %arg14: memref<1x32xf32, #tpu.memory_space<vmem>>, %arg15: memref<64x64xf32, #tpu.memory_space<vmem>>, %arg16: memref<32x32xf32, #tpu.memory_space<vmem>>, %arg17: memref<64x192xbf16, #tpu.memory_space<vmem>>, %arg18: memref<64x192xbf16, #tpu.memory_space<vmem>>, %arg19: memref<192x64xbf16, #tpu.memory_space<vmem>>, %arg20: memref<2x64xf32, #tpu.memory_space<vmem>>, %arg21: memref<2x1x32xbf16, #tpu.memory_space<vmem>>, %arg22: memref<2x1x32xbf16, #tpu.memory_space<vmem>>, %arg23: memref<2x64xf32, #tpu.memory_space<vmem>>) attributes {dimension_semantics = [#tpu.dimension_semantics<parallel>], iteration_bounds = array<i64: 1>, scalar_prefetch = 1 : i64, scratch_operands = 1 : i64, tpu.core_type = #tpu.core_type<tc>, window_params = [{transform_indices = @transform_0, window_bounds = array<i64: 2, 64>}, {transform_indices = @transform_1, window_bounds = array<i64: 2, 8, 32>}, {transform_indices = @transform_2, window_bounds = array<i64: 2, 8, 32>}, {pipeline_mode = #tpu.pipeline_mode<synchronous>, transform_indices = @transform_3, window_bounds = array<i64: 1, 64>}, {pipeline_mode = #tpu.pipeline_mode<synchronous>, transform_indices = @transform_4, window_bounds = array<i64: 1, 64>}, {pipeline_mode = #tpu.pipeline_mode<synchronous>, transform_indices = @transform_5, window_bounds = array<i64: 64, 64>}, {pipeline_mode = #tpu.pipeline_mode<synchronous>, transform_indices = @transform_6, window_bounds = array<i64: 64, 32>}, {pipeline_mode = #tpu.pipeline_mode<synchronous>, transform_indices = @transform_7, window_bounds = array<i64: 64, 32>}, {pipeline_mode = #tpu.pipeline_mode<synchronous>, transform_indices = @transform_8, window_bounds = array<i64: 64, 64>}, {pipeline_mode = #tpu.pipeline_mode<synchronous>, transform_indices = @transform_9, window_bounds = array<i64: 1, 64>}, {pipeline_mode = #tpu.pipeline_mode<synchronous>, transform_indices = @transform_10, window_bounds = array<i64: 1, 64>}, {pipeline_mode = #tpu.pipeline_mode<synchronous>, transform_indices = @transform_11, window_bounds = array<i64: 1, 32>}, {pipeline_mode = #tpu.pipeline_mode<synchronous>, transform_indices = @transform_12, window_bounds = array<i64: 1, 32>}, {pipeline_mode = #tpu.pipeline_mode<synchronous>, transform_indices = @transform_13, window_bounds = array<i64: 64, 64>}, {pipeline_mode = #tpu.pipeline_mode<synchronous>, transform_indices = @transform_14, window_bounds = array<i64: 32, 32>}, {pipeline_mode = #tpu.pipeline_mode<synchronous>, transform_indices = @transform_15, window_bounds = array<i64: 64, 192>}, {pipeline_mode = #tpu.pipeline_mode<synchronous>, transform_indices = @transform_16, window_bounds = array<i64: 64, 192>}, {pipeline_mode = #tpu.pipeline_mode<synchronous>, transform_indices = @transform_17, window_bounds = array<i64: 192, 64>}, {transform_indices = @transform_18, window_bounds = array<i64: 2, 64>}, {transform_indices = @transform_19, window_bounds = array<i64: 2, 1, 32>}, {transform_indices = @transform_20, window_bounds = array<i64: 2, 1, 32>}]} {
    %c0 = arith.constant 0 : index
    %0 = memref.load %arg1[%c0] : memref<1xi32, #tpu.memory_space<smem>>
    %c0_0 = arith.constant 0 : index
    %c0_1 = arith.constant 0 : index
    %1 = vector.load %arg2[%c0_0, %c0_1] : memref<2x64xf32, #tpu.memory_space<vmem>>, vector<2x64xf32>
    %2 = arith.mulf %1, %1 : vector<2x64xf32>
    %cst = arith.constant dense<0.000000e+00> : vector<2xf32>
    %3 = vector.multi_reduction <add>, %2, %cst [1] : vector<2x64xf32> to vector<2xf32>
    %4 = vector.shape_cast %3 : vector<2xf32> to vector<2x1xf32>
    %cst_2 = arith.constant 6.400000e+01 : f32
    %5 = vector.broadcast %cst_2 : f32 to vector<2x1xf32>
    %6 = arith.divf %4, %5 : vector<2x1xf32>
    %cst_3 = arith.constant 9.99999974E-6 : f32
    %7 = vector.broadcast %cst_3 : f32 to vector<2x1xf32>
    %8 = arith.addf %6, %7 : vector<2x1xf32>
    %9 = math.rsqrt %8 : vector<2x1xf32>
    %10 = vector.broadcast %9 : vector<2x1xf32> to vector<2x64xf32>
    %11 = arith.mulf %1, %10 : vector<2x64xf32>
    %c0_4 = arith.constant 0 : index
    %c0_5 = arith.constant 0 : index
    %12 = vector.load %arg5[%c0_4, %c0_5] : memref<1x64xf32, #tpu.memory_space<vmem>>, vector<1x64xf32>
    %13 = vector.broadcast %12 : vector<1x64xf32> to vector<2x64xf32>
    %14 = arith.mulf %11, %13 : vector<2x64xf32>
    %15 = arith.truncf %14 : vector<2x64xf32> to vector<2x64xbf16>
    %c0_6 = arith.constant 0 : index
    %c0_7 = arith.constant 0 : index
    %16 = vector.load %arg7[%c0_6, %c0_7] : memref<64x64xbf16, #tpu.memory_space<vmem>>, vector<64x64xbf16>
    %cst_8 = arith.constant dense<0.000000e+00> : vector<2x64xf32>
    %17 = tpu.matmul %15, %16, %cst_8 {dimension_numbers = #tpu.dot_dimension_numbers<[1], [0], [0], [1], [0, 0, 1, 1], [], []>} : vector<2x64xbf16>, vector<64x64xbf16>, vector<2x64xf32> -> vector<2x64xf32>
    %c0_9 = arith.constant 0 : index
    %c0_10 = arith.constant 0 : index
    %18 = vector.load %arg8[%c0_9, %c0_10] : memref<64x32xbf16, #tpu.memory_space<vmem>>, vector<64x32xbf16>
    %cst_11 = arith.constant dense<0.000000e+00> : vector<2x32xf32>
    %19 = tpu.matmul %15, %18, %cst_11 {dimension_numbers = #tpu.dot_dimension_numbers<[1], [0], [0], [1], [0, 0, 1, 1], [], []>} : vector<2x64xbf16>, vector<64x32xbf16>, vector<2x32xf32> -> vector<2x32xf32>
    %c0_12 = arith.constant 0 : index
    %c0_13 = arith.constant 0 : index
    %20 = vector.load %arg9[%c0_12, %c0_13] : memref<64x32xbf16, #tpu.memory_space<vmem>>, vector<64x32xbf16>
    %cst_14 = arith.constant dense<0.000000e+00> : vector<2x32xf32>
    %21 = tpu.matmul %15, %20, %cst_14 {dimension_numbers = #tpu.dot_dimension_numbers<[1], [0], [0], [1], [0, 0, 1, 1], [], []>} : vector<2x64xbf16>, vector<64x32xbf16>, vector<2x32xf32> -> vector<2x32xf32>
    %c0_15 = arith.constant 0 : index
    %c0_16 = arith.constant 0 : index
    %22 = vector.load %arg15[%c0_15, %c0_16] : memref<64x64xf32, #tpu.memory_space<vmem>>, vector<64x64xf32>
    %cst_17 = arith.constant dense<0.000000e+00> : vector<2x64xf32>
    %23 = tpu.matmul %17, %22, %cst_17 {dimension_numbers = #tpu.dot_dimension_numbers<[1], [0], [0], [1], [0, 0, 1, 1], [], []>} : vector<2x64xf32>, vector<64x64xf32>, vector<2x64xf32> -> vector<2x64xf32>
    %c0_18 = arith.constant 0 : index
    %c0_19 = arith.constant 0 : index
    %24 = vector.load %arg16[%c0_18, %c0_19] : memref<32x32xf32, #tpu.memory_space<vmem>>, vector<32x32xf32>
    %cst_20 = arith.constant dense<0.000000e+00> : vector<2x32xf32>
    %25 = tpu.matmul %19, %24, %cst_20 {dimension_numbers = #tpu.dot_dimension_numbers<[1], [0], [0], [1], [0, 0, 1, 1], [], []>} : vector<2x32xf32>, vector<32x32xf32>, vector<2x32xf32> -> vector<2x32xf32>
    %c0_21 = arith.constant 0 : index
    %c0_22 = arith.constant 0 : index
    %26 = vector.load %arg11[%c0_21, %c0_22] : memref<1x64xf32, #tpu.memory_space<vmem>>, vector<1x64xf32>
    %27 = vector.broadcast %26 : vector<1x64xf32> to vector<2x64xf32>
    %28 = arith.mulf %17, %27 : vector<2x64xf32>
    %c0_23 = arith.constant 0 : index
    %c0_24 = arith.constant 0 : index
    %29 = vector.load %arg12[%c0_23, %c0_24] : memref<1x64xf32, #tpu.memory_space<vmem>>, vector<1x64xf32>
    %30 = vector.broadcast %29 : vector<1x64xf32> to vector<2x64xf32>
    %31 = arith.mulf %23, %30 : vector<2x64xf32>
    %32 = arith.addf %28, %31 : vector<2x64xf32>
    %cst_25 = arith.constant 2.500000e-01 : f32
    %33 = vector.broadcast %cst_25 : f32 to vector<2x64xf32>
    %34 = arith.mulf %32, %33 : vector<2x64xf32>
    %c0_26 = arith.constant 0 : index
    %c0_27 = arith.constant 0 : index
    %35 = vector.load %arg13[%c0_26, %c0_27] : memref<1x32xf32, #tpu.memory_space<vmem>>, vector<1x32xf32>
    %36 = vector.broadcast %35 : vector<1x32xf32> to vector<2x32xf32>
    %37 = arith.mulf %19, %36 : vector<2x32xf32>
    %c0_28 = arith.constant 0 : index
    %c0_29 = arith.constant 0 : index
    %38 = vector.load %arg14[%c0_28, %c0_29] : memref<1x32xf32, #tpu.memory_space<vmem>>, vector<1x32xf32>
    %39 = vector.broadcast %38 : vector<1x32xf32> to vector<2x32xf32>
    %40 = arith.mulf %25, %39 : vector<2x32xf32>
    %41 = arith.addf %37, %40 : vector<2x32xf32>
    %42 = arith.truncf %41 : vector<2x32xf32> to vector<2x32xbf16>
    %c0_30 = arith.constant 0 : index
    %c0_31 = arith.constant 0 : index
    %c0_32 = arith.constant 0 : index
    %43 = vector.load %arg21[%c0_30, %c0_31, %c0_32] : memref<2x1x32xbf16, #tpu.memory_space<vmem>>, vector<2x1x32xbf16>
    %44 = vector.shape_cast %43 : vector<2x1x32xbf16> to vector<2x32xbf16>
    %45 = vector.shape_cast %42 : vector<2x32xbf16> to vector<2x1x32xbf16>
    tpu.vector_store %arg21[%c0_30, %c0_31, %c0_32], %45 {strides = array<i32>} : memref<2x1x32xbf16, #tpu.memory_space<vmem>>, vector<2x1x32xbf16>,
    %46 = arith.truncf %21 : vector<2x32xf32> to vector<2x32xbf16>
    %c0_33 = arith.constant 0 : index
    %c0_34 = arith.constant 0 : index
    %c0_35 = arith.constant 0 : index
    %47 = vector.load %arg22[%c0_33, %c0_34, %c0_35] : memref<2x1x32xbf16, #tpu.memory_space<vmem>>, vector<2x1x32xbf16>
    %48 = vector.shape_cast %47 : vector<2x1x32xbf16> to vector<2x32xbf16>
    %49 = vector.shape_cast %46 : vector<2x32xbf16> to vector<2x1x32xbf16>
    tpu.vector_store %arg22[%c0_33, %c0_34, %c0_35], %49 {strides = array<i32>} : memref<2x1x32xbf16, #tpu.memory_space<vmem>>, vector<2x1x32xbf16>,
    %50 = tpu.iota {dimensions = array<i32: 2>} : vector<1x1x8xi32>
    %51 = vector.broadcast %0 : i32 to vector<1x1x8xi32>
    %52 = arith.cmpi slt, %50, %51 : vector<1x1x8xi32>
    %c0_36 = arith.constant 0 : index
    %c0_37 = arith.constant 0 : index
    %c0_38 = arith.constant 0 : index
    %53 = vector.load %arg3[%c0_36, %c0_37, %c0_38] : memref<2x8x32xbf16, #tpu.memory_space<vmem>>, vector<2x8x16xbf16>
    %c0_39 = arith.constant 0 : index
    %c0_40 = arith.constant 0 : index
    %c0_41 = arith.constant 0 : index
    %54 = vector.load %arg4[%c0_39, %c0_40, %c0_41] : memref<2x8x32xbf16, #tpu.memory_space<vmem>>, vector<2x8x16xbf16>
    %55 = vector.extract_strided_slice %41 {offsets = [0, 0], sizes = [2, 16], strides = [1, 1]} : vector<2x32xf32> to vector<2x16xf32>
    %56 = vector.extract_strided_slice %21 {offsets = [0, 0], sizes = [2, 16], strides = [1, 1]} : vector<2x32xf32> to vector<2x16xf32>
    %57 = vector.extract_strided_slice %34 {offsets = [0, 0], sizes = [2, 16], strides = [1, 1]} : vector<2x64xf32> to vector<2x16xf32>
    %58 = vector.shape_cast %57 : vector<2x16xf32> to vector<2x1x16xf32>
    %59 = arith.truncf %58 : vector<2x1x16xf32> to vector<2x1x16xbf16>
    "tpu.trace_start"() <{level = 10 : i32, message = "bqd,bsd->bqs"}> : () -> ()
    %cst_42 = arith.constant dense<0.000000e+00> : vector<2x1x8xf32>
    %60 = tpu.matmul %59, %53, %cst_42 {dimension_numbers = #tpu.dot_dimension_numbers<[2], [2], [1], [1], [0, 0, 0, 1, 1, 1], [0], [0]>} : vector<2x1x16xbf16>, vector<2x8x16xbf16>, vector<2x1x8xf32> -> vector<2x1x8xf32>
    %cst_43 = arith.constant -1.000000e+30 : f32
    "tpu.trace_stop"() : () -> ()
    %61 = vector.shape_cast %52 : vector<1x1x8xi1> to vector<1x1x8xi1>
    %62 = vector.broadcast %61 : vector<1x1x8xi1> to vector<2x1x8xi1>
    %63 = vector.broadcast %cst_43 : f32 to vector<2x1x8xf32>
    %64 = arith.select %62, %60, %63 : vector<2x1x8xi1>, vector<2x1x8xf32>
    %65 = arith.mulf %57, %55 : vector<2x16xf32>
    %cst_44 = arith.constant dense<0.000000e+00> : vector<2xf32>
    %66 = vector.multi_reduction <add>, %65, %cst_44 [1] : vector<2x16xf32> to vector<2xf32>
    %67 = vector.shape_cast %66 : vector<2xf32> to vector<2x1xf32>
    %68 = vector.shape_cast %67 : vector<2x1xf32> to vector<2x1x1xf32>
    %cst_45 = arith.constant dense<0xFF800000> : vector<2x1xf32>
    %69 = vector.multi_reduction <maximumf>, %64, %cst_45 [2] : vector<2x1x8xf32> to vector<2x1xf32>
    %70 = vector.shape_cast %69 : vector<2x1xf32> to vector<2x1x1xf32>
    %71 = arith.maximumf %70, %68 : vector<2x1x1xf32>
    %72 = vector.broadcast %71 : vector<2x1x1xf32> to vector<2x1x8xf32>
    %73 = arith.subf %64, %72 : vector<2x1x8xf32>
    %74 = math.exp %73 : vector<2x1x8xf32>
    %75 = arith.subf %68, %71 : vector<2x1x1xf32>
    %76 = math.exp %75 : vector<2x1x1xf32>
    %cst_46 = arith.constant dense<0.000000e+00> : vector<2x1xf32>
    %77 = vector.multi_reduction <add>, %74, %cst_46 [2] : vector<2x1x8xf32> to vector<2x1xf32>
    %78 = vector.shape_cast %77 : vector<2x1xf32> to vector<2x1x1xf32>
    %79 = arith.addf %78, %76 : vector<2x1x1xf32>
    %80 = tpu.reciprocal %79 {approx = true} : vector<2x1x1xf32> -> vector<2x1x1xf32>
    %81 = arith.truncf %74 : vector<2x1x8xf32> to vector<2x1x8xbf16>
    "tpu.trace_start"() <{level = 10 : i32, message = "bqs,bsd->bqd"}> : () -> ()
    %cst_47 = arith.constant dense<0.000000e+00> : vector<2x1x16xf32>
    %82 = tpu.matmul %81, %54, %cst_47 {dimension_numbers = #tpu.dot_dimension_numbers<[2], [1], [1], [2], [0, 0, 0, 1, 1, 2], [0], [0]>} : vector<2x1x8xbf16>, vector<2x8x16xbf16>, vector<2x1x16xf32> -> vector<2x1x16xf32>
    "tpu.trace_stop"() : () -> ()
    %83 = vector.shape_cast %56 : vector<2x16xf32> to vector<2x1x16xf32>
    %84 = vector.broadcast %76 : vector<2x1x1xf32> to vector<2x1x16xf32>
    %85 = arith.mulf %84, %83 : vector<2x1x16xf32>
    %86 = arith.addf %82, %85 : vector<2x1x16xf32>
    %87 = vector.broadcast %80 : vector<2x1x1xf32> to vector<2x1x16xf32>
    %88 = arith.mulf %86, %87 : vector<2x1x16xf32>
    %89 = vector.shape_cast %88 : vector<2x1x16xf32> to vector<2x16xf32>
    %c0_48 = arith.constant 0 : index
    %c0_49 = arith.constant 0 : index
    %90 = vector.load %arg23[%c0_48, %c0_49] : memref<2x64xf32, #tpu.memory_space<vmem>>, vector<2x16xf32>
    tpu.vector_store %arg23[%c0_48, %c0_49], %89 {strides = array<i32>} : memref<2x64xf32, #tpu.memory_space<vmem>>, vector<2x16xf32>,
    %91 = vector.extract_strided_slice %34 {offsets = [0, 16], sizes = [2, 16], strides = [1, 1]} : vector<2x64xf32> to vector<2x16xf32>
    %92 = vector.shape_cast %91 : vector<2x16xf32> to vector<2x1x16xf32>
    %93 = arith.truncf %92 : vector<2x1x16xf32> to vector<2x1x16xbf16>
    "tpu.trace_start"() <{level = 10 : i32, message = "bqd,bsd->bqs"}> : () -> ()
    %cst_50 = arith.constant dense<0.000000e+00> : vector<2x1x8xf32>
    %94 = tpu.matmul %93, %53, %cst_50 {dimension_numbers = #tpu.dot_dimension_numbers<[2], [2], [1], [1], [0, 0, 0, 1, 1, 1], [0], [0]>} : vector<2x1x16xbf16>, vector<2x8x16xbf16>, vector<2x1x8xf32> -> vector<2x1x8xf32>
    %cst_51 = arith.constant -1.000000e+30 : f32
    "tpu.trace_stop"() : () -> ()
    %95 = vector.shape_cast %52 : vector<1x1x8xi1> to vector<1x1x8xi1>
    %96 = vector.broadcast %95 : vector<1x1x8xi1> to vector<2x1x8xi1>
    %97 = vector.broadcast %cst_51 : f32 to vector<2x1x8xf32>
    %98 = arith.select %96, %94, %97 : vector<2x1x8xi1>, vector<2x1x8xf32>
    %99 = arith.mulf %91, %55 : vector<2x16xf32>
    %cst_52 = arith.constant dense<0.000000e+00> : vector<2xf32>
    %100 = vector.multi_reduction <add>, %99, %cst_52 [1] : vector<2x16xf32> to vector<2xf32>
    %101 = vector.shape_cast %100 : vector<2xf32> to vector<2x1xf32>
    %102 = vector.shape_cast %101 : vector<2x1xf32> to vector<2x1x1xf32>
    %cst_53 = arith.constant dense<0xFF800000> : vector<2x1xf32>
    %103 = vector.multi_reduction <maximumf>, %98, %cst_53 [2] : vector<2x1x8xf32> to vector<2x1xf32>
    %104 = vector.shape_cast %103 : vector<2x1xf32> to vector<2x1x1xf32>
    %105 = arith.maximumf %104, %102 : vector<2x1x1xf32>
    %106 = vector.broadcast %105 : vector<2x1x1xf32> to vector<2x1x8xf32>
    %107 = arith.subf %98, %106 : vector<2x1x8xf32>
    %108 = math.exp %107 : vector<2x1x8xf32>
    %109 = arith.subf %102, %105 : vector<2x1x1xf32>
    %110 = math.exp %109 : vector<2x1x1xf32>
    %cst_54 = arith.constant dense<0.000000e+00> : vector<2x1xf32>
    %111 = vector.multi_reduction <add>, %108, %cst_54 [2] : vector<2x1x8xf32> to vector<2x1xf32>
    %112 = vector.shape_cast %111 : vector<2x1xf32> to vector<2x1x1xf32>
    %113 = arith.addf %112, %110 : vector<2x1x1xf32>
    %114 = tpu.reciprocal %113 {approx = true} : vector<2x1x1xf32> -> vector<2x1x1xf32>
    %115 = arith.truncf %108 : vector<2x1x8xf32> to vector<2x1x8xbf16>
    "tpu.trace_start"() <{level = 10 : i32, message = "bqs,bsd->bqd"}> : () -> ()
    %cst_55 = arith.constant dense<0.000000e+00> : vector<2x1x16xf32>
    %116 = tpu.matmul %115, %54, %cst_55 {dimension_numbers = #tpu.dot_dimension_numbers<[2], [1], [1], [2], [0, 0, 0, 1, 1, 2], [0], [0]>} : vector<2x1x8xbf16>, vector<2x8x16xbf16>, vector<2x1x16xf32> -> vector<2x1x16xf32>
    "tpu.trace_stop"() : () -> ()
    %117 = vector.shape_cast %56 : vector<2x16xf32> to vector<2x1x16xf32>
    %118 = vector.broadcast %110 : vector<2x1x1xf32> to vector<2x1x16xf32>
    %119 = arith.mulf %118, %117 : vector<2x1x16xf32>
    %120 = arith.addf %116, %119 : vector<2x1x16xf32>
    %121 = vector.broadcast %114 : vector<2x1x1xf32> to vector<2x1x16xf32>
    %122 = arith.mulf %120, %121 : vector<2x1x16xf32>
    %123 = vector.shape_cast %122 : vector<2x1x16xf32> to vector<2x16xf32>
    %c0_56 = arith.constant 0 : index
    %c16 = arith.constant 16 : index
    %124 = vector.load %arg23[%c0_56, %c16] : memref<2x64xf32, #tpu.memory_space<vmem>>, vector<2x16xf32>
    tpu.vector_store %arg23[%c0_56, %c16], %123 {strides = array<i32>} : memref<2x64xf32, #tpu.memory_space<vmem>>, vector<2x16xf32>,
    %c0_57 = arith.constant 0 : index
    %c0_58 = arith.constant 0 : index
    %c16_59 = arith.constant 16 : index
    %125 = vector.load %arg3[%c0_57, %c0_58, %c16_59] : memref<2x8x32xbf16, #tpu.memory_space<vmem>>, vector<2x8x16xbf16>
    %c0_60 = arith.constant 0 : index
    %c0_61 = arith.constant 0 : index
    %c16_62 = arith.constant 16 : index
    %126 = vector.load %arg4[%c0_60, %c0_61, %c16_62] : memref<2x8x32xbf16, #tpu.memory_space<vmem>>, vector<2x8x16xbf16>
    %127 = vector.extract_strided_slice %41 {offsets = [0, 16], sizes = [2, 16], strides = [1, 1]} : vector<2x32xf32> to vector<2x16xf32>
    %128 = vector.extract_strided_slice %21 {offsets = [0, 16], sizes = [2, 16], strides = [1, 1]} : vector<2x32xf32> to vector<2x16xf32>
    %129 = vector.extract_strided_slice %34 {offsets = [0, 32], sizes = [2, 16], strides = [1, 1]} : vector<2x64xf32> to vector<2x16xf32>
    %130 = vector.shape_cast %129 : vector<2x16xf32> to vector<2x1x16xf32>
    %131 = arith.truncf %130 : vector<2x1x16xf32> to vector<2x1x16xbf16>
    "tpu.trace_start"() <{level = 10 : i32, message = "bqd,bsd->bqs"}> : () -> ()
    %cst_63 = arith.constant dense<0.000000e+00> : vector<2x1x8xf32>
    %132 = tpu.matmul %131, %125, %cst_63 {dimension_numbers = #tpu.dot_dimension_numbers<[2], [2], [1], [1], [0, 0, 0, 1, 1, 1], [0], [0]>} : vector<2x1x16xbf16>, vector<2x8x16xbf16>, vector<2x1x8xf32> -> vector<2x1x8xf32>
    %cst_64 = arith.constant -1.000000e+30 : f32
    "tpu.trace_stop"() : () -> ()
    %133 = vector.shape_cast %52 : vector<1x1x8xi1> to vector<1x1x8xi1>
    %134 = vector.broadcast %133 : vector<1x1x8xi1> to vector<2x1x8xi1>
    %135 = vector.broadcast %cst_64 : f32 to vector<2x1x8xf32>
    %136 = arith.select %134, %132, %135 : vector<2x1x8xi1>, vector<2x1x8xf32>
    %137 = arith.mulf %129, %127 : vector<2x16xf32>
    %cst_65 = arith.constant dense<0.000000e+00> : vector<2xf32>
    %138 = vector.multi_reduction <add>, %137, %cst_65 [1] : vector<2x16xf32> to vector<2xf32>
    %139 = vector.shape_cast %138 : vector<2xf32> to vector<2x1xf32>
    %140 = vector.shape_cast %139 : vector<2x1xf32> to vector<2x1x1xf32>
    %cst_66 = arith.constant dense<0xFF800000> : vector<2x1xf32>
    %141 = vector.multi_reduction <maximumf>, %136, %cst_66 [2] : vector<2x1x8xf32> to vector<2x1xf32>
    %142 = vector.shape_cast %141 : vector<2x1xf32> to vector<2x1x1xf32>
    %143 = arith.maximumf %142, %140 : vector<2x1x1xf32>
    %144 = vector.broadcast %143 : vector<2x1x1xf32> to vector<2x1x8xf32>
    %145 = arith.subf %136, %144 : vector<2x1x8xf32>
    %146 = math.exp %145 : vector<2x1x8xf32>
    %147 = arith.subf %140, %143 : vector<2x1x1xf32>
    %148 = math.exp %147 : vector<2x1x1xf32>
    %cst_67 = arith.constant dense<0.000000e+00> : vector<2x1xf32>
    %149 = vector.multi_reduction <add>, %146, %cst_67 [2] : vector<2x1x8xf32> to vector<2x1xf32>
    %150 = vector.shape_cast %149 : vector<2x1xf32> to vector<2x1x1xf32>
    %151 = arith.addf %150, %148 : vector<2x1x1xf32>
    %152 = tpu.reciprocal %151 {approx = true} : vector<2x1x1xf32> -> vector<2x1x1xf32>
    %153 = arith.truncf %146 : vector<2x1x8xf32> to vector<2x1x8xbf16>
    "tpu.trace_start"() <{level = 10 : i32, message = "bqs,bsd->bqd"}> : () -> ()
    %cst_68 = arith.constant dense<0.000000e+00> : vector<2x1x16xf32>
    %154 = tpu.matmul %153, %126, %cst_68 {dimension_numbers = #tpu.dot_dimension_numbers<[2], [1], [1], [2], [0, 0, 0, 1, 1, 2], [0], [0]>} : vector<2x1x8xbf16>, vector<2x8x16xbf16>, vector<2x1x16xf32> -> vector<2x1x16xf32>
    "tpu.trace_stop"() : () -> ()
    %155 = vector.shape_cast %128 : vector<2x16xf32> to vector<2x1x16xf32>
    %156 = vector.broadcast %148 : vector<2x1x1xf32> to vector<2x1x16xf32>
    %157 = arith.mulf %156, %155 : vector<2x1x16xf32>
    %158 = arith.addf %154, %157 : vector<2x1x16xf32>
    %159 = vector.broadcast %152 : vector<2x1x1xf32> to vector<2x1x16xf32>
    %160 = arith.mulf %158, %159 : vector<2x1x16xf32>
    %161 = vector.shape_cast %160 : vector<2x1x16xf32> to vector<2x16xf32>
    %c0_69 = arith.constant 0 : index
    %c32 = arith.constant 32 : index
    %162 = vector.load %arg23[%c0_69, %c32] : memref<2x64xf32, #tpu.memory_space<vmem>>, vector<2x16xf32>
    tpu.vector_store %arg23[%c0_69, %c32], %161 {strides = array<i32>} : memref<2x64xf32, #tpu.memory_space<vmem>>, vector<2x16xf32>,
    %163 = vector.extract_strided_slice %34 {offsets = [0, 48], sizes = [2, 16], strides = [1, 1]} : vector<2x64xf32> to vector<2x16xf32>
    %164 = vector.shape_cast %163 : vector<2x16xf32> to vector<2x1x16xf32>
    %165 = arith.truncf %164 : vector<2x1x16xf32> to vector<2x1x16xbf16>
    "tpu.trace_start"() <{level = 10 : i32, message = "bqd,bsd->bqs"}> : () -> ()
    %cst_70 = arith.constant dense<0.000000e+00> : vector<2x1x8xf32>
    %166 = tpu.matmul %165, %125, %cst_70 {dimension_numbers = #tpu.dot_dimension_numbers<[2], [2], [1], [1], [0, 0, 0, 1, 1, 1], [0], [0]>} : vector<2x1x16xbf16>, vector<2x8x16xbf16>, vector<2x1x8xf32> -> vector<2x1x8xf32>
    %cst_71 = arith.constant -1.000000e+30 : f32
    "tpu.trace_stop"() : () -> ()
    %167 = vector.shape_cast %52 : vector<1x1x8xi1> to vector<1x1x8xi1>
    %168 = vector.broadcast %167 : vector<1x1x8xi1> to vector<2x1x8xi1>
    %169 = vector.broadcast %cst_71 : f32 to vector<2x1x8xf32>
    %170 = arith.select %168, %166, %169 : vector<2x1x8xi1>, vector<2x1x8xf32>
    %171 = arith.mulf %163, %127 : vector<2x16xf32>
    %cst_72 = arith.constant dense<0.000000e+00> : vector<2xf32>
    %172 = vector.multi_reduction <add>, %171, %cst_72 [1] : vector<2x16xf32> to vector<2xf32>
    %173 = vector.shape_cast %172 : vector<2xf32> to vector<2x1xf32>
    %174 = vector.shape_cast %173 : vector<2x1xf32> to vector<2x1x1xf32>
    %cst_73 = arith.constant dense<0xFF800000> : vector<2x1xf32>
    %175 = vector.multi_reduction <maximumf>, %170, %cst_73 [2] : vector<2x1x8xf32> to vector<2x1xf32>
    %176 = vector.shape_cast %175 : vector<2x1xf32> to vector<2x1x1xf32>
    %177 = arith.maximumf %176, %174 : vector<2x1x1xf32>
    %178 = vector.broadcast %177 : vector<2x1x1xf32> to vector<2x1x8xf32>
    %179 = arith.subf %170, %178 : vector<2x1x8xf32>
    %180 = math.exp %179 : vector<2x1x8xf32>
    %181 = arith.subf %174, %177 : vector<2x1x1xf32>
    %182 = math.exp %181 : vector<2x1x1xf32>
    %cst_74 = arith.constant dense<0.000000e+00> : vector<2x1xf32>
    %183 = vector.multi_reduction <add>, %180, %cst_74 [2] : vector<2x1x8xf32> to vector<2x1xf32>
    %184 = vector.shape_cast %183 : vector<2x1xf32> to vector<2x1x1xf32>
    %185 = arith.addf %184, %182 : vector<2x1x1xf32>
    %186 = tpu.reciprocal %185 {approx = true} : vector<2x1x1xf32> -> vector<2x1x1xf32>
    %187 = arith.truncf %180 : vector<2x1x8xf32> to vector<2x1x8xbf16>
    "tpu.trace_start"() <{level = 10 : i32, message = "bqs,bsd->bqd"}> : () -> ()
    %cst_75 = arith.constant dense<0.000000e+00> : vector<2x1x16xf32>
    %188 = tpu.matmul %187, %126, %cst_75 {dimension_numbers = #tpu.dot_dimension_numbers<[2], [1], [1], [2], [0, 0, 0, 1, 1, 2], [0], [0]>} : vector<2x1x8xbf16>, vector<2x8x16xbf16>, vector<2x1x16xf32> -> vector<2x1x16xf32>
    "tpu.trace_stop"() : () -> ()
    %189 = vector.shape_cast %128 : vector<2x16xf32> to vector<2x1x16xf32>
    %190 = vector.broadcast %182 : vector<2x1x1xf32> to vector<2x1x16xf32>
    %191 = arith.mulf %190, %189 : vector<2x1x16xf32>
    %192 = arith.addf %188, %191 : vector<2x1x16xf32>
    %193 = vector.broadcast %186 : vector<2x1x1xf32> to vector<2x1x16xf32>
    %194 = arith.mulf %192, %193 : vector<2x1x16xf32>
    %195 = vector.shape_cast %194 : vector<2x1x16xf32> to vector<2x16xf32>
    %c0_76 = arith.constant 0 : index
    %c48 = arith.constant 48 : index
    %196 = vector.load %arg23[%c0_76, %c48] : memref<2x64xf32, #tpu.memory_space<vmem>>, vector<2x16xf32>
    tpu.vector_store %arg23[%c0_76, %c48], %195 {strides = array<i32>} : memref<2x64xf32, #tpu.memory_space<vmem>>, vector<2x16xf32>,
    %c0_77 = arith.constant 0 : index
    %c0_78 = arith.constant 0 : index
    %197 = vector.load %arg23[%c0_77, %c0_78] : memref<2x64xf32, #tpu.memory_space<vmem>>, vector<2x64xf32>
    %198 = arith.truncf %197 : vector<2x64xf32> to vector<2x64xbf16>
    %c0_79 = arith.constant 0 : index
    %c0_80 = arith.constant 0 : index
    %199 = vector.load %arg10[%c0_79, %c0_80] : memref<64x64xbf16, #tpu.memory_space<vmem>>, vector<64x64xbf16>
    %cst_81 = arith.constant dense<0.000000e+00> : vector<2x64xf32>
    %200 = tpu.matmul %198, %199, %cst_81 {dimension_numbers = #tpu.dot_dimension_numbers<[1], [0], [0], [1], [0, 0, 1, 1], [], []>} : vector<2x64xbf16>, vector<64x64xbf16>, vector<2x64xf32> -> vector<2x64xf32>
    %201 = arith.addf %1, %200 : vector<2x64xf32>
    %202 = arith.mulf %201, %201 : vector<2x64xf32>
    %cst_82 = arith.constant dense<0.000000e+00> : vector<2xf32>
    %203 = vector.multi_reduction <add>, %202, %cst_82 [1] : vector<2x64xf32> to vector<2xf32>
    %204 = vector.shape_cast %203 : vector<2xf32> to vector<2x1xf32>
    %cst_83 = arith.constant 6.400000e+01 : f32
    %205 = vector.broadcast %cst_83 : f32 to vector<2x1xf32>
    %206 = arith.divf %204, %205 : vector<2x1xf32>
    %cst_84 = arith.constant 9.99999974E-6 : f32
    %207 = vector.broadcast %cst_84 : f32 to vector<2x1xf32>
    %208 = arith.addf %206, %207 : vector<2x1xf32>
    %209 = math.rsqrt %208 : vector<2x1xf32>
    %210 = vector.broadcast %209 : vector<2x1xf32> to vector<2x64xf32>
    %211 = arith.mulf %201, %210 : vector<2x64xf32>
    %c0_85 = arith.constant 0 : index
    %c0_86 = arith.constant 0 : index
    %212 = vector.load %arg6[%c0_85, %c0_86] : memref<1x64xf32, #tpu.memory_space<vmem>>, vector<1x64xf32>
    %213 = vector.broadcast %212 : vector<1x64xf32> to vector<2x64xf32>
    %214 = arith.mulf %211, %213 : vector<2x64xf32>
    %215 = arith.truncf %214 : vector<2x64xf32> to vector<2x64xbf16>
    %c0_87 = arith.constant 0 : index
    %c0_88 = arith.constant 0 : index
    %216 = vector.load %arg17[%c0_87, %c0_88] : memref<64x192xbf16, #tpu.memory_space<vmem>>, vector<64x192xbf16>
    %cst_89 = arith.constant dense<0.000000e+00> : vector<2x192xf32>
    %217 = tpu.matmul %215, %216, %cst_89 {dimension_numbers = #tpu.dot_dimension_numbers<[1], [0], [0], [1], [0, 0, 1, 1], [], []>} : vector<2x64xbf16>, vector<64x192xbf16>, vector<2x192xf32> -> vector<2x192xf32>
    %c0_90 = arith.constant 0 : index
    %c0_91 = arith.constant 0 : index
    %218 = vector.load %arg18[%c0_90, %c0_91] : memref<64x192xbf16, #tpu.memory_space<vmem>>, vector<64x192xbf16>
    %cst_92 = arith.constant dense<0.000000e+00> : vector<2x192xf32>
    %219 = tpu.matmul %215, %218, %cst_92 {dimension_numbers = #tpu.dot_dimension_numbers<[1], [0], [0], [1], [0, 0, 1, 1], [], []>} : vector<2x64xbf16>, vector<64x192xbf16>, vector<2x192xf32> -> vector<2x192xf32>
    %220 = arith.negf %217 : vector<2x192xf32>
    %221 = math.exp %220 : vector<2x192xf32>
    %cst_93 = arith.constant 1.000000e+00 : f32
    %222 = vector.broadcast %cst_93 : f32 to vector<2x192xf32>
    %223 = arith.addf %222, %221 : vector<2x192xf32>
    %224 = arith.divf %222, %223 : vector<2x192xf32>
    %225 = arith.mulf %217, %224 : vector<2x192xf32>
    %226 = arith.mulf %225, %219 : vector<2x192xf32>
    %227 = arith.truncf %226 : vector<2x192xf32> to vector<2x192xbf16>
    %c0_94 = arith.constant 0 : index
    %c0_95 = arith.constant 0 : index
    %228 = vector.load %arg19[%c0_94, %c0_95] : memref<192x64xbf16, #tpu.memory_space<vmem>>, vector<192x64xbf16>
    %cst_96 = arith.constant dense<0.000000e+00> : vector<2x64xf32>
    %229 = tpu.matmul %227, %228, %cst_96 {dimension_numbers = #tpu.dot_dimension_numbers<[1], [0], [0], [1], [0, 0, 1, 1], [], []>} : vector<2x192xbf16>, vector<192x64xbf16>, vector<2x64xf32> -> vector<2x64xf32>
    %230 = arith.addf %201, %229 : vector<2x64xf32>
    %c0_97 = arith.constant 0 : index
    %c0_98 = arith.constant 0 : index
    %231 = vector.load %arg20[%c0_97, %c0_98] : memref<2x64xf32, #tpu.memory_space<vmem>>, vector<2x64xf32>
    tpu.vector_store %arg20[%c0_97, %c0_98], %230 {strides = array<i32>} : memref<2x64xf32, #tpu.memory_space<vmem>>, vector<2x64xf32>,
    return
  }
  func.func @transform_0(%arg0: i32, %arg1: memref<1xi32, #tpu.memory_space<smem>>) -> (i32, i32) {
    %c0_i32 = arith.constant 0 : i32
    %c0_i32_0 = arith.constant 0 : i32
    return %arg0, %c0_i32 : i32, i32
  }
  func.func @transform_1(%arg0: i32, %arg1: memref<1xi32, #tpu.memory_space<smem>>) -> (i32, i32, i32) {
    %c0_i32 = arith.constant 0 : i32
    %c0_i32_0 = arith.constant 0 : i32
    %c0_i32_1 = arith.constant 0 : i32
    return %arg0, %c0_i32, %c0_i32_0 : i32, i32, i32
  }
  func.func @transform_2(%arg0: i32, %arg1: memref<1xi32, #tpu.memory_space<smem>>) -> (i32, i32, i32) {
    %c0_i32 = arith.constant 0 : i32
    %c0_i32_0 = arith.constant 0 : i32
    %c0_i32_1 = arith.constant 0 : i32
    return %arg0, %c0_i32, %c0_i32_0 : i32, i32, i32
  }
  func.func @transform_3(%arg0: i32, %arg1: memref<1xi32, #tpu.memory_space<smem>>) -> (i32, i32) {
    %c0_i32 = arith.constant 0 : i32
    %c0_i32_0 = arith.constant 0 : i32
    %c0_i32_1 = arith.constant 0 : i32
    return %c0_i32, %c0_i32_0 : i32, i32
  }
  func.func @transform_4(%arg0: i32, %arg1: memref<1xi32, #tpu.memory_space<smem>>) -> (i32, i32) {
    %c0_i32 = arith.constant 0 : i32
    %c0_i32_0 = arith.constant 0 : i32
    %c0_i32_1 = arith.constant 0 : i32
    return %c0_i32, %c0_i32_0 : i32, i32
  }
  func.func @transform_5(%arg0: i32, %arg1: memref<1xi32, #tpu.memory_space<smem>>) -> (i32, i32) {
    %c0_i32 = arith.constant 0 : i32
    %c0_i32_0 = arith.constant 0 : i32
    %c0_i32_1 = arith.constant 0 : i32
    return %c0_i32, %c0_i32_0 : i32, i32
  }
  func.func @transform_6(%arg0: i32, %arg1: memref<1xi32, #tpu.memory_space<smem>>) -> (i32, i32) {
    %c0_i32 = arith.constant 0 : i32
    %c0_i32_0 = arith.constant 0 : i32
    %c0_i32_1 = arith.constant 0 : i32
    return %c0_i32, %c0_i32_0 : i32, i32
  }
  func.func @transform_7(%arg0: i32, %arg1: memref<1xi32, #tpu.memory_space<smem>>) -> (i32, i32) {
    %c0_i32 = arith.constant 0 : i32
    %c0_i32_0 = arith.constant 0 : i32
    %c0_i32_1 = arith.constant 0 : i32
    return %c0_i32, %c0_i32_0 : i32, i32
  }
  func.func @transform_8(%arg0: i32, %arg1: memref<1xi32, #tpu.memory_space<smem>>) -> (i32, i32) {
    %c0_i32 = arith.constant 0 : i32
    %c0_i32_0 = arith.constant 0 : i32
    %c0_i32_1 = arith.constant 0 : i32
    return %c0_i32, %c0_i32_0 : i32, i32
  }
  func.func @transform_9(%arg0: i32, %arg1: memref<1xi32, #tpu.memory_space<smem>>) -> (i32, i32) {
    %c0_i32 = arith.constant 0 : i32
    %c0_i32_0 = arith.constant 0 : i32
    %c0_i32_1 = arith.constant 0 : i32
    return %c0_i32, %c0_i32_0 : i32, i32
  }
  func.func @transform_10(%arg0: i32, %arg1: memref<1xi32, #tpu.memory_space<smem>>) -> (i32, i32) {
    %c0_i32 = arith.constant 0 : i32
    %c0_i32_0 = arith.constant 0 : i32
    %c0_i32_1 = arith.constant 0 : i32
    return %c0_i32, %c0_i32_0 : i32, i32
  }
  func.func @transform_11(%arg0: i32, %arg1: memref<1xi32, #tpu.memory_space<smem>>) -> (i32, i32) {
    %c0_i32 = arith.constant 0 : i32
    %c0_i32_0 = arith.constant 0 : i32
    %c0_i32_1 = arith.constant 0 : i32
    return %c0_i32, %c0_i32_0 : i32, i32
  }
  func.func @transform_12(%arg0: i32, %arg1: memref<1xi32, #tpu.memory_space<smem>>) -> (i32, i32) {
    %c0_i32 = arith.constant 0 : i32
    %c0_i32_0 = arith.constant 0 : i32
    %c0_i32_1 = arith.constant 0 : i32
    return %c0_i32, %c0_i32_0 : i32, i32
  }
  func.func @transform_13(%arg0: i32, %arg1: memref<1xi32, #tpu.memory_space<smem>>) -> (i32, i32) {
    %c0_i32 = arith.constant 0 : i32
    %c0_i32_0 = arith.constant 0 : i32
    %c0_i32_1 = arith.constant 0 : i32
    return %c0_i32, %c0_i32_0 : i32, i32
  }
  func.func @transform_14(%arg0: i32, %arg1: memref<1xi32, #tpu.memory_space<smem>>) -> (i32, i32) {
    %c0_i32 = arith.constant 0 : i32
    %c0_i32_0 = arith.constant 0 : i32
    %c0_i32_1 = arith.constant 0 : i32
    return %c0_i32, %c0_i32_0 : i32, i32
  }
  func.func @transform_15(%arg0: i32, %arg1: memref<1xi32, #tpu.memory_space<smem>>) -> (i32, i32) {
    %c0_i32 = arith.constant 0 : i32
    %c0_i32_0 = arith.constant 0 : i32
    %c0_i32_1 = arith.constant 0 : i32
    return %c0_i32, %c0_i32_0 : i32, i32
  }
  func.func @transform_16(%arg0: i32, %arg1: memref<1xi32, #tpu.memory_space<smem>>) -> (i32, i32) {
    %c0_i32 = arith.constant 0 : i32
    %c0_i32_0 = arith.constant 0 : i32
    %c0_i32_1 = arith.constant 0 : i32
    return %c0_i32, %c0_i32_0 : i32, i32
  }
  func.func @transform_17(%arg0: i32, %arg1: memref<1xi32, #tpu.memory_space<smem>>) -> (i32, i32) {
    %c0_i32 = arith.constant 0 : i32
    %c0_i32_0 = arith.constant 0 : i32
    %c0_i32_1 = arith.constant 0 : i32
    return %c0_i32, %c0_i32_0 : i32, i32
  }
  func.func @transform_18(%arg0: i32, %arg1: memref<1xi32, #tpu.memory_space<smem>>) -> (i32, i32) {
    %c0_i32 = arith.constant 0 : i32
    %c0_i32_0 = arith.constant 0 : i32
    return %arg0, %c0_i32 : i32, i32
  }
  func.func @transform_19(%arg0: i32, %arg1: memref<1xi32, #tpu.memory_space<smem>>) -> (i32, i32, i32) {
    %c0_i32 = arith.constant 0 : i32
    %c0_i32_0 = arith.constant 0 : i32
    %c0_i32_1 = arith.constant 0 : i32
    return %arg0, %c0_i32, %c0_i32_0 : i32, i32, i32
  }
  func.func @transform_20(%arg0: i32, %arg1: memref<1xi32, #tpu.memory_space<smem>>) -> (i32, i32, i32) {
    %c0_i32 = arith.constant 0 : i32
    %c0_i32_0 = arith.constant 0 : i32
    %c0_i32_1 = arith.constant 0 : i32
    return %arg0, %c0_i32, %c0_i32_0 : i32, i32, i32
  }
}

</mosaic_0001>

<bundles_post_ra>
// kernel: tpu_custom_call.1
= control target key start
LH: loop header
LB: loop body
LE: loop exit
PB: predicated region body
PF: predicated region fallthrough
CT: control target
= control target key end

     0   :  { %s3268_s0 = inlined_call_operand.<no memory space> [shape: s32[1], index: 0, kind: input, shape index: {}]   ;;  %s3269_s1 = inlined_call_operand.vmem [shape: f32[2,64], index: 1, kind: input, shape index: {}]   ;;  %s3270_s2 = inlined_call_operand.vmem [shape: bf16[2,8,32], index: 2, kind: input, shape index: {}]   ;;  %s3271_s3 = inlined_call_operand.vmem [shape: bf16[2,8,32], index: 3, kind: input, shape index: {}]   ;;  %s3272_s4 = inlined_call_operand.vmem [shape: f32[1,64], index: 4, kind: input, shape index: {}]   ;;  %s3273_s5 = inlined_call_operand.vmem [shape: f32[1,64], index: 5, kind: input, shape index: {}]   ;;  %s3274_s6 = inlined_call_operand.hbm [shape: bf16[64,64], index: 6, kind: input, shape index: {}]   ;;  %s3275_s7 = inlined_call_operand.vmem [shape: bf16[64,32], index: 7, kind: input, shape index: {}]   ;;  %s3276_s8 = inlined_call_operand.vmem [shape: bf16[64,32], index: 8, kind: input, shape index: {}]   ;;  %s3277_s9 = inlined_call_operand.hbm [shape: bf16[64,64], index: 9, kind: input, shape index: {}]   ;;  %s3278_s10 = inlined_call_operand.vmem [shape: f32[1,64], index: 10, kind: input, shape index: {}]   ;;  %s3279_s11 = inlined_call_operand.vmem [shape: f32[1,64], index: 11, kind: input, shape index: {}]   ;;  %s3280_s12 = inlined_call_operand.vmem [shape: f32[1,32], index: 12, kind: input, shape index: {}]   ;;  %s3281_s13 = inlined_call_operand.vmem [shape: f32[1,32], index: 13, kind: input, shape index: {}]   ;;  %s3282_s14 = inlined_call_operand.vmem [shape: f32[64,64], index: 14, kind: input, shape index: {}]   ;;  %s3283_s15 = inlined_call_operand.hbm [shape: f32[32,32], index: 15, kind: input, shape index: {}]   ;;  %s3284_s16 = inlined_call_operand.vmem [shape: bf16[64,192], index: 16, kind: input, shape index: {}]   ;;  %s3285_s17 = inlined_call_operand.vmem [shape: bf16[64,192], index: 17, kind: input, shape index: {}]   ;;  %s3286_s18 = inlined_call_operand.vmem [shape: bf16[192,64], index: 18, kind: input, shape index: {}]   ;;  %s3287_s19 = inlined_call_operand.hbm [shape: f32[2,64], index: 19, kind: output, shape index: {0}]   ;;  %s3288_s20 = inlined_call_operand.vmem [shape: bf16[2,1,32], index: 20, kind: output, shape index: {1}]   ;;  %s3289_s21 = inlined_call_operand.vmem [shape: bf16[2,1,32], index: 21, kind: output, shape index: {2}]  }
   0x1   :  { %3293 = sst [smem:[#allocation15_spill]] %s3268_s0 }
   0x2   :  { %3294 = sst [smem:[#allocation16_spill]] %s3269_s1 }
   0x3   :  { %3295 = sst [smem:[#allocation17_spill]] %s3270_s2 }
   0x4   :  { %3296 = sst [smem:[#allocation18_spill]] %s3271_s3 }
   0x5   :  { %3297 = sst [smem:[#allocation19_spill]] %s3272_s4 }
   0x6   :  { %3298 = sst [smem:[#allocation20_spill]] %s3273_s5 }
   0x7   :  { %28 = vsyncpa [#allocation6], 0 }
   0x8   :  { %29 = vsyncpa [#allocation9], 0 }
   0x9   :  { %30 = vsyncpa [#allocation7], 0  ;;  %s2528_s24 = smov [#allocation8]   ;;  %s2529_s25 = smov [#allocation5]  }
   0xa   :  { %s62_s2 = sshll.u32 %s2528_s24, 4  ;;  %s46_s26 = sshll.u32 %s2529_s25, 4  ;;  %s63_s2 = int_to_ptr.vmem [resolvable:$true] %s62_s2  ;;  %s47_s26 = int_to_ptr.vmem [resolvable:$true] %s46_s26 }
   0xb   :  { %s2450_s27 = scalar_lea.vmem %s63_s2, 512  ;;  %p2455_p1 = scmp.lt.s32.totalorder %s63_s2, %s63_s2 }
   0xc   :  { %p2451_p0 = scmp.ne.s32.totalorder %s63_s2, %s2450_s27  ;;  %p2456_p2 = scmp.lt.s32.totalorder %s2450_s27, %s2450_s27 }
   0xe   :  { %p2457_p3 = por %p2456_p2, %p2455_p1 }
  0x10   :  { %p2458_p4 = pnand %p2457_p3, %p2451_p0 }
  0x12   :  { %2461 = shalt.err (!%p2458_p4)
}
  0x13   :  { %s2530_s3 = smov 64   ;;  %s2531_s28 = smov 4  }
  0x14   :  { %68 = dma.hbm_to_vmem [thread:$0]  %s3277_s9, 512, %s63_s2, [#allocation9], %s2530_s3, %s2530_s3, %s2531_s28  }
  0x15   :  { %s2470_s4 = scalar_lea.vmem %s47_s26, 512  ;;  %p2475_p6 = scmp.lt.s32.totalorder %s47_s26, %s47_s26 }
  0x16   :  { %p2471_p5 = scmp.ne.s32.totalorder %s47_s26, %s2470_s4  ;;  %p2476_p7 = scmp.lt.s32.totalorder %s2470_s4, %s2470_s4 }
  0x18   :  { %p2477_p8 = por %p2476_p7, %p2475_p6 }
  0x1a   :  { %p2478_p9 = pnand %p2477_p8, %p2471_p5 }
  0x1c   :  { %2481 = shalt.err (!%p2478_p9)
}
  0x1d   :  { %52 = dma.hbm_to_vmem [thread:$0]  %s3274_s6, 512, %s47_s26, [#allocation6], %s2530_s3, %s2530_s3, %s2531_s28  }
  0x1e   :  { %s2532_s22 = smov [#allocation10]  }
  0x1f   :  { %s84_s23 = sshll.u32 %s2532_s22, 4  ;;  %s85_s23 = int_to_ptr.vmem [resolvable:$true] %s84_s23 }
  0x20   :  { %s2490_s1 = scalar_lea.vmem %s85_s23, 512  ;;  %p2495_p11 = scmp.lt.s32.totalorder %s85_s23, %s85_s23 }
  0x21   :  { %p2491_p10 = scmp.ne.s32.totalorder %s85_s23, %s2490_s1  ;;  %p2496_p12 = scmp.lt.s32.totalorder %s2490_s1, %s2490_s1 }
  0x23   :  { %p2497_p13 = por %p2496_p12, %p2495_p11 }
  0x25   :  { %p2498_p0 = pnand %p2497_p13, %p2491_p10 }
  0x27   :  { %2501 = shalt.err (!%p2498_p0)
}
  0x28   :  { %s2533_s9 = smov 128   ;;  %s2534_s14 = smov 8  }
  0x29   :  { %90 = dma.hbm_to_vmem [thread:$0]  %s3283_s15, 512, %s85_s23, [#allocation9], %s2533_s9, %s2533_s9, %s2534_s14  }
  0x2a   :  { %2522 = dma.done.wait [#allocation6], 512  }
  0x2b   :  { %2523 = vsyncadd [#allocation6], 4294966784 }
  0x2c   :  { %2524 = dma.done.wait [#allocation9], 1024  }
  0x2d   :  { %2525 = vsyncadd [#allocation9], 4294966272  ;;  %vm110_vm0 = vcmask 517120   ;;  %s3299_s26 = sld [smem:[#allocation16_spill]]  ;;  %v2325_v3 = vld [vmem:[#allocation5 + $0x18] sm:$0xff]   ;;  %v2535_v4 = vmov 0.0   ;;  %v348_v32 = vlaneseq }
  0x2e   :  { %2160 = vmatprep.subr.bf16.mxu0 %v2535_v4  ;;  %v2326_v5 = vld [vmem:[#allocation5 + $0x10] sm:$0xff]   ;;  %vm2536_vm1 = vmmov 0   ;;  %2196 = vmatprep.subr.bf16.mxu1 %v2535_v4  ;;  %v2327_v6 = vld [vmem:[#allocation5 + $0x8] sm:$0xff]   ;;  %v2328_v7 = vld [vmem:[#allocation5] sm:$0xff]   ;;  %s3300_s28 = sld [smem:[#allocation19_spill]]  ;;  %vm160_vm2 = vcmask 523264  }
  0x2f   :  { %2168 = vmatprep.mubr.msk.bf16.mxu0 %vm2536_vm1, %v2535_v4  ;;  %2161 = vmatpush3.bf16.msra.mxu0 %v2325_v3  ;;  %v2329_v15 = vld [vmem:[%s3275_s7 + $0x18] sm:$0xff]   ;;  %v2330_v17 = vld [vmem:[%s3275_s7 + $0x10] sm:$0xff]   ;;  %v2331_v18 = vld [vmem:[%s3275_s7 + $0x8] sm:$0xff]   ;;  %v2537_v33 = vmov 1966171168   ;;  %v2733_v36 = vshrl.u32 %v348_v32, 7 }
  0x30   :  { %2162 = vmatprep.subr.bf16.mxu0 %v2535_v4  ;;  %2198 = vmatprep.mubr.msk.bf16.mxu1 %vm2536_vm1, %v2535_v4  ;;  %v2332_v19 = vld [vmem:[%s3275_s7] sm:$0xff]   ;;  %v2333_v20 = vld [vmem:[%s3276_s8 + $0x18] sm:$0xff]   ;;  %v2334_v21 = vld [vmem:[%s3276_s8 + $0x10] sm:$0xff]   ;;  %v420_v34 = vunpack.c.l.s4 %v2537_v33  ;;  %vm439_vm3 = vcmask 253952   ;;  %vm440_vm4 = vsmask.f32 256 }
  0x31   :  { %v2335_v22 = vld [vmem:[%s3276_s8 + $0x8] sm:$0xff]   ;;  %v2336_v23 = vld [vmem:[%s3276_s8] sm:$0xff]   ;;  %vm2744_vm5 = vmand %vm439_vm3, %vm440_vm4  ;;  %vm352_vm6 = vcmask 1048064   ;;  %s3303_s1 = sld [smem:[#allocation17_spill]]  ;;  %vm509_vm7 = vcmask 130048   ;;  %s2539_s9 = smov 65  }
  0x32   :  { %v421_v35 = vunpack.c.0.s8 %v420_v34  ;;  %v470_v45 = vld [vmem:[%s3289_s21] sm:$0x1]  ;;  %v473_v49 = vld [vmem:[%s3289_s21 + $0x1] sm:$0x1]  ;;  %v349_v59 = vand.u32 127, %v348_v32  ;;  %vm367_vm9 = vcmask 1047808  }
  0x33   :  { %v108_v0 = vld [vmem:[%s3299_s26] sm:$0x3]  ;;  %2163 = vmatpush3.bf16.msra.mxu0 %v2326_v5  ;;  %s2541_s6 = smov 97   ;;  %s3306_s8 = sld [smem:[#allocation15_spill]]  ;;  %vm622_vm11 = vcmask 57344   ;;  %vm607_vm12 = vcmask 123904  }
  0x34   :  { %v109_v1 = vmul.f32 %v108_v0, %v108_v0  ;;  %2164 = vmatprep.subr.bf16.mxu0 %v2535_v4  ;;  %v2027_v12 = vld [vmem:[%s3300_s28] ss:$0 sm:$0xff]  ;;  %v2738_v38 = vsub.s32 %v421_v35, %v2733_v36  ;;  %v350_v60 = vand.u32 1, %v349_v59  ;;  %s2542_s27 = smov 112   ;;  %s2543_s30 = smov 16   ;;  %vm686_vm13 = vcmask 1043456  }
  0x35   :  { %v2043_v63 = vld [vmem:[%s3278_s10] ss:$0 sm:$0xff]  ;;  %s3309_s7 = sld [smem:[#allocation18_spill]]  ;;  %vm682_vm14 = vcmask 64512   ;;  %s2544_s25 = smov 96   ;;  %vm781_vm15 = vcmask 1041409  }
  0x36   :  { %v111_v2 = vsel %vm110_vm0, %v109_v1, 0.0  ;;  %vm2776_vm8 = vcmp.eq.s32.totalorder %v350_v60, 0  ;;  %v2045_v34 = vld [vmem:[%s3280_s12] ss:$0 sm:$0xff]  ;;  %s2545_s29 = smov 80   ;;  %vm1321_vm3 = vcmask 386304  }
  0x37   :  { %112 = vadd.xlane.f32.xlu0 %v111_v2  ;;  %2165 = vmatpush3.bf16.msra.mxu0 %v2327_v6  ;;  %v478_v55 = vld [vmem:[%s3303_s1] sm:$0xf]  ;;  %vm1566_vm4 = vcmask 517504  }
  0x38   :  { %2166 = vmatprep.subr.bf16.mxu0 %v2535_v4  ;;  %v2769_v56 = vsel %vm509_vm7, %v478_v55, 0  ;;  %v2046_v35 = vld [vmem:[%s3281_s13] ss:$0 sm:$0xff] }
  0x39   :  { %2197 = vmatpush3.bf16.xpose.msra.mxu1 %v2769_v56 }
  0x3a   :  { %2202 = vmatprep.subr.bf16.mxu1 %v2535_v4 }
  0x3b   :  { %2167 = vmatpush3.bf16.msra.mxu0 %v2328_v7  ;;  %v480_v60 = vld [vmem:[%s3309_s7] sm:$0xf] }
  0x3c   :  { %2172 = vmatprep.subr.bf16.mxu0 %v2535_v4  ;;  %v688_v62 = vsel %vm686_vm13, %v480_v60, 0 }
  0xc0   :  { %v113_v8 = vpop.xlane.xlu0 %112 }
  0xc1   :  { %v115_v9 = vmul.f32 0.015625, %v113_v8 }
  0xc3   :  { %v116_v10 = vadd.f32 1e-05, %v115_v9 }
  0xc5   :  { %2381 = vrsqrt.f32 %v116_v10 }
  0xd2   :  { %v2382_v11 = vpop.eup %2381 }
  0xd3   :  { %v118_v13 = vmul.f32 %v2382_v11, %v108_v0  ;;  %v2044_v0 = vld [vmem:[%s3279_s11] ss:$0 sm:$0xff]  ;;  %v479_v11 = vld [vmem:[%s3303_s1 + $0x4] sm:$0xf] }
  0xd5   :  { %v126_v14 = vmul.f32 %v2027_v12, %v118_v13 }
  0xd7   :  { %v127_v16 = vpack.c.bf16 %v126_v14, %v126_v14 }
  0xd9   :  { %2169 = vmatmul.mubr.msk.bf16.vlgmr.msra.gmra.mxu0 %vm160_vm2, %v127_v16 }
  0xda   :  { %2173 = vmatpush3.bf16.msra.mxu0 %v2329_v15  ;;  %2180 = vmatprep.mubr.msk.bf16.mxu0 %vm2536_vm1, %v2535_v4  ;;  %v2802_v15 = vsel %vm509_vm7, %v479_v11, 0 }
  0xdb   :  { %2174 = vmatprep.subr.bf16.mxu0 %v2535_v4 }
  0xde   :  { %2175 = vmatpush3.bf16.msra.mxu0 %v2330_v17 }
  0xdf   :  { %2176 = vmatprep.subr.bf16.mxu0 %v2535_v4 }
  0xe2   :  { %2177 = vmatpush3.bf16.msra.mxu0 %v2331_v18 }
  0xe3   :  { %2178 = vmatprep.subr.bf16.mxu0 %v2535_v4 }
  0xe6   :  { %2179 = vmatpush3.bf16.msra.mxu0 %v2332_v19 }
  0xe7   :  { %2184 = vmatprep.subr.bf16.mxu0 %v2535_v4 }
  0xe9   :  { %2181 = vmatmul.mubr.msk.bf16.vlgmr.msra.gmra.mxu0 %vm160_vm2, %v127_v16 }
  0xea   :  { %2185 = vmatpush3.bf16.msra.mxu0 %v2333_v20  ;;  %2192 = vmatprep.mubr.msk.bf16.mxu0 %vm2536_vm1, %v2535_v4 }
  0xeb   :  { %2186 = vmatprep.subr.bf16.mxu0 %v2535_v4 }
  0xee   :  { %2187 = vmatpush3.bf16.msra.mxu0 %v2334_v21 }
  0xef   :  { %2188 = vmatprep.subr.bf16.mxu0 %v2535_v4 }
  0xf2   :  { %2189 = vmatpush3.bf16.msra.mxu0 %v2335_v22 }
  0xf3   :  { %2190 = vmatprep.subr.bf16.mxu0 %v2535_v4 }
  0xf6   :  { %2191 = vmatpush3.bf16.msra.mxu0 %v2336_v23  ;;  %v476_v23 = vstv %s3306_s8 }
  0xf7   :  { %2208 = vmatprep.subr.bf16.mxu0 %v2535_v4  ;;  %vm2823_vm10 = vcmp.lt.s32.totalorder %v349_v59, %v476_v23  ;;  %v481_v59 = vld [vmem:[%s3309_s7 + $0x4] sm:$0xf] }
  0xf9   :  { %2193 = vmatmul.mubr.msk.bf16.vlgmr.msra.gmra.mxu0 %vm160_vm2, %v127_v16 }
  0xfa   :  { %2210 = vmatprep.mubr.msk.bf16.mxu0 %vm2536_vm1, %v2535_v4  ;;  %2209 = vmatpush3.bf16.msra.mxu0 %v688_v62 }
  0xfb   :  { %2220 = vmatprep.subr.bf16.mxu0 %v2535_v4 }
 0x199   :  { %v198_v24 = vpop.f32.mrf.mxu0 }
 0x19a   :  { %353 = vrot.lane.b32.xlu0 %v198_v24, %s2530_s3  ;;  %v389_v3 = vmul.f32 %v2043_v63, %v198_v24 }
 0x19b   :  { %v2170_v25 = vpop.f32.mrf.mxu0 }
 0x19d   :  { %v201_v26 = vpop.f32.mrf.mxu0 }
 0x19f   :  { %v2171_v27 = vpop.f32.mrf.mxu0 }
 0x1a9   :  { %v2731_v28 = vpop.f32.mrf.mxu0 }
 0x1ab   :  { %v2182_v29 = vpop.f32.mrf.mxu0 }
 0x1ad   :  { %v273_v30 = vpop.f32.mrf.mxu0 }
 0x1af   :  { %v2183_v31 = vpop.f32.mrf.mxu0 }
 0x1b9   :  { %v2735_v37 = vpop.f32.mrf.mxu0 }
 0x1ba   :  { %v448_v39 = vpack.c.bf16 %v2735_v37, %v2735_v37 }
 0x1bb   :  { %v2194_v40 = vpop.f32.mrf.mxu0 }
 0x1bc   :  { %v456_v41 = vrot.slane %v448_v39, %v2738_v38 }
 0x1bd   :  { %v345_v42 = vpop.f32.mrf.mxu0 }
 0x1be   :  { %v463_v43 = vrot.slane %v456_v41, %v2738_v38  ;;  %v407_v41 = vmul.f32 %v2045_v34, %v2731_v28 }
 0x1bf   :  { %v2195_v46 = vpop.f32.mrf.mxu0 }
 0x1c0   :  { %v465_v47 = vunpack.i.h.s16 %v463_v43  ;;  %v2048_v48 = vpack.i.b16 %v463_v43, %v463_v43 }
 0x1c2   :  { %v467_v50 = vpack.i.b16 %v465_v47, %v465_v47  ;;  %v471_v51 = vsel %vm2744_vm5, %v2048_v48, %v470_v45 }
 0x1c3   :  { %472 = vst [vmem:[%s3289_s21] sm:$0x1] %v471_v51 }
 0x1c4   :  { %v474_v52 = vsel %vm2744_vm5, %v467_v50, %v473_v49  ;;  %v442_v50 = vld [vmem:[%s3288_s20] sm:$0x1] }
 0x1c5   :  { %475 = vst [vmem:[%s3289_s21 + $0x1] sm:$0x1] %v474_v52  ;;  %s2538_s21 = smov 127  }
 0x20c   :  { %v354_v53 = vpop.permute.xlu0 %353 }
 0x20d   :  { %v355_v54 = vsel %vm352_vm6, %v354_v53, %v198_v24 }
 0x20e   :  { %356 = vrot.lane.b32.xlu1 %v355_v54, %s2530_s3  ;;  %s2540_s3 = smov 32   ;;  %v445_v54 = vld [vmem:[%s3288_s20 + $0x1] sm:$0x1] }
 0x280   :  { %v357_v57 = vpop.permute.xlu1 %356 }
 0x281   :  { %v358_v58 = vsel %vm352_vm6, %v357_v57, %v198_v24 }
 0x282   :  { %360 = vrot.lane.b32.xlu1 %v358_v58, %s2538_s21 }
 0x286   :  { %363 = vrot.lane.b32.xlu1 %v358_v58, %s2539_s9  ;;  %s3310_s9 = sld [smem:[#allocation20_spill]] }
 0x28a   :  { %368 = vrot.lane.b32.xlu1 %v2731_v28, %s2540_s3 }
 0x2f4   :  { %v361_v61 = vpop.permute.xlu1 %360 }
 0x2f8   :  { %v364_v1 = vpop.permute.xlu1 %363 }
 0x2f9   :  { %v366_v2 = vsel %vm2776_vm8, %v361_v61, %v364_v1  ;;  %v734_v61 = vsel %vm686_vm13, %v481_v59, 0 }
 0x2fa   :  { %v397_v5 = vmul.f32 %v2044_v0, %v366_v2  ;;  %v2892_v2 = vsub.s32 1, %v2733_v36 }
 0x2fc   :  { %v398_v6 = vadd.f32 %v397_v5, %v389_v3  ;;  %v369_v7 = vpop.permute.xlu1 %368  ;;  %v2895_v5 = vsub.s32 0, %v2733_v36 }
 0x2fd   :  { %v370_v8 = vsel %vm367_vm9, %v369_v7, %v2731_v28 }
 0x2fe   :  { %v2790_v9 = vmul.f32 0.25, %v398_v6  ;;  %371 = vrot.lane.b32.xlu1 %v370_v8, %s2540_s3 }
 0x300   :  { %v489_v10 = vrot.slane %v2790_v9, %v2738_v38 }
 0x302   :  { %v497_v12 = vrot.slane %v489_v10, %v2738_v38  ;;  %v490_v13 = vcombine.high %v489_v10, %v489_v10 }
 0x304   :  { %v2799_v14 = vpack.c.bf16 %v497_v12, %v497_v12  ;;  %v504_v16 = vrot.slane %v490_v13, %v2738_v38 }
 0x306   :  { %2199 = vmatmul.mubr.msk.bf16.vlgmr.msra.gmra.mxu1 %vm509_vm7, %v2799_v14  ;;  %v2811_v17 = vpack.c.bf16 %v504_v16, %v504_v16 }
 0x307   :  { %2203 = vmatpush3.bf16.xpose.msra.mxu1 %v2802_v15  ;;  %2204 = vmatprep.mubr.msk.bf16.mxu1 %vm2536_vm1, %v2535_v4 }
 0x308   :  { %2214 = vmatprep.subr.bf16.mxu1 %v2535_v4 }
 0x30e   :  { %2205 = vmatmul.mubr.msk.bf16.vlgmr.msra.gmra.mxu1 %vm509_vm7, %v2811_v17 }
 0x30f   :  { %2216 = vmatprep.mubr.msk.bf16.mxu1 %vm2536_vm1, %v2535_v4  ;;  %2215 = vmatpush3.bf16.msra.mxu1 %v734_v61 }
 0x310   :  { %2226 = vmatprep.subr.bf16.mxu1 %v2535_v4 }
 0x370   :  { %v372_v18 = vpop.permute.xlu1 %371 }
 0x371   :  { %v373_v19 = vsel %vm367_vm9, %v372_v18, %v2731_v28 }
 0x372   :  { %375 = vrot.lane.b32.xlu1 %v373_v19, %s2538_s21 }
 0x376   :  { %378 = vrot.lane.b32.xlu1 %v373_v19, %s2541_s6 }
 0x3c6   :  { %v550_v20 = vpop.f32.mrf.mxu1 }
 0x3c7   :  { %v604_v28 = vsel %vm2823_vm10, %v550_v20, -1e+30 }
 0x3c8   :  { %v2200_v21 = vpop.f32.mrf.mxu1  ;;  %v623_v53 = vsel %vm622_vm11, %v604_v28, -inf }
 0x3ca   :  { %v553_v22 = vpop.f32.mrf.mxu1 }
 0x3cc   :  { %v2201_v24 = vpop.f32.mrf.mxu1 }
 0x3ce   :  { %v596_v26 = vpop.f32.mrf.mxu1 }
 0x3cf   :  { %v2829_v27 = vsel %vm2823_vm10, %v596_v26, -1e+30  ;;  %v2337_v26 = vld [vmem:[%s3303_s1 + $0x4] ss:$0 sps:$4 sm:$0xff]  }
 0x3d0   :  { %v2206_v29 = vpop.f32.mrf.mxu1  ;;  %v626_v30 = vsel %vm622_vm11, %v2829_v27, -inf }
 0x3d1   :  { %627 = vmax.xlane.f32.xlu1 %v626_v30  ;;  %v662_v30 = vrot.slane %v2735_v37, %v2738_v38 }
 0x3d2   :  { %v599_v31 = vpop.f32.mrf.mxu1 }
 0x3d3   :  { %v663_v31 = vcombine.high %v662_v30, %v662_v30 }
 0x3d4   :  { %v2207_v32 = vpop.f32.mrf.mxu1 }
 0x3e2   :  { %786 = vrot.lane.b32.xlu1 %v2799_v14, %s2542_s27 }
 0x3e4   :  { %v376_v33 = vpop.permute.xlu1 %375 }
 0x3e8   :  { %v379_v39 = vpop.permute.xlu1 %378 }
 0x3e9   :  { %v381_v40 = vsel %vm2776_vm8, %v376_v33, %v379_v39  ;;  %v2940_v33 = vrot.slane %v663_v31, %v2738_v38 }
 0x3ea   :  { %v415_v42 = vmul.f32 %v2046_v35, %v381_v40  ;;  %v2945_v35 = vrot.slane %v662_v30, %v2738_v38  ;;  %v2339_v30 = vld [vmem:[%s3309_s7 + $0x4] ss:$0 sps:$4 sm:$0xff]  }
 0x3ec   :  { %v2844_v43 = vadd.f32 %v415_v42, %v407_v41 }
 0x3ee   :  { %v417_v45 = vpack.c.bf16 %v2844_v43, %v2844_v43  ;;  %880 = vrot.lane.b32.xlu1 %v2844_v43, %s2543_s30  ;;  %v606_v46 = vmul.f32 %v2844_v43, %v2790_v9 }
 0x3f0   :  { %v425_v47 = vrot.slane %v417_v45, %v2738_v38  ;;  %v608_v48 = vsel %vm607_vm12, %v606_v46, 0.0 }
 0x3f1   :  { %609 = vadd.xlane.f32.xlu0 %v608_v48 }
 0x3f2   :  { %v432_v49 = vrot.slane %v425_v47, %v2738_v38 }
 0x3f4   :  { %v434_v51 = vunpack.i.h.s16 %v432_v49  ;;  %v2047_v52 = vpack.i.b16 %v432_v49, %v432_v49 }
 0x3f5   :  { %624 = vmax.xlane.f32.xlu0 %v623_v53 }
 0x3f6   :  { %v436_v55 = vpack.i.b16 %v434_v51, %v434_v51  ;;  %v443_v57 = vsel %vm2744_vm5, %v2047_v52, %v442_v50 }
 0x3f7   :  { %444 = vst [vmem:[%s3288_s20] sm:$0x1] %v443_v57 }
 0x3f8   :  { %v446_v58 = vsel %vm2744_vm5, %v436_v55, %v445_v54 }
 0x3f9   :  { %447 = vst [vmem:[%s3288_s20 + $0x1] sm:$0x1] %v446_v58 }
 0x40b   :  { %832 = vrot.lane.b32.xlu0 %v2811_v17, %s2542_s27 }
 0x45a   :  { %v628_v44 = vpop.xlane.xlu1 %627 }
 0x45e   :  { %v787_v63 = vpop.permute.xlu1 %786 }
 0x462   :  { %v881_v0 = vpop.permute.xlu1 %880 }
 0x463   :  { %v2887_v1 = vmul.f32 %v881_v0, %v2790_v9 }
 0x465   :  { %885 = vrot.lane.b32.xlu0 %v2887_v1, %s2542_s27 }
 0x47a   :  { %v610_v3 = vpop.xlane.xlu0 %609 }
 0x47b   :  { %v619_v6 = vrot.slane %v610_v3, %v2892_v2  ;;  %v615_v7 = vrot.slane %v610_v3, %v2895_v5 }
 0x47d   :  { %v630_v8 = vmax.f32 %v628_v44, %v619_v6  ;;  %v2338_v44 = vld [vmem:[%s3303_s1] ss:$0 sps:$4 sm:$0xff]  }
 0x47e   :  { %v625_v10 = vpop.xlane.xlu0 %624 }
 0x47f   :  { %v632_v11 = vsub.f32 %v2829_v27, %v630_v8  ;;  %v638_v12 = vsub.f32 %v619_v6, %v630_v8  ;;  %v629_v13 = vmax.f32 %v625_v10, %v615_v7 }
 0x481   :  { %v635_v16 = vmul.f32 1.442695, %v632_v11  ;;  %v631_v18 = vsub.f32 %v604_v28, %v629_v13  ;;  %v637_v19 = vsub.f32 %v615_v7, %v629_v13  ;;  %v641_v27 = vmul.f32 1.442695, %v638_v12 }
 0x482   :  { %v833_v24 = vpop.permute.xlu0 %832 }
 0x483   :  { %2383 = vpow2.f32 %v635_v16  ;;  %v633_v20 = vmul.f32 1.442695, %v631_v18  ;;  %v639_v29 = vmul.f32 1.442695, %v637_v19 }
 0x485   :  { %2385 = vpow2.f32 %v633_v20 }
 0x486   :  { %2387 = vpow2.f32 %v641_v27 }
 0x487   :  { %2389 = vpow2.f32 %v639_v29 }
 0x490   :  { %v2900_v21 = vpop.eup %2383 }
 0x491   :  { %v654_v36 = vpack.c.bf16 %v2900_v21, %v2900_v21 }
 0x492   :  { %v2904_v22 = vpop.eup %2385 }
 0x493   :  { %2217 = vmatmul.mubr.msk.bf16.vlgmr.msra.gmra.mxu1 %vm682_vm14, %v654_v36  ;;  %v653_v23 = vpack.c.bf16 %v2904_v22, %v2904_v22  ;;  %v2937_v32 = vpop.eup %2387 }
 0x494   :  { %2227 = vmatpush3.bf16.xpose.msra.mxu1 %v2802_v15  ;;  %2228 = vmatprep.mubr.msk.bf16.mxu1 %vm2536_vm1, %v2535_v4  ;;  %v2942_v34 = vpop.eup %2389  ;;  %v681_v39 = vmul.f32 %v2937_v32, %v2940_v33 }
 0x495   :  { %2211 = vmatmul.mubr.msk.bf16.vlgmr.msra.gmra.mxu0 %vm682_vm14, %v653_v23  ;;  %2238 = vmatprep.subr.bf16.mxu1 %v2535_v4  ;;  %v680_v37 = vmul.f32 %v2942_v34, %v2945_v35 }
 0x496   :  { %2221 = vmatpush3.bf16.xpose.msra.mxu0 %v2769_v56  ;;  %2222 = vmatprep.mubr.msk.bf16.mxu0 %vm2536_vm1, %v2535_v4 }
 0x497   :  { %2232 = vmatprep.subr.bf16.mxu0 %v2535_v4 }
 0x49b   :  { %2229 = vmatmul.mubr.msk.bf16.vlgmr.msra.gmra.mxu1 %vm509_vm7, %v833_v24 }
 0x49c   :  { %2239 = vmatpush3.bf16.msra.mxu1 %v734_v61  ;;  %2240 = vmatprep.mubr.msk.bf16.mxu1 %vm2536_vm1, %v2535_v4 }
 0x49d   :  { %2223 = vmatmul.mubr.msk.bf16.vlgmr.msra.gmra.mxu0 %vm509_vm7, %v787_v63  ;;  %2250 = vmatprep.subr.bf16.mxu1 %v2535_v4 }
 0x49e   :  { %2233 = vmatpush3.bf16.msra.mxu0 %v688_v62  ;;  %2234 = vmatprep.mubr.msk.bf16.mxu0 %vm2536_vm1, %v2535_v4 }
 0x49f   :  { %2244 = vmatprep.subr.bf16.mxu0 %v2535_v4 }
 0x4d7   :  { %v886_v56 = vpop.permute.xlu0 %885 }
 0x4d8   :  { %v888_v15 = vsel %vm607_vm12, %v886_v56, 0.0 }
 0x4d9   :  { %889 = vadd.xlane.f32.xlu1 %v888_v15 }
 0x4ea   :  { %1095 = vrot.lane.b32.xlu1 %v2337_v26, %s2542_s27 }
 0x4ee   :  { %1090 = vrot.lane.b32.xlu1 %v2811_v17, %s2544_s25 }
 0x4f2   :  { %1037 = vrot.lane.b32.xlu1 %v2799_v14, %s2544_s25 }
 0x553   :  { %v770_v40 = vpop.f32.mrf.mxu1 }
 0x554   :  { %v2949_v41 = vadd.f32 %v770_v40, %v681_v39 }
 0x555   :  { %v724_v42 = vpop.f32.mrf.mxu0  ;;  %v2218_v45 = vpop.f32.mrf.mxu1 }
 0x556   :  { %v2953_v46 = vadd.f32 %v724_v42, %v680_v37 }
 0x557   :  { %v2212_v47 = vpop.f32.mrf.mxu0  ;;  %v773_v48 = vpop.f32.mrf.mxu1 }
 0x559   :  { %v727_v28 = vpop.f32.mrf.mxu0  ;;  %v2219_v49 = vpop.f32.mrf.mxu1 }
 0x55b   :  { %v2213_v50 = vpop.f32.mrf.mxu0  ;;  %v871_v38 = vpop.f32.mrf.mxu1 }
 0x55c   :  { %v878_v51 = vsel %vm2823_vm10, %v871_v38, -1e+30 }
 0x55d   :  { %v825_v52 = vpop.f32.mrf.mxu0  ;;  %v2230_v53 = vpop.f32.mrf.mxu1  ;;  %v905_v54 = vsel %vm622_vm11, %v878_v51, -inf }
 0x55e   :  { %v877_v55 = vsel %vm2823_vm10, %v825_v52, -1e+30  ;;  %906 = vmax.xlane.f32.xlu0 %v905_v54 }
 0x55f   :  { %v2224_v57 = vpop.f32.mrf.mxu0  ;;  %v874_v58 = vpop.f32.mrf.mxu1  ;;  %v902_v61 = vsel %vm622_vm11, %v877_v55, -inf }
 0x561   :  { %v828_v59 = vpop.f32.mrf.mxu0  ;;  %v2231_v60 = vpop.f32.mrf.mxu1 }
 0x562   :  { %903 = vmax.xlane.f32.xlu0 %v902_v61  ;;  %v890_v63 = vpop.xlane.xlu1 %889 }
 0x563   :  { %v2225_v62 = vpop.f32.mrf.mxu0  ;;  %v899_v0 = vrot.slane %v890_v63, %v2892_v2  ;;  %v895_v7 = vrot.slane %v890_v63, %v2895_v5 }
 0x566   :  { %v1096_v24 = vpop.permute.xlu1 %1095 }
 0x567   :  { %v2973_v56 = vsel %vm509_vm7, %v1096_v24, 0 }
 0x56a   :  { %v1091_v31 = vpop.permute.xlu1 %1090 }
 0x56e   :  { %v1038_v39 = vpop.permute.xlu1 %1037 }
 0x578   :  { %1042 = vrot.lane.b32.xlu0 %v2338_v44, %s2542_s27 }
 0x57c   :  { %1145 = vrot.lane.b32.xlu0 %v2887_v1, %s2544_s25 }
 0x5e7   :  { %v907_v3 = vpop.xlane.xlu0 %906 }
 0x5e8   :  { %v909_v6 = vmax.f32 %v907_v3, %v899_v0 }
 0x5ea   :  { %v911_v8 = vsub.f32 %v878_v51, %v909_v6  ;;  %v917_v10 = vsub.f32 %v899_v0, %v909_v6 }
 0x5eb   :  { %v904_v11 = vpop.xlane.xlu0 %903 }
 0x5ec   :  { %v914_v12 = vmul.f32 1.442695, %v911_v8  ;;  %v908_v13 = vmax.f32 %v904_v11, %v895_v7  ;;  %v920_v45 = vmul.f32 1.442695, %v917_v10  ;;  %v2340_v11 = vld [vmem:[%s3309_s7] ss:$0 sps:$4 sm:$0xff]  }
 0x5ee   :  { %2391 = vpow2.f32 %v914_v12  ;;  %v910_v16 = vsub.f32 %v877_v55, %v908_v13  ;;  %v916_v18 = vsub.f32 %v895_v7, %v908_v13 }
 0x5ef   :  { %v1043_v19 = vpop.permute.xlu0 %1042 }
 0x5f0   :  { %v912_v20 = vmul.f32 1.442695, %v910_v16  ;;  %v2984_v27 = vsel %vm509_vm7, %v1043_v19, 0  ;;  %v918_v47 = vmul.f32 1.442695, %v916_v18 }
 0x5f2   :  { %2393 = vpow2.f32 %v912_v20 }
 0x5f3   :  { %v1146_v36 = vpop.permute.xlu0 %1145  ;;  %2395 = vpow2.f32 %v920_v45 }
 0x5f4   :  { %v1148_v1 = vsel %vm607_vm12, %v1146_v36, 0.0  ;;  %2397 = vpow2.f32 %v918_v47 }
 0x5f5   :  { %1149 = vadd.xlane.f32.xlu1 %v1148_v1 }
 0x5fb   :  { %v2970_v23 = vpop.eup %2391 }
 0x5fc   :  { %v933_v15 = vpack.c.bf16 %v2970_v23, %v2970_v23 }
 0x5fe   :  { %2241 = vmatmul.mubr.msk.bf16.vlgmr.msra.gmra.mxu1 %vm682_vm14, %v933_v15 }
 0x5ff   :  { %v2978_v26 = vpop.eup %2393  ;;  %2251 = vmatpush3.bf16.xpose.msra.mxu1 %v2973_v56  ;;  %2252 = vmatprep.mubr.msk.bf16.mxu1 %vm2536_vm1, %v2535_v4 }
 0x600   :  { %v932_v29 = vpack.c.bf16 %v2978_v26, %v2978_v26  ;;  %2262 = vmatprep.subr.bf16.mxu1 %v2535_v4 }
 0x602   :  { %2235 = vmatmul.mubr.msk.bf16.vlgmr.msra.gmra.mxu0 %vm682_vm14, %v932_v29 }
 0x603   :  { %2245 = vmatpush3.bf16.xpose.msra.mxu0 %v2984_v27  ;;  %2246 = vmatprep.mubr.msk.bf16.mxu0 %vm2536_vm1, %v2535_v4 }
 0x604   :  { %2256 = vmatprep.subr.bf16.mxu0 %v2535_v4 }
 0x606   :  { %2253 = vmatmul.mubr.msk.bf16.vlgmr.msra.gmra.mxu1 %vm509_vm7, %v1091_v31  ;;  %1264 = vrot.lane.b32.xlu1 %v2339_v30, %s2542_s27 }
 0x607   :  { %2264 = vmatprep.mubr.msk.bf16.mxu1 %vm2536_vm1, %v2535_v4 }
 0x60a   :  { %2247 = vmatmul.mubr.msk.bf16.vlgmr.msra.gmra.mxu0 %vm509_vm7, %v1038_v39  ;;  %1368 = vrot.lane.b32.xlu1 %v2811_v17, %s2545_s29  ;;  %v3013_v17 = vpop.eup %2395 }
 0x60b   :  { %2258 = vmatprep.mubr.msk.bf16.mxu0 %vm2536_vm1, %v2535_v4  ;;  %v935_v48 = vmul.f32 %v3013_v17, %v2940_v33  ;;  %v3017_v28 = vpop.eup %2397 }
 0x60c   :  { %v934_v38 = vmul.f32 %v3017_v28, %v2945_v35 }
 0x60e   :  { %1323 = vrot.lane.b32.xlu1 %v2799_v14, %s2545_s29 }
 0x67e   :  { %v1150_v40 = vpop.xlane.xlu1 %1149 }
 0x67f   :  { %v3038_v12 = vrot.slane %v1150_v40, %v2892_v2  ;;  %v3044_v18 = vrot.slane %v1150_v40, %v2895_v5 }
 0x682   :  { %v1265_v37 = vpop.permute.xlu1 %1264 }
 0x683   :  { %v3009_v42 = vsel %vm686_vm13, %v1265_v37, 0 }
 0x684   :  { %2263 = vmatpush3.bf16.msra.mxu1 %v3009_v42 }
 0x685   :  { %2274 = vmatprep.subr.bf16.mxu1 %v2535_v4 }
 0x6be   :  { %v1016_v14 = vpop.f32.mrf.mxu1 }
 0x6bf   :  { %v3019_v49 = vadd.f32 %v1016_v14, %v935_v48  ;;  %v1369_v14 = vpop.permute.xlu1 %1368 }
 0x6c0   :  { %v2242_v50 = vpop.f32.mrf.mxu1 }
 0x6c2   :  { %v973_v51 = vpop.f32.mrf.mxu0  ;;  %v1019_v52 = vpop.f32.mrf.mxu1 }
 0x6c3   :  { %v3023_v53 = vadd.f32 %v973_v51, %v934_v38 }
 0x6c4   :  { %v2236_v54 = vpop.f32.mrf.mxu0  ;;  %v2243_v55 = vpop.f32.mrf.mxu1 }
 0x6c6   :  { %v976_v57 = vpop.f32.mrf.mxu0  ;;  %v1137_v58 = vpop.f32.mrf.mxu1 }
 0x6c7   :  { %v1144_v59 = vsel %vm2823_vm10, %v1137_v58, -1e+30 }
 0x6c8   :  { %v2237_v60 = vpop.f32.mrf.mxu0  ;;  %v2254_v61 = vpop.f32.mrf.mxu1  ;;  %v1165_v62 = vsel %vm622_vm11, %v1144_v59, -inf }
 0x6c9   :  { %1166 = vmax.xlane.f32.xlu0 %v1165_v62 }
 0x6ca   :  { %v1084_v44 = vpop.f32.mrf.mxu0  ;;  %v1140_v63 = vpop.f32.mrf.mxu1 }
 0x6cb   :  { %v1143_v0 = vsel %vm2823_vm10, %v1084_v44, -1e+30 }
 0x6cc   :  { %v2248_v3 = vpop.f32.mrf.mxu0  ;;  %v2255_v6 = vpop.f32.mrf.mxu1  ;;  %v1162_v7 = vsel %vm622_vm11, %v1143_v0, -inf }
 0x6cd   :  { %1163 = vmax.xlane.f32.xlu0 %v1162_v7 }
 0x6ce   :  { %v1087_v8 = vpop.f32.mrf.mxu0 }
 0x6d0   :  { %v2249_v10 = vpop.f32.mrf.mxu0 }
 0x6e3   :  { %1213 = vrot.lane.b32.xlu0 %v2340_v11, %s2542_s27  ;;  %v925_v11 = vsel %vm622_vm11, %v2970_v23, 0.0 }
 0x6e7   :  { %1415 = vrot.lane.b32.xlu0 %v2844_v43, %s2540_s3 }
 0x752   :  { %v1167_v13 = vpop.xlane.xlu0 %1166 }
 0x753   :  { %v3041_v16 = vmax.f32 %v1167_v13, %v3038_v12  ;;  %v922_v13 = vsel %vm622_vm11, %v2978_v26, 0.0 }
 0x755   :  { %v1171_v19 = vsub.f32 %v1144_v59, %v3041_v16  ;;  %v1177_v20 = vsub.f32 %v3038_v12, %v3041_v16  ;;  %v2342_v16 = vld [vmem:[#allocation8 + $0x10] sm:$0xff]  }
 0x756   :  { %v1164_v36 = vpop.xlane.xlu0 %1163 }
 0x757   :  { %v1174_v1 = vmul.f32 1.442695, %v1171_v19  ;;  %v3050_v24 = vmax.f32 %v1164_v36, %v3044_v18  ;;  %v1201_v19 = vrot.slane %v2940_v33, %v2895_v5  ;;  %v643_v36 = vsel %vm622_vm11, %v2904_v22, 0.0 }
 0x759   :  { %2399 = vpow2.f32 %v1174_v1  ;;  %v1170_v43 = vsub.f32 %v1143_v0, %v3050_v24  ;;  %v1176_v15 = vsub.f32 %v3044_v18, %v3050_v24 }
 0x75a   :  { %v1214_v29 = vpop.permute.xlu0 %1213 }
 0x75b   :  { %v1172_v30 = vmul.f32 1.442695, %v1170_v43  ;;  %v1219_v31 = vsel %vm686_vm13, %v1214_v29, 0 }
 0x75c   :  { %2257 = vmatpush3.bf16.msra.mxu0 %v1219_v31 }
 0x75d   :  { %2401 = vpow2.f32 %v1172_v30  ;;  %2268 = vmatprep.subr.bf16.mxu0 %v2535_v4 }
 0x75e   :  { %v1416_v39 = vpop.permute.xlu0 %1415 }
 0x75f   :  { %v1418_v40 = vmul.f32 %v1416_v39, %v2790_v9  ;;  %v1324_v9 = vpop.permute.xlu1 %1323 }
 0x761   :  { %1420 = vrot.lane.b32.xlu1 %v1418_v40, %s2545_s29 }
 0x766   :  { %v2400_v37 = vpop.eup %2399 }
 0x767   :  { %v1193_v45 = vpack.c.bf16 %v2400_v37, %v2400_v37  ;;  %v1185_v6 = vsel %vm622_vm11, %v2400_v37, 0.0 }
 0x769   :  { %2265 = vmatmul.mubr.msk.bf16.vlgmr.msra.gmra.mxu1 %vm682_vm14, %v1193_v45 }
 0x76a   :  { %v2402_v47 = vpop.eup %2401  ;;  %2275 = vmatpush3.bf16.xpose.msra.mxu1 %v2973_v56  ;;  %2276 = vmatprep.mubr.msk.bf16.mxu1 %vm2536_vm1, %v2535_v4 }
 0x76b   :  { %v1192_v48 = vpack.c.bf16 %v2402_v47, %v2402_v47  ;;  %2286 = vmatprep.subr.bf16.mxu1 %v2535_v4  ;;  %v1182_v25 = vsel %vm622_vm11, %v2402_v47, 0.0 }
 0x76d   :  { %2259 = vmatmul.mubr.msk.bf16.vlgmr.msra.gmra.mxu0 %vm682_vm14, %v1192_v48 }
 0x76e   :  { %2269 = vmatpush3.bf16.xpose.msra.mxu0 %v2984_v27  ;;  %2270 = vmatprep.mubr.msk.bf16.mxu0 %vm2536_vm1, %v2535_v4 }
 0x76f   :  { %2280 = vmatprep.subr.bf16.mxu0 %v2535_v4 }
 0x771   :  { %2277 = vmatmul.mubr.msk.bf16.vlgmr.msra.gmra.mxu1 %vm509_vm7, %v1369_v14 }
 0x772   :  { %2287 = vmatpush3.bf16.msra.mxu1 %v3009_v42  ;;  %2288 = vmatprep.mubr.msk.bf16.mxu1 %vm2536_vm1, %v2535_v4 }
 0x775   :  { %2271 = vmatmul.mubr.msk.bf16.vlgmr.msra.gmra.mxu0 %vm509_vm7, %v1324_v9 }
 0x776   :  { %2281 = vmatpush3.bf16.msra.mxu0 %v1219_v31  ;;  %2282 = vmatprep.mubr.msk.bf16.mxu0 %vm2536_vm1, %v2535_v4 }
 0x777   :  { %2292 = vmatprep.subr.bf16.mxu0 %v2535_v4 }
 0x7d3   :  { %v1421_v56 = vpop.permute.xlu1 %1420 }
 0x7d4   :  { %v1423_v27 = vsel %vm607_vm12, %v1421_v56, 0.0 }
 0x7d5   :  { %1424 = vadd.xlane.f32.xlu0 %v1423_v27 }
 0x829   :  { %v3078_v50 = vpop.f32.mrf.mxu1 }
 0x82b   :  { %v2266_v38 = vpop.f32.mrf.mxu1 }
 0x82d   :  { %v3080_v42 = vpop.f32.mrf.mxu0  ;;  %v1309_v51 = vpop.f32.mrf.mxu1 }
 0x82f   :  { %v2260_v52 = vpop.f32.mrf.mxu0  ;;  %v2267_v54 = vpop.f32.mrf.mxu1 }
 0x831   :  { %v1258_v55 = vpop.f32.mrf.mxu0  ;;  %v1407_v57 = vpop.f32.mrf.mxu1 }
 0x832   :  { %v1414_v58 = vsel %vm2823_vm10, %v1407_v57, -1e+30 }
 0x833   :  { %v2261_v59 = vpop.f32.mrf.mxu0  ;;  %v2278_v60 = vpop.f32.mrf.mxu1  ;;  %v1440_v61 = vsel %vm622_vm11, %v1414_v58, -inf }
 0x834   :  { %1441 = vmax.xlane.f32.xlu1 %v1440_v61  ;;  %v1197_v59 = vrot.slane %v2945_v35, %v2895_v5  ;;  %v1178_v35 = vmul.f32 1.442695, %v1176_v15 }
 0x835   :  { %v1362_v62 = vpop.f32.mrf.mxu0  ;;  %v1410_v44 = vpop.f32.mrf.mxu1 }
 0x836   :  { %v1413_v63 = vsel %vm2823_vm10, %v1362_v62, -1e+30 }
 0x837   :  { %v2272_v0 = vpop.f32.mrf.mxu0  ;;  %v2279_v3 = vpop.f32.mrf.mxu1  ;;  %v1437_v7 = vsel %vm622_vm11, %v1413_v63, -inf }
 0x838   :  { %1186 = vadd.xlane.f32.xlu1 %v1185_v6  ;;  %1438 = vmax.xlane.f32.xlu0 %v1437_v7 }
 0x839   :  { %v1365_v8 = vpop.f32.mrf.mxu0 }
 0x83a   :  { %v2341_v8 = vld [vmem:[#allocation8 + $0x18] sm:$0xff]  }
 0x83b   :  { %v2273_v10 = vpop.f32.mrf.mxu0 }
 0x83c   :  { %926 = vadd.xlane.f32.xlu0 %v925_v11 }
 0x840   :  { %923 = vadd.xlane.f32.xlu0 %v922_v13 }
 0x844   :  { %1183 = vadd.xlane.f32.xlu0 %v1182_v25 }
 0x85a   :  { %1204 = vrot.lane.b32.xlu0 %v1201_v19, %s2542_s27 }
 0x85e   :  { %v1425_v1 = vpop.xlane.xlu0 %1424 }
 0x85f   :  { %v3100_v23 = vrot.slane %v1425_v1, %v2892_v2  ;;  %v3106_v29 = vrot.slane %v1425_v1, %v2895_v5  ;;  %v1180_v5 = vmul.f32 1.442695, %v1177_v20 }
 0x879   :  { %644 = vadd.xlane.f32.xlu0 %v643_v36 }
 0x8bd   :  { %v1442_v43 = vpop.xlane.xlu1 %1441 }
 0x8be   :  { %v3103_v26 = vmax.f32 %v1442_v43, %v3100_v23 }
 0x8c0   :  { %v1446_v30 = vsub.f32 %v1414_v58, %v3103_v26  ;;  %v1452_v33 = vsub.f32 %v3100_v23, %v3103_v26 }
 0x8c1   :  { %v1439_v31 = vpop.xlane.xlu0 %1438 }
 0x8c2   :  { %v1449_v39 = vmul.f32 1.442695, %v1446_v30  ;;  %v3112_v22 = vmax.f32 %v1439_v31, %v3106_v29 }
 0x8c4   :  { %2403 = vpow2.f32 %v1449_v39  ;;  %v1445_v2 = vsub.f32 %v1413_v63, %v3112_v22  ;;  %v1451_v40 = vsub.f32 %v3106_v29, %v3112_v22  ;;  %v2343_v39 = vld [vmem:[#allocation8 + $0x8] sm:$0xff]  }
 0x8c5   :  { %v927_v37 = vpop.xlane.xlu0 %926 }
 0x8c6   :  { %v1447_v45 = vmul.f32 1.442695, %v1445_v2  ;;  %v929_v47 = vadd.f32 %v3013_v17, %v927_v37  ;;  %v1453_v1 = vmul.f32 1.442695, %v1451_v40  ;;  %v2344_v37 = vld [vmem:[#allocation8] sm:$0xff]  }
 0x8c8   :  { %2405 = vpow2.f32 %v1447_v45 }
 0x8c9   :  { %v924_v48 = vpop.xlane.xlu0 %923  ;;  %2407 = vrcp.f32 %v929_v47 }
 0x8ca   :  { %v928_v14 = vadd.f32 %v3017_v28, %v924_v48 }
 0x8cc   :  { %2409 = vrcp.f32 %v928_v14 }
 0x8d1   :  { %v2404_v9 = vpop.eup %2403 }
 0x8d2   :  { %v1468_v56 = vpack.c.bf16 %v2404_v9, %v2404_v9  ;;  %v1460_v28 = vsel %vm622_vm11, %v2404_v9, 0.0 }
 0x8d4   :  { %2289 = vmatmul.mubr.msk.bf16.vlgmr.msra.gmra.mxu1 %vm682_vm14, %v1468_v56 }
 0x8d5   :  { %v2406_v27 = vpop.eup %2405 }
 0x8d6   :  { %v1457_v38 = vsel %vm622_vm11, %v2406_v27, 0.0  ;;  %v1467_v51 = vpack.c.bf16 %v2406_v27, %v2406_v27  ;;  %v2408_v52 = vpop.eup %2407 }
 0x8d7   :  { %1458 = vadd.xlane.f32.xlu1 %v1457_v38  ;;  %v1023_v17 = vmul.f32 %v2408_v52, %v3019_v49  ;;  %v1184_v49 = vpop.xlane.xlu0 %1183 }
 0x8d8   :  { %2283 = vmatmul.mubr.msk.bf16.vlgmr.msra.gmra.mxu0 %vm682_vm14, %v1467_v51 }
 0x8d9   :  { %v2410_v54 = vpop.eup %2409  ;;  %2300 = vmatprep.mubr.msk.bf16.mxu0 %vm2536_vm1, %v2535_v4  ;;  %v1026_v57 = vrot.slane %v1023_v17, 7  ;;  %2293 = vmatpush3.bf16.msra.mxu0 %v2341_v8  ;;  %vm1031_vm1 = vcmask 255104   ;;  %v2351_v8 = vld [vmem:[%s3284_s16 + $0x20] ss:$8 sps:$4 sm:$0xff]  }
 0x8da   :  { %v1022_v55 = vmul.f32 %v2410_v54, %v3023_v53  ;;  %v646_v53 = vsel %vm622_vm11, %v2900_v21, 0.0  ;;  %2294 = vmatprep.subr.bf16.mxu0 %v2535_v4 }
 0x8db   :  { %1461 = vadd.xlane.f32.xlu1 %v1460_v28  ;;  %v1205_v60 = vpop.permute.xlu0 %1204 }
 0x8dc   :  { %v1027_v58 = vsel %vm781_vm15, %v1026_v57, %v1022_v55 }
 0x8dd   :  { %1028 = vrot.lane.b32.xlu0 %v1027_v58, %s2543_s30  ;;  %2295 = vmatpush3.bf16.msra.mxu0 %v2342_v16  ;;  %v2362_v16 = vld [vmem:[%s3285_s17 + $0x14] ss:$8 sps:$4 sm:$0xff]  }
 0x8de   :  { %2296 = vmatprep.subr.bf16.mxu0 %v2535_v4 }
 0x8e1   :  { %2297 = vmatpush3.bf16.msra.mxu0 %v2343_v39 }
 0x8e2   :  { %2298 = vmatprep.subr.bf16.mxu0 %v2535_v4 }
 0x8e5   :  { %2299 = vmatpush3.bf16.msra.mxu0 %v2344_v37  ;;  %v2371_v37 = vld [vmem:[%s3286_s18 + $0x28] sm:$0xff]  }
 0x8ec   :  { %1202 = vrot.lane.b32.xlu1 %v1197_v59, %s2542_s27 }
 0x902   :  { %v645_v61 = vpop.xlane.xlu0 %644 }
 0x903   :  { %v649_v62 = vadd.f32 %v2942_v34, %v645_v61  ;;  %v1187_v34 = vpop.xlane.xlu1 %1186 }
 0x905   :  { %2411 = vrcp.f32 %v649_v62  ;;  %v2441_v62 = vld [vmem:[%s3299_s26] sm:$0x3] }
 0x906   :  { %2413 = vpow2.f32 %v1180_v5 }
 0x907   :  { %2415 = vpow2.f32 %v1178_v35 }
 0x910   :  { %647 = vadd.xlane.f32.xlu1 %v646_v53 }
 0x912   :  { %v2412_v44 = vpop.eup %2411 }
 0x913   :  { %v3136_v63 = vmul.f32 %v2412_v44, %v2953_v46  ;;  %v2414_v0 = vpop.eup %2413 }
 0x914   :  { %v1189_v3 = vadd.f32 %v2414_v0, %v1187_v34  ;;  %v2416_v6 = vpop.eup %2415  ;;  %v1209_v46 = vmul.f32 %v2414_v0, %v1205_v60  ;;  %v2345_v0 = vld [vmem:[%s3284_s16 + $0x30] ss:$8 sps:$4 sm:$0xff]  }
 0x915   :  { %v1188_v21 = vadd.f32 %v2416_v6, %v1184_v49 }
 0x916   :  { %2417 = vrcp.f32 %v1189_v3  ;;  %v1307_v12 = vadd.f32 %v3078_v50, %v1209_v46  ;;  %v1455_v50 = vmul.f32 1.442695, %v1452_v33  ;;  %v2347_v3 = vld [vmem:[%s3284_s16 + $0x34] ss:$8 sps:$4 sm:$0xff]   ;;  %v2356_v46 = vld [vmem:[%s3285_s17 + $0x24] ss:$8 sps:$4 sm:$0xff]  }
 0x917   :  { %2419 = vrcp.f32 %v1188_v21  ;;  %v2350_v21 = vld [vmem:[%s3285_s17 + $0x34] ss:$8 sps:$4 sm:$0xff]   ;;  %1722 = vmatprep.subr.bf16.mxu1 %v2347_v3 }
 0x918   :  { %2421 = vpow2.f32 %v1455_v50  ;;  %1811 = vmatprep.subr.bf16.mxu0 %v2350_v21  ;;  %1723 = vmatpush1.bf16.msra.mxu1 %v2345_v0 }
 0x919   :  { %2423 = vpow2.f32 %v1453_v1 }
 0x923   :  { %v2418_v18 = vpop.eup %2417 }
 0x924   :  { %v1313_v24 = vmul.f32 %v2418_v18, %v1307_v12  ;;  %v2420_v13 = vpop.eup %2419  ;;  %v2359_v12 = vld [vmem:[%s3284_s16 + $0x14] ss:$8 sps:$4 sm:$0xff]   ;;  %v2547_v18 = vmov 0  }
 0x925   :  { %v2422_v43 = vpop.eup %2421  ;;  %1746 = vmatprep.mubr.bf16.mxu1 %v2547_v18 }
 0x926   :  { %v1316_v19 = vrot.slane %v1313_v24, 7  ;;  %v1470_v2 = vmul.f32 %v2422_v43, %v1205_v60  ;;  %v2360_v24 = vld [vmem:[%s3285_s17 + $0x10] ss:$8 sps:$4 sm:$0xff]  }
 0x960   :  { %v1459_v7 = vpop.xlane.xlu1 %1458 }
 0x964   :  { %v1462_v10 = vpop.xlane.xlu1 %1461 }
 0x965   :  { %v1464_v30 = vadd.f32 %v2422_v43, %v1462_v10  ;;  %v2354_v10 = vld [vmem:[%s3285_s17 + $0x20] ss:$8 sps:$4 sm:$0xff]  }
 0x966   :  { %v2074_v43 = vld [vmem:[%s3310_s9] ss:$0 sm:$0xff] }
 0x967   :  { %2425 = vrcp.f32 %v1464_v30 }
 0x968   :  { %v1203_v20 = vpop.permute.xlu1 %1202 }
 0x969   :  { %v1208_v15 = vmul.f32 %v2416_v6, %v1203_v20  ;;  %v2348_v6 = vld [vmem:[%s3285_s17 + $0x30] ss:$8 sps:$4 sm:$0xff]  }
 0x96b   :  { %v1256_v11 = vadd.f32 %v3080_v42, %v1208_v15  ;;  %v2424_v42 = vpop.eup %2423  ;;  %v2365_v15 = vld [vmem:[%s3284_s16 + $0x4] ss:$8 sps:$4 sm:$0xff]  }
 0x96c   :  { %v1463_v31 = vadd.f32 %v2424_v42, %v1459_v7  ;;  %v1469_v47 = vmul.f32 %v2424_v42, %v1203_v20  ;;  %v2353_v7 = vld [vmem:[%s3284_s16 + $0x24] ss:$8 sps:$4 sm:$0xff]   ;;  %v2357_v20 = vld [vmem:[%s3284_s16 + $0x10] ss:$8 sps:$4 sm:$0xff]  }
 0x96d   :  { %v1312_v25 = vmul.f32 %v2420_v13, %v1256_v11  ;;  %1724 = vmatprep.subr.bf16.mxu1 %v2353_v7  ;;  %v2368_v11 = vld [vmem:[%s3285_s17 + $0x4] ss:$8 sps:$4 sm:$0xff]   ;;  %v2363_v13 = vld [vmem:[%s3284_s16] ss:$8 sps:$4 sm:$0xff]  }
 0x96e   :  { %2427 = vrcp.f32 %v1463_v31  ;;  %1725 = vmatpush1.bf16.msra.mxu1 %v2351_v8  ;;  %v2369_v31 = vld [vmem:[%s3286_s18 + $0x38] sm:$0xff]  }
 0x96f   :  { %v1317_v36 = vsel %vm781_vm15, %v1316_v19, %v1312_v25  ;;  %1726 = vmatprep.subr.bf16.mxu1 %v2359_v12  ;;  %v2366_v25 = vld [vmem:[%s3285_s17] ss:$8 sps:$4 sm:$0xff]  }
 0x970   :  { %1318 = vrot.lane.b32.xlu1 %v1317_v36, %s2540_s3  ;;  %s2546_s3 = smov 48  }
 0x972   :  { %1727 = vmatpush1.bf16.msra.mxu1 %v2357_v20 }
 0x973   :  { %1728 = vmatprep.subr.bf16.mxu1 %v2365_v15 }
 0x974   :  { %v2426_v26 = vpop.eup %2425 }
 0x976   :  { %1729 = vmatpush1.bf16.msra.mxu1 %v2363_v13 }
 0x977   :  { %1961 = vmatprep.subr.bf16.mxu1 %v2547_v18 }
 0x97b   :  { %v2428_v9 = vpop.eup %2427 }
 0x994   :  { %v1551_v45 = vpop.f32.mrf.mxu1 }
 0x995   :  { %v1552_v23 = vadd.f32 %v1551_v45, %v1470_v2  ;;  %v2370_v2 = vld [vmem:[%s3286_s18 + $0x30] sm:$0xff]   ;;  %v2372_v45 = vld [vmem:[%s3286_s18 + $0x20] sm:$0xff]  }
 0x996   :  { %v2290_v33 = vpop.f32.mrf.mxu1 }
 0x997   :  { %v1558_v29 = vmul.f32 %v2426_v26, %v1552_v23  ;;  %v2373_v23 = vld [vmem:[%s3286_s18 + $0x18] sm:$0xff]   ;;  %v2374_v26 = vld [vmem:[%s3286_s18 + $0x10] sm:$0xff]   ;;  %v2375_v33 = vld [vmem:[%s3286_s18 + $0x8] sm:$0xff]  }
 0x998   :  { %v1508_v22 = vpop.f32.mrf.mxu0  ;;  %v1554_v40 = vpop.f32.mrf.mxu1 }
 0x999   :  { %v1509_v48 = vadd.f32 %v1508_v22, %v1469_v47  ;;  %v648_v14 = vpop.xlane.xlu1 %647  ;;  %v1561_v51 = vrot.slane %v1558_v29, 7  ;;  %v2376_v47 = vld [vmem:[%s3286_s18] sm:$0xff]   ;;  %v2377_v29 = vld [vmem:[%s3286_s18 + $0x58] sm:$0xff]   ;;  %v2378_v22 = vld [vmem:[%s3286_s18 + $0x50] sm:$0xff]  }
 0x99a   :  { %v650_v56 = vadd.f32 %v2937_v32, %v648_v14  ;;  %v2284_v27 = vpop.f32.mrf.mxu0  ;;  %v2291_v38 = vpop.f32.mrf.mxu1  ;;  %v2379_v40 = vld [vmem:[%s3286_s18 + $0x48] sm:$0xff]  }
 0x99b   :  { %v1557_v52 = vmul.f32 %v2428_v9, %v1509_v48  ;;  %v1029_v32 = vpop.permute.xlu0 %1028  ;;  %v2380_v48 = vld [vmem:[%s3286_s18 + $0x40] sm:$0xff]   ;;  %s2548_s18 = smov [#allocation11]  }
 0x99c   :  { %2429 = vrcp.f32 %v650_v56  ;;  %v1511_v17 = vpop.f32.mrf.mxu0  ;;  %s2009_s22 = sshll.u32 %s2548_s18, 4  ;;  %s2010_s22 = int_to_ptr.vmem [resolvable:$true] %s2009_s22 }
 0x99d   :  { %v1562_v4 = vsel %vm781_vm15, %v1561_v51, %v1557_v52  ;;  %s2502_s26 = scalar_lea.vmem %s2010_s22, 32  ;;  %p2507_p2 = scmp.lt.s32.totalorder %s2010_s22, %s2010_s22 }
 0x99e   :  { %1563 = vrot.lane.b32.xlu1 %v1562_v4, %s2546_s3  ;;  %v2285_v54 = vpop.f32.mrf.mxu0  ;;  %p2503_p1 = scmp.ne.s32.totalorder %s2010_s22, %s2502_s26  ;;  %p2508_p3 = scmp.lt.s32.totalorder %s2502_s26, %s2502_s26 }
 0x9a0   :  { %p2509_p4 = por %p2508_p3, %p2507_p2 }
 0x9a2   :  { %p2510_p5 = pnand %p2509_p4, %p2503_p1 }
 0x9a9   :  { %v2430_v28 = vpop.eup %2429 }
 0x9aa   :  { %v777_v55 = vmul.f32 %v2430_v28, %v2949_v41 }
 0x9ac   :  { %v780_v57 = vrot.slane %v777_v55, 7 }
 0x9ae   :  { %v782_v58 = vsel %vm781_vm15, %v780_v57, %v3136_v63 }
 0x9af   :  { %784 = vst.msk [vmem:[#allocation2] sm:$0x3] %vm607_vm12, %v782_v58 }
 0x9b0   :  { %1032 = vst.msk [vmem:[#allocation2] sm:$0x3] %vm1031_vm1, %v1029_v32 }
 0x9e2   :  { %v1319_v59 = vpop.permute.xlu1 %1318 }
 0x9e3   :  { %1322 = vst.msk [vmem:[#allocation2] sm:$0x3] %vm1321_vm3, %v1319_v59 }
 0xa10   :  { %v1564_v49 = vpop.permute.xlu1 %1563 }
 0xa11   :  { %1567 = vst.msk [vmem:[#allocation2] sm:$0x3] %vm1566_vm4, %v1564_v49 }
 0xa18   :  { %v1568_v60 = vld [vmem:[#allocation2] sm:$0x3] }
 0xa19   :  { %v1569_v61 = vpack.c.bf16 %v1568_v60, %v1568_v60 }
 0xa1b   :  { %2301 = vmatmul.mubr.msk.bf16.vlgmr.msra.gmra.mxu0 %vm160_vm2, %v1569_v61 }
 0xa1c   :  { %1812 = vmatpush1.bf16.msra.mxu0 %v2348_v6  ;;  %1835 = vmatprep.mubr.bf16.mxu0 %v2547_v18 }
 0xa1d   :  { %1813 = vmatprep.subr.bf16.mxu0 %v2356_v46 }
 0xa20   :  { %1814 = vmatpush1.bf16.msra.mxu0 %v2354_v10 }
 0xa21   :  { %1815 = vmatprep.subr.bf16.mxu0 %v2362_v16 }
 0xa24   :  { %1816 = vmatpush1.bf16.msra.mxu0 %v2360_v24 }
 0xa25   :  { %1817 = vmatprep.subr.bf16.mxu0 %v2368_v11 }
 0xa28   :  { %1818 = vmatpush1.bf16.msra.mxu0 %v2366_v25 }
 0xadb   :  { %v1639_v41 = vpop.f32.mrf.mxu0 }
 0xadc   :  { %v3167_v53 = vadd.f32 %v2441_v62, %v1639_v41 }
 0xadd   :  { %v2302_v44 = vpop.f32.mrf.mxu0 }
 0xade   :  { %v1646_v63 = vmul.f32 %v3167_v53, %v3167_v53 }
 0xadf   :  { %v1642_v5 = vpop.f32.mrf.mxu0 }
 0xae0   :  { %v1647_v35 = vsel %vm110_vm0, %v1646_v63, 0.0 }
 0xae1   :  { %1648 = vadd.xlane.f32.xlu0 %v1647_v35  ;;  %v2303_v34 = vpop.f32.mrf.mxu0 }
 0xb6a   :  { %v1649_v19 = vpop.xlane.xlu0 %1648 }
 0xb6b   :  { %v1650_v36 = vmul.f32 0.015625, %v1649_v19 }
 0xb6d   :  { %v1651_v50 = vadd.f32 1e-05, %v1650_v36 }
 0xb6f   :  { %2431 = vrsqrt.f32 %v1651_v50 }
 0xb7c   :  { %v2432_v1 = vpop.eup %2431 }
 0xb7d   :  { %v1653_v30 = vmul.f32 %v2432_v1, %v3167_v53 }
 0xb7f   :  { %v1661_v42 = vmul.f32 %v2074_v43, %v1653_v30 }
 0xb81   :  { %v1662_v39 = vpack.c.bf16 %v1661_v42, %v1661_v42 }
 0xb83   :  { %2083 = vmatmul.mubr.msk.bf16.vlgmr.msra.gmra.mxu1 %vm160_vm2, %v1662_v39  ;;  %2092 = vmatmul.mubr.msk.bf16.vlgmr.msra.gmra.mxu0 %vm160_vm2, %v1662_v39 }
 0xb84   :  { %1962 = vmatpush1.bf16.msra.mxu1 %v2369_v31 }
 0xb85   :  { %1963 = vmatprep.subr.bf16.mxu1 %v2547_v18 }
 0xb88   :  { %1964 = vmatpush1.bf16.msra.mxu1 %v2370_v2 }
 0xb89   :  { %1965 = vmatprep.subr.bf16.mxu1 %v2547_v18 }
 0xb8c   :  { %1966 = vmatpush1.bf16.msra.mxu1 %v2371_v37 }
 0xb8d   :  { %1967 = vmatprep.subr.bf16.mxu1 %v2547_v18 }
 0xb90   :  { %1968 = vmatpush1.bf16.msra.mxu1 %v2372_v45 }
 0xb91   :  { %1969 = vmatprep.subr.bf16.mxu1 %v2547_v18 }
 0xb94   :  { %1970 = vmatpush1.bf16.msra.mxu1 %v2373_v23 }
 0xb95   :  { %1971 = vmatprep.subr.bf16.mxu1 %v2547_v18 }
 0xb98   :  { %1972 = vmatpush1.bf16.msra.mxu1 %v2374_v26 }
 0xb99   :  { %1973 = vmatprep.subr.bf16.mxu1 %v2547_v18 }
 0xb9c   :  { %1974 = vmatpush1.bf16.msra.mxu1 %v2375_v33 }
 0xb9d   :  { %1975 = vmatprep.subr.bf16.mxu1 %v2547_v18 }
 0xba0   :  { %1976 = vmatpush1.bf16.msra.mxu1 %v2376_v47 }
 0xba1   :  { %1985 = vmatprep.subr.bf16.mxu1 %v2547_v18 }
 0xba4   :  { %1986 = vmatpush2.bf16.msra.mxu1 %v2377_v29 }
 0xba5   :  { %1987 = vmatprep.subr.bf16.mxu1 %v2547_v18 }
 0xba8   :  { %1988 = vmatpush2.bf16.msra.mxu1 %v2378_v22 }
 0xba9   :  { %1989 = vmatprep.subr.bf16.mxu1 %v2547_v18 }
 0xbac   :  { %1990 = vmatpush2.bf16.msra.mxu1 %v2379_v40 }
 0xbad   :  { %1991 = vmatprep.subr.bf16.mxu1 %v2547_v18 }
 0xbb0   :  { %1992 = vmatpush2.bf16.msra.mxu1 %v2380_v48 }
 0xc43   :  { %v1748_v14 = vpop.f32.mrf.mxu1  ;;  %v1837_v9 = vpop.f32.mrf.mxu0 }
 0xc44   :  { %v2093_v56 = vmul.f32 -1.442695, %v1748_v14 }
 0xc45   :  { %v1750_v27 = vpop.f32.mrf.mxu1  ;;  %v1839_v38 = vpop.f32.mrf.mxu0 }
 0xc46   :  { %2433 = vpow2.f32 %v2093_v56  ;;  %v2094_v51 = vmul.f32 -1.442695, %v1750_v27 }
 0xc47   :  { %v1752_v52 = vpop.f32.mrf.mxu1  ;;  %v1841_v17 = vpop.f32.mrf.mxu0 }
 0xc48   :  { %2435 = vpow2.f32 %v2094_v51 }
 0xc49   :  { %v1753_v4 = vpop.f32.mrf.mxu1  ;;  %v1842_v54 = vpop.f32.mrf.mxu0 }
 0xc53   :  { %v2434_v28 = vpop.eup %2433 }
 0xc54   :  { %v1850_v55 = vadd.f32 1.0, %v2434_v28 }
 0xc55   :  { %v2436_v57 = vpop.eup %2435 }
 0xc56   :  { %2437 = vrcp.f32 %v1850_v55  ;;  %v1851_v58 = vadd.f32 1.0, %v2436_v57 }
 0xc58   :  { %2439 = vrcp.f32 %v1851_v58 }
 0xc63   :  { %v2438_v32 = vpop.eup %2437 }
 0xc64   :  { %v1856_v59 = vmul.f32 %v2438_v32, %v1748_v14 }
 0xc65   :  { %v2440_v49 = vpop.eup %2439 }
 0xc66   :  { %v1857_v60 = vmul.f32 %v2440_v49, %v1750_v27  ;;  %v1858_v61 = vmul.f32 %v1856_v59, %v1837_v9 }
 0xc68   :  { %v1859_v41 = vmul.f32 %v1857_v60, %v1839_v38  ;;  %v1860_v44 = vpack.c.bf16 %v1858_v61, %v1858_v61 }
 0xc6a   :  { %v1861_v62 = vpack.c.bf16 %v1859_v41, %v1859_v41 }
 0xc6c   :  { %2107 = vmatprep.mubr.msk.bf16.mxu1 %vm160_vm2, %v1861_v62 }
 0xc6d   :  { %1994 = vmatmul.mubr.bf16.vlgmr.msra.gmra.mxu1 %v1860_v44 }
 0xd2d   :  { %v1995_v63 = vpop.f32.mrf.mxu1 }
 0xd2e   :  { %v2001_v5 = vadd.f32 %v1995_v63, %v3167_v53 }
 0xd2f   :  { %v1997_v35 = vpop.f32.mrf.mxu1 }
 0xd30   :  { %2002 = vst.msk [vmem:[#allocation11] sm:$0x3] %vm110_vm0, %v2001_v5 }
 0xd31   :  { %v1998_v34 = vpop.f32.mrf.mxu1 }
 0xd32   :  { %2513 = shalt.err (!%p2510_p5)
}
 0xd33   :  { %2012 = dma.vmem_to_hbm [thread:$0]  %s2010_s22, 32, %s3287_s19, [#allocation7]   ;;  %v1999_v0 = vpop.f32.mrf.mxu1 }
 0xd34   :  { %2526 = dma.done.wait [#allocation7], 32  }
 0xd35   :  { %2527 = vsyncadd [#allocation7], 4294967264 }
 0xd36   :  { %2024 = vsyncpa [#allocation6], 1 }
 0xd37   :  { %2025 = vsyncpa [#allocation9], 1 }
 0xd38   :  { %2026 = vsyncpa [#allocation7], 1 }

// kernel: tpu_custom_call.1
= control target key start
LH: loop header
LB: loop body
LE: loop exit
PB: predicated region body
PF: predicated region fallthrough
CT: control target
= control target key end

     0   :  { %s3441_s0 = inlined_call_operand.<no memory space> [shape: s32[1], index: 0, kind: input, shape index: {}]   ;;  %s3442_s1 = inlined_call_operand.vmem [shape: f32[2,64], index: 1, kind: input, shape index: {}]   ;;  %s3443_s2 = inlined_call_operand.vmem [shape: bf16[2,8,32], index: 2, kind: input, shape index: {}]   ;;  %s3444_s3 = inlined_call_operand.vmem [shape: bf16[2,8,32], index: 3, kind: input, shape index: {}]   ;;  %s3445_s4 = inlined_call_operand.vmem [shape: f32[1,64], index: 4, kind: input, shape index: {}]   ;;  %s3446_s5 = inlined_call_operand.vmem [shape: f32[1,64], index: 5, kind: input, shape index: {}]   ;;  %s3447_s6 = inlined_call_operand.hbm [shape: bf16[64,64], index: 6, kind: input, shape index: {}]   ;;  %s3448_s7 = inlined_call_operand.vmem [shape: bf16[64,32], index: 7, kind: input, shape index: {}]   ;;  %s3449_s8 = inlined_call_operand.vmem [shape: bf16[64,32], index: 8, kind: input, shape index: {}]   ;;  %s3450_s9 = inlined_call_operand.hbm [shape: bf16[64,64], index: 9, kind: input, shape index: {}]   ;;  %s3451_s10 = inlined_call_operand.vmem [shape: f32[1,64], index: 10, kind: input, shape index: {}]   ;;  %s3452_s11 = inlined_call_operand.vmem [shape: f32[1,64], index: 11, kind: input, shape index: {}]   ;;  %s3453_s12 = inlined_call_operand.vmem [shape: f32[1,32], index: 12, kind: input, shape index: {}]   ;;  %s3454_s13 = inlined_call_operand.vmem [shape: f32[1,32], index: 13, kind: input, shape index: {}]   ;;  %s3455_s14 = inlined_call_operand.vmem [shape: f32[64,64], index: 14, kind: input, shape index: {}]   ;;  %s3456_s15 = inlined_call_operand.hbm [shape: f32[32,32], index: 15, kind: input, shape index: {}]   ;;  %s3457_s16 = inlined_call_operand.vmem [shape: bf16[64,192], index: 16, kind: input, shape index: {}]   ;;  %s3458_s17 = inlined_call_operand.vmem [shape: bf16[64,192], index: 17, kind: input, shape index: {}]   ;;  %s3459_s18 = inlined_call_operand.vmem [shape: bf16[192,64], index: 18, kind: input, shape index: {}]   ;;  %s3460_s19 = inlined_call_operand.hbm [shape: f32[2,64], index: 19, kind: output, shape index: {0}]   ;;  %s3461_s20 = inlined_call_operand.vmem [shape: bf16[2,1,32], index: 20, kind: output, shape index: {1}]   ;;  %s3462_s21 = inlined_call_operand.vmem [shape: bf16[2,1,32], index: 21, kind: output, shape index: {2}]  }
   0x1   :  { %3466 = sst [smem:[#allocation15_spill]] %s3441_s0 }
   0x2   :  { %3467 = sst [smem:[#allocation16_spill]] %s3442_s1 }
   0x3   :  { %3468 = sst [smem:[#allocation17_spill]] %s3443_s2 }
   0x4   :  { %3469 = sst [smem:[#allocation18_spill]] %s3444_s3 }
   0x5   :  { %3470 = sst [smem:[#allocation19_spill]] %s3445_s4 }
   0x6   :  { %3471 = sst [smem:[#allocation20_spill]] %s3446_s5 }
   0x7   :  { %28 = vsyncpa [#allocation6], 0 }
   0x8   :  { %29 = vsyncpa [#allocation9], 0 }
   0x9   :  { %30 = vsyncpa [#allocation7], 0  ;;  %s2698_s2 = smov [#allocation8]   ;;  %s2699_s26 = smov [#allocation5]  }
   0xa   :  { %s62_s25 = sshll.u32 %s2698_s2, 4  ;;  %s46_s27 = sshll.u32 %s2699_s26, 4  ;;  %s63_s25 = int_to_ptr.vmem [resolvable:$true] %s62_s25  ;;  %s47_s27 = int_to_ptr.vmem [resolvable:$true] %s46_s27 }
   0xb   :  { %s2620_s3 = scalar_lea.vmem %s63_s25, 512  ;;  %p2625_p1 = scmp.lt.s32.totalorder %s63_s25, %s63_s25 }
   0xc   :  { %p2621_p0 = scmp.ne.s32.totalorder %s63_s25, %s2620_s3  ;;  %p2626_p2 = scmp.lt.s32.totalorder %s2620_s3, %s2620_s3 }
   0xe   :  { %p2627_p3 = por %p2626_p2, %p2625_p1 }
  0x10   :  { %p2628_p4 = pnand %p2627_p3, %p2621_p0 }
  0x12   :  { %2631 = shalt.err (!%p2628_p4)
}
  0x13   :  { %s2700_s28 = smov 64   ;;  %s2701_s29 = smov 4  }
  0x14   :  { %68 = dma.hbm_to_vmem [thread:$0]  %s3450_s9, 512, %s63_s25, [#allocation9], %s2700_s28, %s2700_s28, %s2701_s29  }
  0x15   :  { %s2640_s30 = scalar_lea.vmem %s47_s27, 512  ;;  %p2645_p6 = scmp.lt.s32.totalorder %s47_s27, %s47_s27 }
  0x16   :  { %p2641_p5 = scmp.ne.s32.totalorder %s47_s27, %s2640_s30  ;;  %p2646_p7 = scmp.lt.s32.totalorder %s2640_s30, %s2640_s30 }
  0x18   :  { %p2647_p8 = por %p2646_p7, %p2645_p6 }
  0x1a   :  { %p2648_p9 = pnand %p2647_p8, %p2641_p5 }
  0x1c   :  { %2651 = shalt.err (!%p2648_p9)
}
  0x1d   :  { %52 = dma.hbm_to_vmem [thread:$0]  %s3447_s6, 512, %s47_s27, [#allocation6], %s2700_s28, %s2700_s28, %s2701_s29  }
  0x1e   :  { %s2702_s23 = smov [#allocation10]  }
  0x1f   :  { %s84_s1 = sshll.u32 %s2702_s23, 4  ;;  %s85_s1 = int_to_ptr.vmem [resolvable:$true] %s84_s1 }
  0x20   :  { %s2660_s24 = scalar_lea.vmem %s85_s1, 512  ;;  %p2665_p11 = scmp.lt.s32.totalorder %s85_s1, %s85_s1 }
  0x21   :  { %p2661_p10 = scmp.ne.s32.totalorder %s85_s1, %s2660_s24  ;;  %p2666_p12 = scmp.lt.s32.totalorder %s2660_s24, %s2660_s24 }
  0x23   :  { %p2667_p13 = por %p2666_p12, %p2665_p11 }
  0x25   :  { %p2668_p0 = pnand %p2667_p13, %p2661_p10 }
  0x27   :  { %2671 = shalt.err (!%p2668_p0)
}
  0x28   :  { %s2703_s9 = smov 128   ;;  %s2704_s2 = smov 8  }
  0x29   :  { %90 = dma.hbm_to_vmem [thread:$0]  %s3456_s15, 512, %s85_s1, [#allocation9], %s2703_s9, %s2703_s9, %s2704_s2  }
  0x2a   :  { %2692 = dma.done.wait [#allocation6], 512  }
  0x2b   :  { %2693 = vsyncadd [#allocation6], 4294966784 }
  0x2c   :  { %2694 = dma.done.wait [#allocation9], 1024  }
  0x2d   :  { %2695 = vsyncadd [#allocation9], 4294966272  ;;  %vm110_vm0 = vcmask 517120   ;;  %s3472_s3 = sld [smem:[#allocation16_spill]]  ;;  %v2495_v3 = vld [vmem:[#allocation5 + $0x18] sm:$0xff]   ;;  %v2705_v5 = vmov 0.0   ;;  %v547_v38 = vlaneseq }
  0x2e   :  { %v2496_v4 = vld [vmem:[%s3449_s8 + $0x18] sm:$0xff]   ;;  %2303 = vmatprep.subr.bf16.mxu1 %v2705_v5  ;;  %2327 = vmatprep.subr.bf16.mxu0 %v2705_v5  ;;  %v2498_v7 = vld [vmem:[%s3449_s8 + $0x10] sm:$0xff]   ;;  %v2500_v9 = vld [vmem:[%s3449_s8 + $0x8] sm:$0xff]   ;;  %vm2706_vm1 = vmmov 0   ;;  %s3473_s24 = sld [smem:[#allocation19_spill]]  ;;  %vm160_vm2 = vcmask 523264  }
  0x2f   :  { %2304 = vmatpush3.bf16.msra.mxu1 %v2495_v3  ;;  %2328 = vmatpush3.bf16.msra.mxu0 %v2496_v4  ;;  %v2497_v6 = vld [vmem:[#allocation5 + $0x10] sm:$0xff]   ;;  %v2499_v8 = vld [vmem:[#allocation5 + $0x8] sm:$0xff]   ;;  %v2501_v10 = vld [vmem:[#allocation5] sm:$0xff]   ;;  %v2707_v36 = vmov 1966171168   ;;  %v2930_v40 = vshrl.u32 %v547_v38, 7 }
  0x30   :  { %2305 = vmatprep.subr.bf16.mxu1 %v2705_v5  ;;  %2329 = vmatprep.subr.bf16.mxu0 %v2705_v5  ;;  %v2502_v11 = vld [vmem:[%s3449_s8] sm:$0xff]   ;;  %v2503_v19 = vld [vmem:[%s3448_s7 + $0x18] sm:$0xff]   ;;  %v2504_v21 = vld [vmem:[%s3448_s7 + $0x10] sm:$0xff]   ;;  %v545_v37 = vunpack.c.l.s4 %v2707_v36  ;;  %vm564_vm3 = vcmask 253952   ;;  %vm565_vm4 = vsmask.f32 256 }
  0x31   :  { %2311 = vmatprep.mubr.msk.bf16.mxu1 %vm2706_vm1, %v2705_v5  ;;  %2335 = vmatprep.mubr.msk.bf16.mxu0 %vm2706_vm1, %v2705_v5  ;;  %v2505_v22 = vld [vmem:[%s3448_s7 + $0x8] sm:$0xff]   ;;  %v2506_v23 = vld [vmem:[%s3448_s7] sm:$0xff]   ;;  %v355_v24 = vld [vmem:[%s3455_s14 + $0x38] sm:$0xff]  ;;  %vm433_vm6 = vcmask 261120   ;;  %s3476_s5 = sld [smem:[#allocation17_spill]]  ;;  %vm636_vm7 = vcmask 130048  }
  0x32   :  { %v354_v25 = vld [vmem:[%s3455_s14 + $0x30] sm:$0xff]  ;;  %v353_v26 = vld [vmem:[%s3455_s14 + $0x28] sm:$0xff]  ;;  %v352_v27 = vld [vmem:[%s3455_s14 + $0x20] sm:$0xff]  ;;  %v546_v39 = vunpack.c.0.s8 %v545_v37  ;;  %vm734_vm8 = vcmask 123904   ;;  %s2708_s29 = smov 112   ;;  %s3477_s4 = sld [smem:[#allocation15_spill]] }
  0x33   :  { %v108_v0 = vld [vmem:[%s3472_s3] sm:$0x3]  ;;  %2306 = vmatpush3.bf16.msra.mxu1 %v2497_v6  ;;  %2330 = vmatpush3.bf16.msra.mxu0 %v2498_v7  ;;  %v351_v28 = vld [vmem:[%s3455_s14 + $0x18] sm:$0xff]  ;;  %v350_v29 = vld [vmem:[%s3455_s14 + $0x10] sm:$0xff]  ;;  %vm749_vm10 = vcmask 57344   ;;  %s3480_s30 = sld [smem:[#allocation18_spill]] }
  0x34   :  { %v109_v1 = vmul.f32 %v108_v0, %v108_v0  ;;  %2307 = vmatprep.subr.bf16.mxu1 %v2705_v5  ;;  %2331 = vmatprep.subr.bf16.mxu0 %v2705_v5  ;;  %v2154_v16 = vld [vmem:[%s3473_s24] ss:$0 sm:$0xff]  ;;  %v349_v30 = vld [vmem:[%s3455_s14 + $0x8] sm:$0xff]  ;;  %v431_v33 = vld [vmem:[#allocation10 + $0x10] sm:$0xff]  ;;  %v2935_v43 = vsub.s32 %v546_v39, %v2930_v40  ;;  %vm813_vm11 = vcmask 1043456   ;;  %s2709_s23 = smov 16  }
  0x35   :  { %v348_v31 = vld [vmem:[%s3455_s14] sm:$0xff]  ;;  %v430_v34 = vld [vmem:[#allocation10 + $0x8] sm:$0xff]  ;;  %vm2944_vm5 = vmand %vm564_vm3, %vm565_vm4  ;;  %vm809_vm12 = vcmask 64512   ;;  %s2710_s8 = smov 96   ;;  %s2711_s2 = smov 80   ;;  %vm908_vm13 = vcmask 1041409  }
  0x36   :  { %v111_v2 = vsel %vm110_vm0, %v109_v1, 0.0  ;;  %v432_v32 = vld [vmem:[#allocation10 + $0x18] sm:$0xff]  ;;  %v429_v35 = vld [vmem:[#allocation10] sm:$0xff]  ;;  %s2712_s25 = smov 32   ;;  %s2713_s26 = smov 48   ;;  %vm1158_vm14 = vcmask 255104  }
  0x37   :  { %112 = vadd.xlane.f32.xlu0 %v111_v2  ;;  %2308 = vmatpush3.bf16.msra.mxu1 %v2499_v8  ;;  %v595_v52 = vld [vmem:[%s3462_s21] sm:$0x1]  ;;  %v598_v57 = vld [vmem:[%s3462_s21 + $0x1] sm:$0x1]  ;;  %v606_v3 = vld [vmem:[%s3476_s5 + $0x4] sm:$0xf] }
  0x38   :  { %2332 = vmatpush3.bf16.msra.mxu0 %v2500_v9  ;;  %2309 = vmatprep.subr.bf16.mxu1 %v2705_v5  ;;  %v605_v1 = vld [vmem:[%s3476_s5] sm:$0xf]  ;;  %v2977_v4 = vsel %vm636_vm7, %v606_v3, 0  ;;  %vm1448_vm15 = vcmask 386304  }
  0x39   :  { %2333 = vmatprep.subr.bf16.mxu0 %v2705_v5  ;;  %v2970_v2 = vsel %vm636_vm7, %v605_v1, 0  ;;  %v2172_v6 = vld [vmem:[%s3451_s10] ss:$0 sm:$0xff]  ;;  %v3072_v1 = vsub.s32 0, %v2930_v40 }
  0x3a   :  { %v2173_v7 = vld [vmem:[%s3452_s11] ss:$0 sm:$0xff] }
  0x3b   :  { %2310 = vmatpush3.bf16.msra.mxu1 %v2501_v10 }
  0x3c   :  { %2334 = vmatpush3.bf16.msra.mxu0 %v2502_v11  ;;  %2315 = vmatprep.subr.bf16.mxu1 %v2705_v5 }
  0x3d   :  { %2358 = vmatprep.subr.mxu0 %v2705_v5 }
  0xc0   :  { %v113_v12 = vpop.xlane.xlu0 %112 }
  0xc1   :  { %v115_v13 = vmul.f32 0.015625, %v113_v12 }
  0xc3   :  { %v116_v14 = vadd.f32 1e-05, %v115_v13 }
  0xc5   :  { %2551 = vrsqrt.f32 %v116_v14 }
  0xd2   :  { %v2552_v15 = vpop.eup %2551 }
  0xd3   :  { %v118_v17 = vmul.f32 %v2552_v15, %v108_v0 }
  0xd5   :  { %v126_v18 = vmul.f32 %v2154_v16, %v118_v17 }
  0xd7   :  { %v127_v20 = vpack.c.bf16 %v126_v18, %v126_v18 }
  0xd9   :  { %2312 = vmatmul.mubr.msk.bf16.vlgmr.msra.gmra.mxu1 %vm160_vm2, %v127_v20  ;;  %2336 = vmatmul.mubr.msk.bf16.vlgmr.msra.gmra.mxu0 %vm160_vm2, %v127_v20 }
  0xda   :  { %2316 = vmatpush3.bf16.msra.mxu1 %v2503_v19  ;;  %2323 = vmatprep.mubr.msk.bf16.mxu1 %vm2706_vm1, %v2705_v5 }
  0xdb   :  { %2317 = vmatprep.subr.bf16.mxu1 %v2705_v5  ;;  %2366 = vmatprep.mubr.msk.f32.mxu0 %vm2706_vm1, %v2705_v5 }
  0xdc   :  { %2359 = vmatpush3.msra.mxu0 %v432_v32  ;;  %v567_v32 = vld [vmem:[%s3461_s20] sm:$0x1] }
  0xdd   :  { %2360 = vmatprep.subr.mxu0 %v2705_v5 }
  0xde   :  { %2318 = vmatpush3.bf16.msra.mxu1 %v2504_v21  ;;  %2361 = vmatpush3.msra.mxu0 %v431_v33  ;;  %v2175_v21 = vld [vmem:[%s3454_s13] ss:$0 sm:$0xff] }
  0xdf   :  { %2319 = vmatprep.subr.bf16.mxu1 %v2705_v5  ;;  %2362 = vmatprep.subr.mxu0 %v2705_v5 }
  0xe0   :  { %2363 = vmatpush3.msra.mxu0 %v430_v34 }
  0xe1   :  { %2364 = vmatprep.subr.mxu0 %v2705_v5 }
  0xe2   :  { %2320 = vmatpush3.bf16.msra.mxu1 %v2505_v22  ;;  %2365 = vmatpush3.msra.mxu0 %v429_v35  ;;  %v570_v35 = vld [vmem:[%s3461_s20 + $0x1] sm:$0x1] }
  0xe3   :  { %2321 = vmatprep.subr.bf16.mxu1 %v2705_v5  ;;  %2375 = vmatprep.subr.bf16.mxu0 %v2705_v5 }
  0xe6   :  { %2322 = vmatpush3.bf16.msra.mxu1 %v2506_v23 }
  0xe7   :  { %2339 = vmatprep.subr.mxu1 %v2705_v5 }
  0xe9   :  { %2324 = vmatmul.mubr.msk.bf16.vlgmr.msra.gmra.mxu1 %vm160_vm2, %v127_v20  ;;  %v2174_v20 = vld [vmem:[%s3453_s12] ss:$0 sm:$0xff] }
  0xea   :  { %2340 = vmatpush3.msra.mxu1 %v355_v24  ;;  %2355 = vmatprep.mubr.msk.f32.mxu1 %vm2706_vm1, %v2705_v5 }
  0xeb   :  { %2341 = vmatprep.subr.mxu1 %v2705_v5 }
  0xec   :  { %2342 = vmatpush3.msra.mxu1 %v354_v25 }
  0xed   :  { %2343 = vmatprep.subr.mxu1 %v2705_v5 }
  0xee   :  { %2344 = vmatpush3.msra.mxu1 %v353_v26 }
  0xef   :  { %2345 = vmatprep.subr.mxu1 %v2705_v5 }
  0xf0   :  { %2346 = vmatpush3.msra.mxu1 %v352_v27 }
  0xf1   :  { %2347 = vmatprep.subr.mxu1 %v2705_v5 }
  0xf2   :  { %2348 = vmatpush3.msra.mxu1 %v351_v28 }
  0xf3   :  { %2349 = vmatprep.subr.mxu1 %v2705_v5 }
  0xf4   :  { %2350 = vmatpush3.msra.mxu1 %v350_v29 }
  0xf5   :  { %2351 = vmatprep.subr.mxu1 %v2705_v5 }
  0xf6   :  { %2352 = vmatpush3.msra.mxu1 %v349_v30 }
  0xf7   :  { %2353 = vmatprep.subr.mxu1 %v2705_v5 }
  0xf8   :  { %2354 = vmatpush3.msra.mxu1 %v348_v31 }
  0xf9   :  { %2369 = vmatprep.subr.bf16.mxu1 %v2705_v5 }
 0x199   :  { %v198_v41 = vpop.f32.mrf.mxu1  ;;  %v2932_v42 = vpop.f32.mrf.mxu0 }
 0x19a   :  { %v573_v44 = vpack.c.bf16 %v2932_v42, %v2932_v42  ;;  %2356 = vmatmul.mubr.msk.f32.vlgmr.msra.gmra.mxu1 %vm160_vm2, %v198_v41  ;;  %v514_v9 = vmul.f32 %v2172_v6, %v198_v41  ;;  %v602_v41 = vand.u32 127, %v547_v38 }
 0x19b   :  { %v2313_v45 = vpop.f32.mrf.mxu1  ;;  %v2337_v46 = vpop.f32.mrf.mxu0  ;;  %2371 = vmatprep.mubr.msk.bf16.mxu1 %vm2706_vm1, %v2705_v5  ;;  %2370 = vmatpush3.bf16.xpose.msra.mxu1 %v2970_v2 }
 0x19c   :  { %v581_v47 = vrot.slane %v573_v44, %v2935_v43  ;;  %2381 = vmatprep.subr.bf16.mxu1 %v2705_v5  ;;  %v603_v44 = vstv %s3477_s4 }
 0x19d   :  { %v201_v48 = vpop.f32.mrf.mxu1  ;;  %v345_v49 = vpop.f32.mrf.mxu0  ;;  %vm3043_vm9 = vcmp.lt.s32.totalorder %v602_v41, %v603_v44 }
 0x19e   :  { %v588_v50 = vrot.slane %v581_v47, %v2935_v43 }
 0x19f   :  { %v2314_v53 = vpop.f32.mrf.mxu1  ;;  %v2338_v54 = vpop.f32.mrf.mxu0 }
 0x1a0   :  { %v590_v55 = vunpack.i.h.s16 %v588_v50  ;;  %v2177_v56 = vpack.i.b16 %v588_v50, %v588_v50 }
 0x1a2   :  { %v592_v58 = vpack.i.b16 %v590_v55, %v590_v55  ;;  %v596_v59 = vsel %vm2944_vm5, %v2177_v56, %v595_v52 }
 0x1a3   :  { %597 = vst [vmem:[%s3462_s21] sm:$0x1] %v596_v59  ;;  %v607_v59 = vld [vmem:[%s3480_s30] sm:$0xf] }
 0x1a4   :  { %v599_v60 = vsel %vm2944_vm5, %v592_v58, %v598_v57  ;;  %v608_v57 = vld [vmem:[%s3480_s30 + $0x4] sm:$0xf] }
 0x1a5   :  { %600 = vst [vmem:[%s3462_s21 + $0x1] sm:$0x1] %v599_v60  ;;  %v861_v58 = vsel %vm813_vm11, %v608_v57, 0  ;;  %v815_v60 = vsel %vm813_vm11, %v607_v59, 0 }
 0x1a9   :  { %v270_v61 = vpop.f32.mrf.mxu1 }
 0x1aa   :  { %2367 = vmatmul.mubr.msk.f32.vlgmr.msra.gmra.mxu0 %vm433_vm6, %v270_v61  ;;  %v532_v23 = vmul.f32 %v2174_v20, %v270_v61  ;;  %v3068_v61 = vsub.s32 1, %v2930_v40 }
 0x1ab   :  { %v2325_v62 = vpop.f32.mrf.mxu1  ;;  %2377 = vmatprep.mubr.msk.bf16.mxu0 %vm2706_vm1, %v2705_v5  ;;  %2376 = vmatpush3.bf16.xpose.msra.mxu0 %v2977_v4 }
 0x1ac   :  { %2387 = vmatprep.subr.bf16.mxu0 %v2705_v5 }
 0x1ad   :  { %v273_v63 = vpop.f32.mrf.mxu1 }
 0x1af   :  { %v2326_v0 = vpop.f32.mrf.mxu1 }
 0x25a   :  { %v425_v8 = vpop.f32.mrf.mxu1 }
 0x25b   :  { %v522_v10 = vmul.f32 %v2173_v7, %v425_v8 }
 0x25c   :  { %v2357_v11 = vpop.f32.mrf.mxu1 }
 0x25d   :  { %v523_v12 = vadd.f32 %v522_v10, %v514_v9 }
 0x25f   :  { %v2988_v13 = vmul.f32 0.25, %v523_v12 }
 0x261   :  { %v616_v14 = vrot.slane %v2988_v13, %v2935_v43 }
 0x263   :  { %v617_v15 = vcombine.high %v616_v14, %v616_v14  ;;  %v624_v16 = vrot.slane %v616_v14, %v2935_v43 }
 0x265   :  { %v2993_v17 = vpack.c.bf16 %v624_v16, %v624_v16  ;;  %v631_v18 = vrot.slane %v617_v15, %v2935_v43 }
 0x267   :  { %2372 = vmatmul.mubr.msk.bf16.vlgmr.msra.gmra.mxu1 %vm636_vm7, %v2993_v17  ;;  %v2998_v19 = vpack.c.bf16 %v631_v18, %v631_v18 }
 0x268   :  { %2383 = vmatprep.mubr.msk.bf16.mxu1 %vm2706_vm1, %v2705_v5  ;;  %2382 = vmatpush3.bf16.msra.mxu1 %v815_v60 }
 0x269   :  { %2378 = vmatmul.mubr.msk.bf16.vlgmr.msra.gmra.mxu0 %vm636_vm7, %v2998_v19  ;;  %2393 = vmatprep.subr.bf16.mxu1 %v2705_v5 }
 0x26a   :  { %v503_v22 = vpop.f32.mrf.mxu0  ;;  %2389 = vmatprep.mubr.msk.bf16.mxu0 %vm2706_vm1, %v2705_v5  ;;  %2388 = vmatpush3.bf16.msra.mxu0 %v861_v58 }
 0x26b   :  { %v540_v24 = vmul.f32 %v2175_v21, %v503_v22  ;;  %2399 = vmatprep.subr.bf16.mxu0 %v2705_v5 }
 0x26c   :  { %v2368_v25 = vpop.f32.mrf.mxu0 }
 0x26d   :  { %v3012_v26 = vadd.f32 %v540_v24, %v532_v23 }
 0x26f   :  { %v542_v27 = vpack.c.bf16 %v3012_v26, %v3012_v26  ;;  %v733_v28 = vmul.f32 %v3012_v26, %v2988_v13 }
 0x271   :  { %v550_v29 = vrot.slane %v542_v27, %v2935_v43  ;;  %v735_v30 = vsel %vm734_vm8, %v733_v28, 0.0  ;;  %v789_v28 = vrot.slane %v2932_v42, %v2935_v43 }
 0x272   :  { %736 = vadd.xlane.f32.xlu0 %v735_v30 }
 0x273   :  { %v557_v31 = vrot.slane %v550_v29, %v2935_v43  ;;  %v790_v29 = vcombine.high %v789_v28, %v789_v28 }
 0x275   :  { %v559_v33 = vunpack.i.h.s16 %v557_v31  ;;  %v2176_v34 = vpack.i.b16 %v557_v31, %v557_v31  ;;  %v3112_v31 = vrot.slane %v790_v29, %v2935_v43 }
 0x277   :  { %v561_v36 = vpack.i.b16 %v559_v33, %v559_v33  ;;  %v568_v37 = vsel %vm2944_vm5, %v2176_v34, %v567_v32  ;;  %v1328_v46 = vrot.slane %v3112_v31, %v3072_v1 }
 0x278   :  { %569 = vst [vmem:[%s3461_s20] sm:$0x1] %v568_v37 }
 0x279   :  { %v571_v39 = vsel %vm2944_vm5, %v561_v36, %v570_v35  ;;  %v3119_v35 = vrot.slane %v789_v28, %v2935_v43 }
 0x27a   :  { %572 = vst [vmem:[%s3461_s20 + $0x1] sm:$0x1] %v571_v39  ;;  %s3481_s20 = sld [smem:[#allocation20_spill]] }
 0x288   :  { %959 = vrot.lane.b32.xlu0 %v2998_v19, %s2708_s29 }
 0x2fb   :  { %v737_v62 = vpop.xlane.xlu0 %736 }
 0x2fc   :  { %v746_v63 = vrot.slane %v737_v62, %v3068_v61  ;;  %v742_v6 = vrot.slane %v737_v62, %v3072_v1  ;;  %v2508_v62 = vld [vmem:[%s3476_s5 + $0x4] ss:$0 sps:$4 sm:$0xff]  }
 0x2ff   :  { %v960_v24 = vpop.permute.xlu0 %959 }
 0x327   :  { %v677_v45 = vpop.f32.mrf.mxu1 }
 0x328   :  { %v731_v38 = vsel %vm3043_vm9, %v677_v45, -1e+30 }
 0x329   :  { %v2373_v47 = vpop.f32.mrf.mxu1  ;;  %v723_v48 = vpop.f32.mrf.mxu0  ;;  %v750_v56 = vsel %vm749_vm10, %v731_v38, -inf }
 0x32a   :  { %v732_v49 = vsel %vm3043_vm9, %v723_v48, -1e+30 }
 0x32b   :  { %v680_v50 = vpop.f32.mrf.mxu1  ;;  %v2379_v51 = vpop.f32.mrf.mxu0  ;;  %v753_v52 = vsel %vm749_vm10, %v732_v49, -inf }
 0x32c   :  { %754 = vmax.xlane.f32.xlu1 %v753_v52 }
 0x32d   :  { %v2374_v53 = vpop.f32.mrf.mxu1  ;;  %v726_v54 = vpop.f32.mrf.mxu0 }
 0x32f   :  { %v2380_v55 = vpop.f32.mrf.mxu0 }
 0x330   :  { %751 = vmax.xlane.f32.xlu1 %v750_v56 }
 0x341   :  { %913 = vrot.lane.b32.xlu1 %v2993_v17, %s2708_s29 }
 0x345   :  { %1007 = vrot.lane.b32.xlu1 %v3012_v26, %s2709_s23 }
 0x3b5   :  { %v755_v0 = vpop.xlane.xlu1 %754 }
 0x3b6   :  { %v757_v3 = vmax.f32 %v755_v0, %v746_v63 }
 0x3b8   :  { %v759_v7 = vsub.f32 %v732_v49, %v757_v3  ;;  %v765_v8 = vsub.f32 %v746_v63, %v757_v3 }
 0x3b9   :  { %v752_v9 = vpop.xlane.xlu1 %751 }
 0x3ba   :  { %v762_v10 = vmul.f32 1.442695, %v759_v7  ;;  %v756_v11 = vmax.f32 %v752_v9, %v742_v6  ;;  %v768_v25 = vmul.f32 1.442695, %v765_v8 }
 0x3bc   :  { %2553 = vpow2.f32 %v762_v10  ;;  %v758_v12 = vsub.f32 %v731_v38, %v756_v11  ;;  %v764_v14 = vsub.f32 %v742_v6, %v756_v11 }
 0x3bd   :  { %v914_v15 = vpop.permute.xlu1 %913 }
 0x3be   :  { %v760_v16 = vmul.f32 1.442695, %v758_v12  ;;  %v766_v27 = vmul.f32 1.442695, %v764_v14 }
 0x3c0   :  { %2555 = vpow2.f32 %v760_v16 }
 0x3c1   :  { %v1008_v18 = vpop.permute.xlu1 %1007  ;;  %2557 = vpow2.f32 %v768_v25 }
 0x3c2   :  { %v3076_v20 = vmul.f32 %v1008_v18, %v2988_v13  ;;  %2559 = vpow2.f32 %v766_v27 }
 0x3c4   :  { %1012 = vrot.lane.b32.xlu1 %v3076_v20, %s2708_s29 }
 0x3c9   :  { %v3080_v40 = vpop.eup %2553 }
 0x3ca   :  { %v781_v21 = vpack.c.bf16 %v3080_v40, %v3080_v40 }
 0x3cc   :  { %2390 = vmatmul.mubr.msk.bf16.vlgmr.msra.gmra.mxu0 %vm809_vm12, %v781_v21 }
 0x3cd   :  { %v3085_v22 = vpop.eup %2555  ;;  %2400 = vmatpush3.bf16.xpose.msra.mxu0 %v2977_v4  ;;  %2401 = vmatprep.mubr.msk.bf16.mxu0 %vm2706_vm1, %v2705_v5 }
 0x3ce   :  { %v780_v23 = vpack.c.bf16 %v3085_v22, %v3085_v22  ;;  %2411 = vmatprep.subr.bf16.mxu0 %v2705_v5  ;;  %v3109_v30 = vpop.eup %2557 }
 0x3cf   :  { %v808_v32 = vmul.f32 %v3109_v30, %v3112_v31  ;;  %v3116_v33 = vpop.eup %2559 }
 0x3d0   :  { %2384 = vmatmul.mubr.msk.bf16.vlgmr.msra.gmra.mxu1 %vm809_vm12, %v780_v23  ;;  %v807_v42 = vmul.f32 %v3116_v33, %v3119_v35 }
 0x3d1   :  { %2394 = vmatpush3.bf16.xpose.msra.mxu1 %v2970_v2  ;;  %2395 = vmatprep.mubr.msk.bf16.mxu1 %vm2706_vm1, %v2705_v5 }
 0x3d2   :  { %2405 = vmatprep.subr.bf16.mxu1 %v2705_v5 }
 0x3d4   :  { %2402 = vmatmul.mubr.msk.bf16.vlgmr.msra.gmra.mxu0 %vm636_vm7, %v960_v24 }
 0x3d5   :  { %2412 = vmatpush3.bf16.msra.mxu0 %v861_v58  ;;  %2413 = vmatprep.mubr.msk.bf16.mxu0 %vm2706_vm1, %v2705_v5 }
 0x3d6   :  { %2423 = vmatprep.subr.bf16.mxu0 %v2705_v5 }
 0x3d8   :  { %2396 = vmatmul.mubr.msk.bf16.vlgmr.msra.gmra.mxu1 %vm636_vm7, %v914_v15 }
 0x3d9   :  { %2406 = vmatpush3.bf16.msra.mxu1 %v815_v60  ;;  %2407 = vmatprep.mubr.msk.bf16.mxu1 %vm2706_vm1, %v2705_v5  ;;  %v2507_v60 = vld [vmem:[%s3476_s5] ss:$0 sps:$4 sm:$0xff]  }
 0x3da   :  { %2417 = vmatprep.subr.bf16.mxu1 %v2705_v5 }
 0x436   :  { %v1013_v2 = vpop.permute.xlu1 %1012 }
 0x437   :  { %v1015_v4 = vsel %vm734_vm8, %v1013_v2, 0.0 }
 0x438   :  { %1016 = vadd.xlane.f32.xlu0 %v1015_v4 }
 0x48c   :  { %v897_v34 = vpop.f32.mrf.mxu0 }
 0x48d   :  { %v3121_v36 = vadd.f32 %v897_v34, %v808_v32 }
 0x48e   :  { %v2391_v37 = vpop.f32.mrf.mxu0 }
 0x490   :  { %v851_v39 = vpop.f32.mrf.mxu1  ;;  %v900_v41 = vpop.f32.mrf.mxu0 }
 0x491   :  { %v3125_v44 = vadd.f32 %v851_v39, %v807_v42 }
 0x492   :  { %v2385_v45 = vpop.f32.mrf.mxu1  ;;  %v2392_v47 = vpop.f32.mrf.mxu0 }
 0x494   :  { %v854_v48 = vpop.f32.mrf.mxu1  ;;  %v998_v49 = vpop.f32.mrf.mxu0 }
 0x495   :  { %v1005_v50 = vsel %vm3043_vm9, %v998_v49, -1e+30 }
 0x496   :  { %v2386_v51 = vpop.f32.mrf.mxu1  ;;  %v2403_v43 = vpop.f32.mrf.mxu0  ;;  %v1032_v52 = vsel %vm749_vm10, %v1005_v50, -inf }
 0x497   :  { %1033 = vmax.xlane.f32.xlu1 %v1032_v52 }
 0x498   :  { %v952_v38 = vpop.f32.mrf.mxu1  ;;  %v1001_v53 = vpop.f32.mrf.mxu0 }
 0x499   :  { %v1004_v54 = vsel %vm3043_vm9, %v952_v38, -1e+30 }
 0x49a   :  { %v2397_v55 = vpop.f32.mrf.mxu1  ;;  %v2404_v56 = vpop.f32.mrf.mxu0  ;;  %v1029_v57 = vsel %vm749_vm10, %v1004_v54, -inf }
 0x49b   :  { %1030 = vmax.xlane.f32.xlu0 %v1029_v57 }
 0x49c   :  { %v955_v58 = vpop.f32.mrf.mxu1 }
 0x49e   :  { %v2398_v59 = vpop.f32.mrf.mxu1 }
 0x4a8   :  { %1169 = vrot.lane.b32.xlu1 %v2507_v60, %s2708_s29 }
 0x4ac   :  { %1217 = vrot.lane.b32.xlu1 %v2998_v19, %s2710_s8 }
 0x4b0   :  { %1272 = vrot.lane.b32.xlu1 %v3076_v20, %s2710_s8 }
 0x4b1   :  { %1222 = vrot.lane.b32.xlu0 %v2508_v62, %s2708_s29 }
 0x4b5   :  { %1164 = vrot.lane.b32.xlu0 %v2993_v17, %s2710_s8 }
 0x4c1   :  { %v1017_v63 = vpop.xlane.xlu0 %1016 }
 0x4c2   :  { %v1026_v0 = vrot.slane %v1017_v63, %v3068_v61  ;;  %v1022_v7 = vrot.slane %v1017_v63, %v3072_v1 }
 0x520   :  { %v1034_v3 = vpop.xlane.xlu1 %1033 }
 0x521   :  { %v1036_v6 = vmax.f32 %v1034_v3, %v1026_v0 }
 0x523   :  { %v1038_v8 = vsub.f32 %v1005_v50, %v1036_v6  ;;  %v1044_v9 = vsub.f32 %v1026_v0, %v1036_v6 }
 0x524   :  { %v1170_v10 = vpop.permute.xlu1 %1169  ;;  %v1031_v11 = vpop.xlane.xlu0 %1030 }
 0x525   :  { %v1041_v12 = vmul.f32 1.442695, %v1038_v8  ;;  %v1035_v14 = vmax.f32 %v1031_v11, %v1022_v7  ;;  %v3161_v28 = vsel %vm636_vm7, %v1170_v10, 0  ;;  %v1047_v34 = vmul.f32 1.442695, %v1044_v9 }
 0x526   :  { %v2509_v8 = vld [vmem:[%s3480_s30] ss:$0 sps:$4 sm:$0xff]   ;;  %v2510_v9 = vld [vmem:[%s3480_s30 + $0x4] ss:$0 sps:$4 sm:$0xff]  }
 0x527   :  { %2561 = vpow2.f32 %v1041_v12  ;;  %v1037_v15 = vsub.f32 %v1004_v54, %v1035_v14  ;;  %v1043_v16 = vsub.f32 %v1022_v7, %v1035_v14 }
 0x528   :  { %v1218_v18 = vpop.permute.xlu1 %1217  ;;  %v1223_v2 = vpop.permute.xlu0 %1222 }
 0x529   :  { %v1039_v20 = vmul.f32 1.442695, %v1037_v15  ;;  %v3150_v4 = vsel %vm636_vm7, %v1223_v2, 0  ;;  %v1045_v37 = vmul.f32 1.442695, %v1043_v16 }
 0x52b   :  { %2563 = vpow2.f32 %v1039_v20 }
 0x52c   :  { %v1273_v21 = vpop.permute.xlu1 %1272  ;;  %v1165_v32 = vpop.permute.xlu0 %1164  ;;  %2565 = vpow2.f32 %v1047_v34 }
 0x52d   :  { %v1275_v23 = vsel %vm734_vm8, %v1273_v21, 0.0  ;;  %2567 = vpow2.f32 %v1045_v37 }
 0x52e   :  { %1276 = vadd.xlane.f32.xlu0 %v1275_v23 }
 0x534   :  { %v3147_v24 = vpop.eup %2561 }
 0x535   :  { %v1060_v25 = vpack.c.bf16 %v3147_v24, %v3147_v24 }
 0x537   :  { %2414 = vmatmul.mubr.msk.bf16.vlgmr.msra.gmra.mxu0 %vm809_vm12, %v1060_v25 }
 0x538   :  { %v3155_v27 = vpop.eup %2563  ;;  %2424 = vmatpush3.bf16.xpose.msra.mxu0 %v3150_v4  ;;  %2425 = vmatprep.mubr.msk.bf16.mxu0 %vm2706_vm1, %v2705_v5 }
 0x539   :  { %v1059_v29 = vpack.c.bf16 %v3155_v27, %v3155_v27  ;;  %2435 = vmatprep.subr.bf16.mxu0 %v2705_v5  ;;  %v3177_v42 = vpop.eup %2565 }
 0x53a   :  { %v1062_v39 = vmul.f32 %v3177_v42, %v3112_v31  ;;  %v3181_v41 = vpop.eup %2567 }
 0x53b   :  { %2408 = vmatmul.mubr.msk.bf16.vlgmr.msra.gmra.mxu1 %vm809_vm12, %v1059_v29  ;;  %v1061_v49 = vmul.f32 %v3181_v41, %v3119_v35 }
 0x53c   :  { %2418 = vmatpush3.bf16.xpose.msra.mxu1 %v3161_v28  ;;  %2419 = vmatprep.mubr.msk.bf16.mxu1 %vm2706_vm1, %v2705_v5 }
 0x53d   :  { %2429 = vmatprep.subr.bf16.mxu1 %v2705_v5 }
 0x53f   :  { %2426 = vmatmul.mubr.msk.bf16.vlgmr.msra.gmra.mxu0 %vm636_vm7, %v1218_v18 }
 0x540   :  { %2437 = vmatprep.mubr.msk.bf16.mxu0 %vm2706_vm1, %v2705_v5 }
 0x543   :  { %2420 = vmatmul.mubr.msk.bf16.vlgmr.msra.gmra.mxu1 %vm636_vm7, %v1165_v32 }
 0x544   :  { %2431 = vmatprep.mubr.msk.bf16.mxu1 %vm2706_vm1, %v2705_v5 }
 0x5b7   :  { %v1277_v10 = vpop.xlane.xlu0 %1276 }
 0x5b8   :  { %v3210_v11 = vrot.slane %v1277_v10, %v3068_v61  ;;  %v3216_v14 = vrot.slane %v1277_v10, %v3072_v1 }
 0x5f7   :  { %v1143_v45 = vpop.f32.mrf.mxu0 }
 0x5f8   :  { %v3183_v47 = vadd.f32 %v1143_v45, %v1062_v39 }
 0x5f9   :  { %v2415_v48 = vpop.f32.mrf.mxu0 }
 0x5fb   :  { %v1100_v50 = vpop.f32.mrf.mxu1  ;;  %v1146_v51 = vpop.f32.mrf.mxu0 }
 0x5fc   :  { %v3187_v43 = vadd.f32 %v1100_v50, %v1061_v49 }
 0x5fd   :  { %v2409_v52 = vpop.f32.mrf.mxu1  ;;  %v2416_v38 = vpop.f32.mrf.mxu0 }
 0x5ff   :  { %v1103_v53 = vpop.f32.mrf.mxu1  ;;  %v1264_v54 = vpop.f32.mrf.mxu0 }
 0x600   :  { %v1271_v55 = vsel %vm3043_vm9, %v1264_v54, -1e+30 }
 0x601   :  { %v2410_v56 = vpop.f32.mrf.mxu1  ;;  %v2427_v57 = vpop.f32.mrf.mxu0  ;;  %v1292_v58 = vsel %vm749_vm10, %v1271_v55, -inf }
 0x602   :  { %1293 = vmax.xlane.f32.xlu1 %v1292_v58 }
 0x603   :  { %v1211_v59 = vpop.f32.mrf.mxu1  ;;  %v1267_v60 = vpop.f32.mrf.mxu0 }
 0x604   :  { %v1270_v62 = vsel %vm3043_vm9, %v1211_v59, -1e+30 }
 0x605   :  { %v2421_v63 = vpop.f32.mrf.mxu1  ;;  %v2428_v0 = vpop.f32.mrf.mxu0  ;;  %v1289_v3 = vsel %vm749_vm10, %v1270_v62, -inf }
 0x606   :  { %1290 = vmax.xlane.f32.xlu0 %v1289_v3 }
 0x607   :  { %v1214_v6 = vpop.f32.mrf.mxu1 }
 0x609   :  { %v2422_v7 = vpop.f32.mrf.mxu1 }
 0x613   :  { %1340 = vrot.lane.b32.xlu1 %v2509_v8, %s2708_s29 }
 0x617   :  { %1495 = vrot.lane.b32.xlu1 %v2998_v19, %s2711_s2 }
 0x61b   :  { %1542 = vrot.lane.b32.xlu1 %v3012_v26, %s2712_s25 }
 0x61c   :  { %1391 = vrot.lane.b32.xlu0 %v2510_v9, %s2708_s29 }
 0x620   :  { %1450 = vrot.lane.b32.xlu0 %v2993_v17, %s2711_s2 }
 0x68b   :  { %v1294_v12 = vpop.xlane.xlu1 %1293 }
 0x68c   :  { %v3213_v19 = vmax.f32 %v1294_v12, %v3210_v11 }
 0x68e   :  { %v1298_v15 = vsub.f32 %v1271_v55, %v3213_v19  ;;  %v1304_v26 = vsub.f32 %v3210_v11, %v3213_v19  ;;  %v2512_v19 = vld [vmem:[#allocation8 + $0x10] sm:$0xff]  }
 0x68f   :  { %v1341_v16 = vpop.permute.xlu1 %1340  ;;  %v1291_v18 = vpop.xlane.xlu0 %1290 }
 0x690   :  { %v1301_v20 = vmul.f32 1.442695, %v1298_v15  ;;  %v1346_v17 = vsel %vm813_vm11, %v1341_v16, 0  ;;  %v3223_v21 = vmax.f32 %v1291_v18, %v3216_v14  ;;  %v1052_v15 = vsel %vm749_vm10, %v3147_v24, 0.0 }
 0x691   :  { %2430 = vmatpush3.bf16.msra.mxu1 %v1346_v17  ;;  %v1049_v16 = vsel %vm749_vm10, %v3155_v27, 0.0 }
 0x692   :  { %2569 = vpow2.f32 %v1301_v20  ;;  %v1297_v23 = vsub.f32 %v1270_v62, %v3223_v21  ;;  %v1303_v2 = vsub.f32 %v3216_v14, %v3223_v21  ;;  %2441 = vmatprep.subr.bf16.mxu1 %v2705_v5  ;;  %v770_v20 = vsel %vm749_vm10, %v3085_v22, 0.0 }
 0x693   :  { %v1496_v25 = vpop.permute.xlu1 %1495  ;;  %v1392_v29 = vpop.permute.xlu0 %1391 }
 0x694   :  { %v1299_v32 = vmul.f32 1.442695, %v1297_v23  ;;  %v1397_v34 = vsel %vm813_vm11, %v1392_v29, 0 }
 0x695   :  { %2436 = vmatpush3.bf16.msra.mxu0 %v1397_v34 }
 0x696   :  { %2571 = vpow2.f32 %v1299_v32  ;;  %2447 = vmatprep.subr.bf16.mxu0 %v2705_v5 }
 0x697   :  { %v1543_v37 = vpop.permute.xlu1 %1542 }
 0x698   :  { %v1545_v39 = vmul.f32 %v1543_v37, %v2988_v13  ;;  %v1451_v13 = vpop.permute.xlu0 %1450 }
 0x69a   :  { %1547 = vrot.lane.b32.xlu0 %v1545_v39, %s2711_s2 }
 0x69f   :  { %v2570_v45 = vpop.eup %2569 }
 0x6a0   :  { %v1320_v48 = vpack.c.bf16 %v2570_v45, %v2570_v45  ;;  %v1312_v51 = vsel %vm749_vm10, %v2570_v45, 0.0 }
 0x6a2   :  { %2438 = vmatmul.mubr.msk.bf16.vlgmr.msra.gmra.mxu0 %vm809_vm12, %v1320_v48 }
 0x6a3   :  { %v2572_v49 = vpop.eup %2571  ;;  %2448 = vmatpush3.bf16.xpose.msra.mxu0 %v3150_v4  ;;  %2449 = vmatprep.mubr.msk.bf16.mxu0 %vm2706_vm1, %v2705_v5 }
 0x6a4   :  { %v1319_v50 = vpack.c.bf16 %v2572_v49, %v2572_v49  ;;  %2459 = vmatprep.subr.bf16.mxu0 %v2705_v5  ;;  %v1309_v18 = vsel %vm749_vm10, %v2572_v49, 0.0 }
 0x6a6   :  { %2432 = vmatmul.mubr.msk.bf16.vlgmr.msra.gmra.mxu1 %vm809_vm12, %v1319_v50 }
 0x6a7   :  { %2442 = vmatpush3.bf16.xpose.msra.mxu1 %v3161_v28  ;;  %2443 = vmatprep.mubr.msk.bf16.mxu1 %vm2706_vm1, %v2705_v5 }
 0x6a8   :  { %2453 = vmatprep.subr.bf16.mxu1 %v2705_v5 }
 0x6aa   :  { %2450 = vmatmul.mubr.msk.bf16.vlgmr.msra.gmra.mxu0 %vm636_vm7, %v1496_v25 }
 0x6ab   :  { %2460 = vmatpush3.bf16.msra.mxu0 %v1397_v34  ;;  %2461 = vmatprep.mubr.msk.bf16.mxu0 %vm2706_vm1, %v2705_v5 }
 0x6ae   :  { %2444 = vmatmul.mubr.msk.bf16.vlgmr.msra.gmra.mxu1 %vm636_vm7, %v1451_v13 }
 0x6af   :  { %2454 = vmatpush3.bf16.msra.mxu1 %v1346_v17  ;;  %2455 = vmatprep.mubr.msk.bf16.mxu1 %vm2706_vm1, %v2705_v5 }
 0x6b0   :  { %2465 = vmatprep.subr.bf16.mxu1 %v2705_v5 }
 0x70c   :  { %v1548_v4 = vpop.permute.xlu0 %1547 }
 0x70d   :  { %v1550_v28 = vsel %vm734_vm8, %v1548_v4, 0.0 }
 0x70e   :  { %1551 = vadd.xlane.f32.xlu1 %v1550_v28 }
 0x712   :  { %1313 = vadd.xlane.f32.xlu1 %v1312_v51 }
 0x762   :  { %v3252_v52 = vpop.f32.mrf.mxu0 }
 0x764   :  { %v2439_v38 = vpop.f32.mrf.mxu0 }
 0x766   :  { %v3254_v53 = vpop.f32.mrf.mxu1  ;;  %v1436_v54 = vpop.f32.mrf.mxu0 }
 0x768   :  { %v2433_v55 = vpop.f32.mrf.mxu1  ;;  %v2440_v56 = vpop.f32.mrf.mxu0 }
 0x76a   :  { %v1385_v57 = vpop.f32.mrf.mxu1  ;;  %v1534_v58 = vpop.f32.mrf.mxu0 }
 0x76b   :  { %v1541_v59 = vsel %vm3043_vm9, %v1534_v58, -1e+30 }
 0x76c   :  { %v2434_v60 = vpop.f32.mrf.mxu1  ;;  %v2451_v62 = vpop.f32.mrf.mxu0  ;;  %v1567_v63 = vsel %vm749_vm10, %v1541_v59, -inf }
 0x76d   :  { %1568 = vmax.xlane.f32.xlu0 %v1567_v63 }
 0x76e   :  { %v1489_v0 = vpop.f32.mrf.mxu1  ;;  %v1537_v3 = vpop.f32.mrf.mxu0 }
 0x76f   :  { %v1540_v6 = vsel %vm3043_vm9, %v1489_v0, -1e+30 }
 0x770   :  { %v2445_v7 = vpop.f32.mrf.mxu1  ;;  %v2452_v8 = vpop.f32.mrf.mxu0  ;;  %v1564_v9 = vsel %vm749_vm10, %v1540_v6, -inf }
 0x771   :  { %1565 = vmax.xlane.f32.xlu0 %v1564_v9 }
 0x772   :  { %v1492_v10 = vpop.f32.mrf.mxu1 }
 0x773   :  { %v2511_v10 = vld [vmem:[#allocation8 + $0x18] sm:$0xff]  }
 0x774   :  { %v2446_v12 = vpop.f32.mrf.mxu1 }
 0x775   :  { %1053 = vadd.xlane.f32.xlu0 %v1052_v15 }
 0x779   :  { %1050 = vadd.xlane.f32.xlu0 %v1049_v16 }
 0x77d   :  { %1310 = vadd.xlane.f32.xlu0 %v1309_v18 }
 0x793   :  { %1331 = vrot.lane.b32.xlu0 %v1328_v46, %s2708_s29 }
 0x797   :  { %v1552_v17 = vpop.xlane.xlu1 %1551 }
 0x798   :  { %v3273_v24 = vrot.slane %v1552_v17, %v3068_v61  ;;  %v3279_v25 = vrot.slane %v1552_v17, %v3072_v1 }
 0x7b2   :  { %771 = vadd.xlane.f32.xlu0 %v770_v20 }
 0x7f6   :  { %v1569_v23 = vpop.xlane.xlu0 %1568 }
 0x7f7   :  { %v3276_v27 = vmax.f32 %v1569_v23, %v3273_v24 }
 0x7f9   :  { %v1573_v29 = vsub.f32 %v1541_v59, %v3276_v27  ;;  %v1579_v31 = vsub.f32 %v3273_v24, %v3276_v27  ;;  %v1324_v59 = vrot.slane %v3119_v35, %v3072_v1  ;;  %v1307_v1 = vmul.f32 1.442695, %v1304_v26 }
 0x7fa   :  { %v1566_v32 = vpop.xlane.xlu0 %1565  ;;  %v1305_v35 = vmul.f32 1.442695, %v1303_v2 }
 0x7fb   :  { %v1576_v34 = vmul.f32 1.442695, %v1573_v29  ;;  %v3285_v22 = vmax.f32 %v1566_v32, %v3279_v25 }
 0x7fd   :  { %2573 = vpow2.f32 %v1576_v34  ;;  %v1572_v61 = vsub.f32 %v1540_v6, %v3285_v22  ;;  %v1578_v37 = vsub.f32 %v3279_v25, %v3285_v22  ;;  %v2513_v34 = vld [vmem:[#allocation8 + $0x8] sm:$0xff]  }
 0x7fe   :  { %v1054_v39 = vpop.xlane.xlu0 %1053 }
 0x7ff   :  { %v1574_v45 = vmul.f32 1.442695, %v1572_v61  ;;  %v1056_v48 = vadd.f32 %v3177_v42, %v1054_v39  ;;  %v1580_v17 = vmul.f32 1.442695, %v1578_v37  ;;  %v2514_v39 = vld [vmem:[#allocation8] sm:$0xff]  }
 0x801   :  { %2575 = vpow2.f32 %v1574_v45 }
 0x802   :  { %v1051_v49 = vpop.xlane.xlu0 %1050  ;;  %2577 = vrcp.f32 %v1056_v48 }
 0x803   :  { %v1055_v50 = vadd.f32 %v3181_v41, %v1051_v49 }
 0x805   :  { %2579 = vrcp.f32 %v1055_v50 }
 0x80a   :  { %v2574_v13 = vpop.eup %2573 }
 0x80b   :  { %v1595_v4 = vpack.c.bf16 %v2574_v13, %v2574_v13  ;;  %v1587_v41 = vsel %vm749_vm10, %v2574_v13, 0.0 }
 0x80d   :  { %2462 = vmatmul.mubr.msk.bf16.vlgmr.msra.gmra.mxu0 %vm809_vm12, %v1595_v4 }
 0x80e   :  { %v2576_v28 = vpop.eup %2575 }
 0x80f   :  { %v1584_v51 = vsel %vm749_vm10, %v2576_v28, 0.0  ;;  %v1594_v38 = vpack.c.bf16 %v2576_v28, %v2576_v28  ;;  %v2578_v54 = vpop.eup %2577 }
 0x810   :  { %1585 = vadd.xlane.f32.xlu1 %v1584_v51  ;;  %v1150_v42 = vmul.f32 %v2578_v54, %v3183_v47  ;;  %v1311_v47 = vpop.xlane.xlu0 %1310 }
 0x811   :  { %2456 = vmatmul.mubr.msk.bf16.vlgmr.msra.gmra.mxu1 %vm809_vm12, %v1594_v38 }
 0x812   :  { %v2580_v55 = vpop.eup %2579  ;;  %2473 = vmatprep.mubr.msk.bf16.mxu1 %vm2706_vm1, %v2705_v5  ;;  %v1153_v57 = vrot.slane %v1150_v42, 7  ;;  %2466 = vmatpush3.bf16.msra.mxu1 %v2511_v10  ;;  %vm1693_vm1 = vcmask 517504   ;;  %v2521_v10 = vld [vmem:[%s3457_s16 + $0x20] ss:$8 sps:$4 sm:$0xff]  }
 0x813   :  { %v1149_v56 = vmul.f32 %v2580_v55, %v3187_v43  ;;  %v773_v43 = vsel %vm749_vm10, %v3080_v40, 0.0  ;;  %2467 = vmatprep.subr.bf16.mxu1 %v2705_v5 }
 0x814   :  { %1588 = vadd.xlane.f32.xlu1 %v1587_v41  ;;  %v1332_v60 = vpop.permute.xlu0 %1331 }
 0x815   :  { %v1154_v58 = vsel %vm908_vm13, %v1153_v57, %v1149_v56 }
 0x816   :  { %1155 = vrot.lane.b32.xlu0 %v1154_v58, %s2709_s23  ;;  %2468 = vmatpush3.bf16.msra.mxu1 %v2512_v19  ;;  %v2532_v19 = vld [vmem:[%s3458_s17 + $0x14] ss:$8 sps:$4 sm:$0xff]  }
 0x817   :  { %2469 = vmatprep.subr.bf16.mxu1 %v2705_v5 }
 0x81a   :  { %2470 = vmatpush3.bf16.msra.mxu1 %v2513_v34 }
 0x81b   :  { %2471 = vmatprep.subr.bf16.mxu1 %v2705_v5 }
 0x81e   :  { %2472 = vmatpush3.bf16.msra.mxu1 %v2514_v39  ;;  %v2541_v39 = vld [vmem:[%s3459_s18 + $0x28] sm:$0xff]  }
 0x825   :  { %1329 = vrot.lane.b32.xlu1 %v1324_v59, %s2708_s29 }
 0x83b   :  { %v772_v62 = vpop.xlane.xlu0 %771 }
 0x83c   :  { %v776_v63 = vadd.f32 %v3116_v33, %v772_v62  ;;  %v1314_v33 = vpop.xlane.xlu1 %1313 }
 0x83e   :  { %2581 = vrcp.f32 %v776_v63  ;;  %v2611_v63 = vld [vmem:[%s3472_s3] sm:$0x3] }
 0x83f   :  { %2583 = vpow2.f32 %v1307_v1 }
 0x840   :  { %2585 = vpow2.f32 %v1305_v35 }
 0x849   :  { %774 = vadd.xlane.f32.xlu1 %v773_v43 }
 0x84b   :  { %v2582_v0 = vpop.eup %2581 }
 0x84c   :  { %v3309_v3 = vmul.f32 %v2582_v0, %v3125_v44  ;;  %v2584_v6 = vpop.eup %2583 }
 0x84d   :  { %v1316_v7 = vadd.f32 %v2584_v6, %v1314_v33  ;;  %v2586_v8 = vpop.eup %2585  ;;  %v1336_v44 = vmul.f32 %v2584_v6, %v1332_v60  ;;  %v2515_v6 = vld [vmem:[%s3457_s16 + $0x30] ss:$8 sps:$4 sm:$0xff]  }
 0x84e   :  { %v1315_v40 = vadd.f32 %v2586_v8, %v1311_v47 }
 0x84f   :  { %2587 = vrcp.f32 %v1316_v7  ;;  %v1434_v11 = vadd.f32 %v3252_v52, %v1336_v44  ;;  %v1582_v52 = vmul.f32 1.442695, %v1579_v31  ;;  %v2517_v7 = vld [vmem:[%s3457_s16 + $0x34] ss:$8 sps:$4 sm:$0xff]   ;;  %v2526_v44 = vld [vmem:[%s3458_s17 + $0x24] ss:$8 sps:$4 sm:$0xff]  }
 0x850   :  { %2589 = vrcp.f32 %v1315_v40  ;;  %v2520_v40 = vld [vmem:[%s3458_s17 + $0x34] ss:$8 sps:$4 sm:$0xff]   ;;  %1849 = vmatprep.subr.bf16.mxu0 %v2517_v7 }
 0x851   :  { %2591 = vpow2.f32 %v1582_v52  ;;  %1938 = vmatprep.subr.bf16.mxu1 %v2520_v40  ;;  %1850 = vmatpush1.bf16.msra.mxu0 %v2515_v6 }
 0x852   :  { %2593 = vpow2.f32 %v1580_v17 }
 0x85c   :  { %v2588_v14 = vpop.eup %2587 }
 0x85d   :  { %v1440_v21 = vmul.f32 %v2588_v14, %v1434_v11  ;;  %v2590_v16 = vpop.eup %2589  ;;  %v2529_v11 = vld [vmem:[%s3457_s16 + $0x14] ss:$8 sps:$4 sm:$0xff]   ;;  %v2714_v14 = vmov 0  }
 0x85e   :  { %v2592_v23 = vpop.eup %2591  ;;  %1873 = vmatprep.mubr.bf16.mxu0 %v2714_v14 }
 0x85f   :  { %v1443_v46 = vrot.slane %v1440_v21, 7  ;;  %v1597_v61 = vmul.f32 %v2592_v23, %v1332_v60  ;;  %v2530_v21 = vld [vmem:[%s3458_s17 + $0x10] ss:$8 sps:$4 sm:$0xff]  }
 0x899   :  { %v1586_v9 = vpop.xlane.xlu1 %1585 }
 0x89d   :  { %v1589_v12 = vpop.xlane.xlu1 %1588 }
 0x89e   :  { %v1591_v29 = vadd.f32 %v2592_v23, %v1589_v12  ;;  %v2524_v12 = vld [vmem:[%s3458_s17 + $0x20] ss:$8 sps:$4 sm:$0xff]  }
 0x89f   :  { %v2203_v23 = vld [vmem:[%s3481_s20] ss:$0 sm:$0xff] }
 0x8a0   :  { %2595 = vrcp.f32 %v1591_v29 }
 0x8a1   :  { %v1330_v26 = vpop.permute.xlu1 %1329 }
 0x8a2   :  { %v1335_v2 = vmul.f32 %v2586_v8, %v1330_v26  ;;  %v2518_v8 = vld [vmem:[%s3458_s17 + $0x30] ss:$8 sps:$4 sm:$0xff]  }
 0x8a4   :  { %v1383_v15 = vadd.f32 %v3254_v53, %v1335_v2  ;;  %v2594_v53 = vpop.eup %2593  ;;  %v2535_v2 = vld [vmem:[%s3457_s16 + $0x4] ss:$8 sps:$4 sm:$0xff]  }
 0x8a5   :  { %v1590_v32 = vadd.f32 %v2594_v53, %v1586_v9  ;;  %v1596_v48 = vmul.f32 %v2594_v53, %v1330_v26  ;;  %v2523_v9 = vld [vmem:[%s3457_s16 + $0x24] ss:$8 sps:$4 sm:$0xff]   ;;  %v2527_v26 = vld [vmem:[%s3457_s16 + $0x10] ss:$8 sps:$4 sm:$0xff]  }
 0x8a6   :  { %v1439_v18 = vmul.f32 %v2590_v16, %v1383_v15  ;;  %1851 = vmatprep.subr.bf16.mxu0 %v2523_v9  ;;  %v2538_v15 = vld [vmem:[%s3458_s17 + $0x4] ss:$8 sps:$4 sm:$0xff]   ;;  %v2533_v16 = vld [vmem:[%s3457_s16] ss:$8 sps:$4 sm:$0xff]  }
 0x8a7   :  { %2597 = vrcp.f32 %v1590_v32  ;;  %1852 = vmatpush1.bf16.msra.mxu0 %v2521_v10  ;;  %v2539_v32 = vld [vmem:[%s3459_s18 + $0x38] sm:$0xff]  }
 0x8a8   :  { %v1444_v20 = vsel %vm908_vm13, %v1443_v46, %v1439_v18  ;;  %1853 = vmatprep.subr.bf16.mxu0 %v2529_v11  ;;  %v2536_v18 = vld [vmem:[%s3458_s17] ss:$8 sps:$4 sm:$0xff]  }
 0x8a9   :  { %1445 = vrot.lane.b32.xlu1 %v1444_v20, %s2712_s25 }
 0x8ab   :  { %1854 = vmatpush1.bf16.msra.mxu0 %v2527_v26 }
 0x8ac   :  { %1855 = vmatprep.subr.bf16.mxu0 %v2535_v2 }
 0x8ad   :  { %v2596_v27 = vpop.eup %2595 }
 0x8af   :  { %1856 = vmatpush1.bf16.msra.mxu0 %v2533_v16 }
 0x8b0   :  { %2088 = vmatprep.subr.bf16.mxu0 %v2714_v14 }
 0x8b4   :  { %v2598_v13 = vpop.eup %2597 }
 0x8cd   :  { %v1678_v45 = vpop.f32.mrf.mxu0 }
 0x8ce   :  { %v1679_v24 = vadd.f32 %v1678_v45, %v1597_v61  ;;  %v2540_v61 = vld [vmem:[%s3459_s18 + $0x30] sm:$0xff]   ;;  %v2542_v45 = vld [vmem:[%s3459_s18 + $0x20] sm:$0xff]  }
 0x8cf   :  { %v2463_v31 = vpop.f32.mrf.mxu0 }
 0x8d0   :  { %v1685_v25 = vmul.f32 %v2596_v27, %v1679_v24  ;;  %v2543_v24 = vld [vmem:[%s3459_s18 + $0x18] sm:$0xff]   ;;  %v2544_v27 = vld [vmem:[%s3459_s18 + $0x10] sm:$0xff]   ;;  %v2545_v31 = vld [vmem:[%s3459_s18 + $0x8] sm:$0xff]  }
 0x8d1   :  { %v1635_v22 = vpop.f32.mrf.mxu1  ;;  %v1681_v37 = vpop.f32.mrf.mxu0 }
 0x8d2   :  { %v1636_v49 = vadd.f32 %v1635_v22, %v1596_v48  ;;  %v775_v50 = vpop.xlane.xlu1 %774  ;;  %v1688_v38 = vrot.slane %v1685_v25, 7  ;;  %v2546_v48 = vld [vmem:[%s3459_s18] sm:$0xff]   ;;  %v2547_v25 = vld [vmem:[%s3459_s18 + $0x58] sm:$0xff]   ;;  %v2548_v22 = vld [vmem:[%s3459_s18 + $0x50] sm:$0xff]  }
 0x8d3   :  { %v777_v4 = vadd.f32 %v3109_v30, %v775_v50  ;;  %v2457_v28 = vpop.f32.mrf.mxu1  ;;  %v2464_v51 = vpop.f32.mrf.mxu0  ;;  %v2549_v37 = vld [vmem:[%s3459_s18 + $0x48] sm:$0xff]  }
 0x8d4   :  { %v1684_v54 = vmul.f32 %v2598_v13, %v1636_v49  ;;  %v1156_v30 = vpop.permute.xlu0 %1155  ;;  %v2550_v49 = vld [vmem:[%s3459_s18 + $0x40] sm:$0xff]   ;;  %s2715_s18 = smov [#allocation11]  }
 0x8d5   :  { %2599 = vrcp.f32 %v777_v4  ;;  %v1638_v42 = vpop.f32.mrf.mxu1  ;;  %s2136_s15 = sshll.u32 %s2715_s18, 4  ;;  %s2137_s15 = int_to_ptr.vmem [resolvable:$true] %s2136_s15 }
 0x8d6   :  { %v1689_v5 = vsel %vm908_vm13, %v1688_v38, %v1684_v54  ;;  %s2672_s3 = scalar_lea.vmem %s2137_s15, 32  ;;  %p2677_p2 = scmp.lt.s32.totalorder %s2137_s15, %s2137_s15 }
 0x8d7   :  { %1690 = vrot.lane.b32.xlu1 %v1689_v5, %s2713_s26  ;;  %v2458_v55 = vpop.f32.mrf.mxu1  ;;  %p2673_p1 = scmp.ne.s32.totalorder %s2137_s15, %s2672_s3  ;;  %p2678_p3 = scmp.lt.s32.totalorder %s2672_s3, %s2672_s3 }
 0x8d9   :  { %p2679_p4 = por %p2678_p3, %p2677_p2 }
 0x8db   :  { %p2680_p5 = pnand %p2679_p4, %p2673_p1 }
 0x8e2   :  { %v2600_v41 = vpop.eup %2599 }
 0x8e3   :  { %v904_v56 = vmul.f32 %v2600_v41, %v3121_v36 }
 0x8e5   :  { %v907_v57 = vrot.slane %v904_v56, 7 }
 0x8e7   :  { %v909_v58 = vsel %vm908_vm13, %v907_v57, %v3309_v3 }
 0x8e8   :  { %911 = vst.msk [vmem:[#allocation2] sm:$0x3] %vm734_vm8, %v909_v58 }
 0x8e9   :  { %1159 = vst.msk [vmem:[#allocation2] sm:$0x3] %vm1158_vm14, %v1156_v30 }
 0x91b   :  { %v1446_v59 = vpop.permute.xlu1 %1445 }
 0x91c   :  { %1449 = vst.msk [vmem:[#allocation2] sm:$0x3] %vm1448_vm15, %v1446_v59 }
 0x949   :  { %v1691_v47 = vpop.permute.xlu1 %1690 }
 0x94a   :  { %1694 = vst.msk [vmem:[#allocation2] sm:$0x3] %vm1693_vm1, %v1691_v47 }
 0x951   :  { %v1695_v60 = vld [vmem:[#allocation2] sm:$0x3] }
 0x952   :  { %v1696_v62 = vpack.c.bf16 %v1695_v60, %v1695_v60 }
 0x954   :  { %2474 = vmatmul.mubr.msk.bf16.vlgmr.msra.gmra.mxu1 %vm160_vm2, %v1696_v62 }
 0x955   :  { %1939 = vmatpush1.bf16.msra.mxu1 %v2518_v8  ;;  %1962 = vmatprep.mubr.bf16.mxu1 %v2714_v14 }
 0x956   :  { %1940 = vmatprep.subr.bf16.mxu1 %v2526_v44 }
 0x959   :  { %1941 = vmatpush1.bf16.msra.mxu1 %v2524_v12 }
 0x95a   :  { %1942 = vmatprep.subr.bf16.mxu1 %v2532_v19 }
 0x95d   :  { %1943 = vmatpush1.bf16.msra.mxu1 %v2530_v21 }
 0x95e   :  { %1944 = vmatprep.subr.bf16.mxu1 %v2538_v15 }
 0x961   :  { %1945 = vmatpush1.bf16.msra.mxu1 %v2536_v18 }
 0xa14   :  { %v1766_v36 = vpop.f32.mrf.mxu1 }
 0xa15   :  { %v3340_v43 = vadd.f32 %v2611_v63, %v1766_v36 }
 0xa16   :  { %v2475_v0 = vpop.f32.mrf.mxu1 }
 0xa17   :  { %v1773_v3 = vmul.f32 %v3340_v43, %v3340_v43 }
 0xa18   :  { %v1769_v1 = vpop.f32.mrf.mxu1 }
 0xa19   :  { %v1774_v35 = vsel %vm110_vm0, %v1773_v3, 0.0 }
 0xa1a   :  { %1775 = vadd.xlane.f32.xlu1 %v1774_v35  ;;  %v2476_v33 = vpop.f32.mrf.mxu1 }
 0xaa3   :  { %v1776_v46 = vpop.xlane.xlu1 %1775 }
 0xaa4   :  { %v1777_v20 = vmul.f32 0.015625, %v1776_v46 }
 0xaa6   :  { %v1778_v52 = vadd.f32 1e-05, %v1777_v20 }
 0xaa8   :  { %2601 = vrsqrt.f32 %v1778_v52 }
 0xab5   :  { %v2602_v17 = vpop.eup %2601 }
 0xab6   :  { %v1780_v29 = vmul.f32 %v2602_v17, %v3340_v43 }
 0xab8   :  { %v1788_v53 = vmul.f32 %v2203_v23, %v1780_v29 }
 0xaba   :  { %v1789_v34 = vpack.c.bf16 %v1788_v53, %v1788_v53 }
 0xabc   :  { %2212 = vmatmul.mubr.msk.bf16.vlgmr.msra.gmra.mxu0 %vm160_vm2, %v1789_v34  ;;  %2221 = vmatmul.mubr.msk.bf16.vlgmr.msra.gmra.mxu1 %vm160_vm2, %v1789_v34 }
 0xabd   :  { %2089 = vmatpush1.bf16.msra.mxu0 %v2539_v32 }
 0xabe   :  { %2090 = vmatprep.subr.bf16.mxu0 %v2714_v14 }
 0xac1   :  { %2091 = vmatpush1.bf16.msra.mxu0 %v2540_v61 }
 0xac2   :  { %2092 = vmatprep.subr.bf16.mxu0 %v2714_v14 }
 0xac5   :  { %2093 = vmatpush1.bf16.msra.mxu0 %v2541_v39 }
 0xac6   :  { %2094 = vmatprep.subr.bf16.mxu0 %v2714_v14 }
 0xac9   :  { %2095 = vmatpush1.bf16.msra.mxu0 %v2542_v45 }
 0xaca   :  { %2096 = vmatprep.subr.bf16.mxu0 %v2714_v14 }
 0xacd   :  { %2097 = vmatpush1.bf16.msra.mxu0 %v2543_v24 }
 0xace   :  { %2098 = vmatprep.subr.bf16.mxu0 %v2714_v14 }
 0xad1   :  { %2099 = vmatpush1.bf16.msra.mxu0 %v2544_v27 }
 0xad2   :  { %2100 = vmatprep.subr.bf16.mxu0 %v2714_v14 }
 0xad5   :  { %2101 = vmatpush1.bf16.msra.mxu0 %v2545_v31 }
 0xad6   :  { %2102 = vmatprep.subr.bf16.mxu0 %v2714_v14 }
 0xad9   :  { %2103 = vmatpush1.bf16.msra.mxu0 %v2546_v48 }
 0xada   :  { %2112 = vmatprep.subr.bf16.mxu0 %v2714_v14 }
 0xadd   :  { %2113 = vmatpush2.bf16.msra.mxu0 %v2547_v25 }
 0xade   :  { %2114 = vmatprep.subr.bf16.mxu0 %v2714_v14 }
 0xae1   :  { %2115 = vmatpush2.bf16.msra.mxu0 %v2548_v22 }
 0xae2   :  { %2116 = vmatprep.subr.bf16.mxu0 %v2714_v14 }
 0xae5   :  { %2117 = vmatpush2.bf16.msra.mxu0 %v2549_v37 }
 0xae6   :  { %2118 = vmatprep.subr.bf16.mxu0 %v2714_v14 }
 0xae9   :  { %2119 = vmatpush2.bf16.msra.mxu0 %v2550_v49 }
 0xb7c   :  { %v1875_v50 = vpop.f32.mrf.mxu0  ;;  %v1964_v13 = vpop.f32.mrf.mxu1 }
 0xb7d   :  { %v2222_v4 = vmul.f32 -1.442695, %v1875_v50 }
 0xb7e   :  { %v1877_v28 = vpop.f32.mrf.mxu0  ;;  %v1966_v51 = vpop.f32.mrf.mxu1 }
 0xb7f   :  { %2603 = vpow2.f32 %v2222_v4  ;;  %v2223_v38 = vmul.f32 -1.442695, %v1877_v28 }
 0xb80   :  { %v1879_v54 = vpop.f32.mrf.mxu0  ;;  %v1968_v42 = vpop.f32.mrf.mxu1 }
 0xb81   :  { %2605 = vpow2.f32 %v2223_v38 }
 0xb82   :  { %v1880_v5 = vpop.f32.mrf.mxu0  ;;  %v1969_v55 = vpop.f32.mrf.mxu1 }
 0xb8c   :  { %v2604_v41 = vpop.eup %2603 }
 0xb8d   :  { %v1977_v56 = vadd.f32 1.0, %v2604_v41 }
 0xb8e   :  { %v2606_v57 = vpop.eup %2605 }
 0xb8f   :  { %2607 = vrcp.f32 %v1977_v56  ;;  %v1978_v58 = vadd.f32 1.0, %v2606_v57 }
 0xb91   :  { %2609 = vrcp.f32 %v1978_v58 }
 0xb9c   :  { %v2608_v30 = vpop.eup %2607 }
 0xb9d   :  { %v1983_v59 = vmul.f32 %v2608_v30, %v1875_v50 }
 0xb9e   :  { %v2610_v47 = vpop.eup %2609 }
 0xb9f   :  { %v1984_v60 = vmul.f32 %v2610_v47, %v1877_v28  ;;  %v1985_v62 = vmul.f32 %v1983_v59, %v1964_v13 }
 0xba1   :  { %v1986_v36 = vmul.f32 %v1984_v60, %v1966_v51  ;;  %v1987_v0 = vpack.c.bf16 %v1985_v62, %v1985_v62 }
 0xba3   :  { %v1988_v63 = vpack.c.bf16 %v1986_v36, %v1986_v36 }
 0xba5   :  { %2236 = vmatprep.mubr.msk.bf16.mxu0 %vm160_vm2, %v1988_v63 }
 0xba6   :  { %2121 = vmatmul.mubr.bf16.vlgmr.msra.gmra.mxu0 %v1987_v0 }
 0xc66   :  { %v2122_v3 = vpop.f32.mrf.mxu0 }
 0xc67   :  { %v2128_v1 = vadd.f32 %v2122_v3, %v3340_v43 }
 0xc68   :  { %v2124_v35 = vpop.f32.mrf.mxu0 }
 0xc69   :  { %2129 = vst.msk [vmem:[#allocation11] sm:$0x3] %vm110_vm0, %v2128_v1 }
 0xc6a   :  { %v2125_v33 = vpop.f32.mrf.mxu0 }
 0xc6b   :  { %2683 = shalt.err (!%p2680_p5)
}
 0xc6c   :  { %2139 = dma.vmem_to_hbm [thread:$0]  %s2137_s15, 32, %s3460_s19, [#allocation7]   ;;  %v2126_v6 = vpop.f32.mrf.mxu0 }
 0xc6d   :  { %2696 = dma.done.wait [#allocation7], 32  }
 0xc6e   :  { %2697 = vsyncadd [#allocation7], 4294967264 }
 0xc6f   :  { %2151 = vsyncpa [#allocation6], 1 }
 0xc70   :  { %2152 = vsyncpa [#allocation9], 1 }
 0xc71   :  { %2153 = vsyncpa [#allocation7], 1 }

</bundles_post_ra>
